<compile_context>
chip_gen: v7x
topology: tpu7x:2x2x1
jax: 0.10.0
libtpu: 0.0.40
codegen_flags: <defaults>
</compile_context>

<pallas_src>
import jax
import jax.numpy as jnp
from jax.experimental import pallas as pl
from jax.experimental.pallas import tpu as pltpu

D_IN = 1024
D_HID = 512
D_OUT = 1024

_SQRT_2_OVER_PI = 0.7978845608028654  # math.sqrt(2.0 / math.pi)


def _new_gelu(x):
    # HuggingFace NewGELUActivation (tanh approximation), computed in f32.
    return 0.5 * x * (1.0 + jnp.tanh(_SQRT_2_OVER_PI * (x + 0.044715 * x * x * x)))


def mlp4_kernel(x_ref, w1_ref, b1_ref, w2_ref, b2_ref, o_ref):
    # ll1: x @ W1 + b1 -> [tb, 512]; MXU runs in the input dtype (f32 or bf16),
    # accumulates in f32.
    h = jnp.dot(x_ref[...], w1_ref[...], preferred_element_type=jnp.float32)
    h = h + b1_ref[...].astype(jnp.float32)
    # NewGELU in f32 (accumulator dtype) — EUP tanh, VPU the rest.
    g = _new_gelu(h)
    # Dropout (eval mode) == identity.
    # ll2: g @ W2 + b2 -> [tb, 1024]; cast g back to weight dtype for the MXU.
    g = g.astype(w2_ref.dtype)
    y = jnp.dot(g, w2_ref[...], preferred_element_type=jnp.float32)
    y = y + b2_ref[...].astype(jnp.float32)
    o_ref[...] = y.astype(o_ref.dtype)


def _pick_tb(batch):
    """Largest MXU-friendly batch tile that divides B, capped at 512.

    512 rows keep total VMEM (double-buffered x/out tiles + resident weights +
    f32 intermediates) under the default scoped limit on v5e/v6e/v7x while
    filling the 128/256-wide MXU M dimension. Tiny batches fall through to a
    single grid step with the whole problem resident.
    """
    for cand in (512, 256, 128, 64, 32, 16, 8):
        if batch % cand == 0:
            return cand
    return batch  # odd/tiny batch: one grid step, block == full array


def mlp4_forward(x, w1, b1, w2, b2, *, tb=None):
    """x: [B, 1024]; w1: [1024, 512]; b1: [1, 512]; w2: [512, 1024]; b2: [1, 1024]."""
    B, d_in = x.shape
    assert d_in == D_IN
    if tb is None:
        tb = _pick_tb(B)
    assert B % tb == 0, "batch must be a multiple of the batch tile"
    grid = (B // tb,)

    def nbytes(a):
        return a.size * a.dtype.itemsize

    cost = pl.CostEstimate(
        flops=2 * B * D_IN * D_HID + 2 * B * D_HID * D_OUT,
        transcendentals=B * D_HID,  # one tanh per hidden activation
        bytes_accessed=(nbytes(x) + nbytes(w1) + nbytes(b1) + nbytes(w2)
                        + nbytes(b2) + B * D_OUT * x.dtype.itemsize),
    )

    return pl.pallas_call(
        mlp4_kernel,
        out_shape=jax.ShapeDtypeStruct((B, D_OUT), x.dtype),
        grid_spec=pltpu.PrefetchScalarGridSpec(
            num_scalar_prefetch=0,
            grid=grid,
            in_specs=[
                pl.BlockSpec((tb, D_IN), lambda i: (i, 0)),      # x tile
                pl.BlockSpec((D_IN, D_HID), lambda i: (0, 0)),   # W1 (resident)
                pl.BlockSpec((1, D_HID), lambda i: (0, 0)),      # b1
                pl.BlockSpec((D_HID, D_OUT), lambda i: (0, 0)),  # W2 (resident)
                pl.BlockSpec((1, D_OUT), lambda i: (0, 0)),      # b2
            ],
            out_specs=pl.BlockSpec((tb, D_OUT), lambda i: (i, 0)),
        ),
        compiler_params=pltpu.CompilerParams(
            dimension_semantics=("parallel",),  # shards grid across v7x's 2 TCs
        ),
        cost_estimate=cost,
    )(x, w1, b1, w2, b2)


def init_params(key, dtype=jnp.float32):
    """Deterministic init mimicking nn.Linear default (uniform +/- 1/sqrt(fan_in))."""
    k1, k2, k3, k4 = jax.random.split(key, 4)
    bound1 = 1.0 / jnp.sqrt(jnp.float32(D_IN))
    bound2 = 1.0 / jnp.sqrt(jnp.float32(D_HID))
    # Stored transposed relative to PyTorch: [in, out]
    w1 = jax.random.uniform(k1, (D_IN, D_HID), jnp.float32, -bound1, bound1)
    b1 = jax.random.uniform(k2, (1, D_HID), jnp.float32, -bound1, bound1)
    w2 = jax.random.uniform(k3, (D_HID, D_OUT), jnp.float32, -bound2, bound2)
    b2 = jax.random.uniform(k4, (1, D_OUT), jnp.float32, -bound2, bound2)
    return tuple(p.astype(dtype) for p in (w1, b1, w2, b2))


def mlp4_reference(x, w1, b1, w2, b2):
    x = x.astype(jnp.float32)
    h = _new_gelu(x @ w1 + b1)
    return h @ w2 + b2


if __name__ == "__main__":
    key = jax.random.PRNGKey(0)
    kx, kp = jax.random.split(key)

    # --- f32 path (small batch, single grid step; tight tolerance) ---
    B = 8
    x = jax.random.normal(kx, (B, D_IN), jnp.float32)
    w1, b1, w2, b2 = init_params(kp, jnp.float32)
    out = jax.block_until_ready(mlp4_forward(x, w1, b1, w2, b2))
    ref = mlp4_reference(x, w1, b1, w2, b2)
    assert out.shape == (B, D_OUT)
    assert jnp.allclose(out, ref, atol=1e-4, rtol=1e-4), "f32 mismatch vs reference"

    # --- bf16 path (v6e/v7x fast path: bf16 weights/activations, f32 accum) ---
    Bb = 64
    xb = jax.random.normal(kx, (Bb, D_IN), jnp.float32).astype(jnp.bfloat16)
    w1b, b1b, w2b, b2b = (p.astype(jnp.bfloat16) for p in (w1, b1, w2, b2))
    outb = jax.block_until_ready(mlp4_forward(xb, w1b, b1b, w2b, b2b))
    refb = mlp4_reference(xb, w1, b1, w2, b2)
    assert outb.shape == (Bb, D_OUT)
    assert jnp.allclose(outb.astype(jnp.float32), refb, atol=5e-2, rtol=5e-2), (
        "bf16 mismatch vs reference")

    print("KERNEL_OK")
</pallas_src>

<mosaic_0001>
module attributes {stable_mosaic.version = 11 : i64} {
  func.func @mlp4_kernel(%arg0: i32, %arg1: memref<8x1024xf32, #tpu.memory_space<vmem>>, %arg2: memref<1024x512xf32, #tpu.memory_space<vmem>>, %arg3: memref<1x512xf32, #tpu.memory_space<vmem>>, %arg4: memref<512x1024xf32, #tpu.memory_space<vmem>>, %arg5: memref<1x1024xf32, #tpu.memory_space<vmem>>, %arg6: memref<8x1024xf32, #tpu.memory_space<vmem>>) attributes {dimension_semantics = [#tpu.dimension_semantics<parallel>], iteration_bounds = array<i64: 1>, scalar_prefetch = 0 : i64, scratch_operands = 0 : i64, tpu.core_type = #tpu.core_type<tc>, window_params = [{transform_indices = @transform_0, window_bounds = array<i64: 8, 1024>}, {pipeline_mode = #tpu.pipeline_mode<synchronous>, transform_indices = @transform_1, window_bounds = array<i64: 1024, 512>}, {pipeline_mode = #tpu.pipeline_mode<synchronous>, transform_indices = @transform_2, window_bounds = array<i64: 1, 512>}, {pipeline_mode = #tpu.pipeline_mode<synchronous>, transform_indices = @transform_3, window_bounds = array<i64: 512, 1024>}, {pipeline_mode = #tpu.pipeline_mode<synchronous>, transform_indices = @transform_4, window_bounds = array<i64: 1, 1024>}, {transform_indices = @transform_5, window_bounds = array<i64: 8, 1024>}]} {
    %c0 = arith.constant 0 : index
    %c0_0 = arith.constant 0 : index
    %0 = vector.load %arg1[%c0, %c0_0] : memref<8x1024xf32, #tpu.memory_space<vmem>>, vector<8x1024xf32>
    %c0_1 = arith.constant 0 : index
    %c0_2 = arith.constant 0 : index
    %1 = vector.load %arg2[%c0_1, %c0_2] : memref<1024x512xf32, #tpu.memory_space<vmem>>, vector<1024x512xf32>
    %cst = arith.constant dense<0.000000e+00> : vector<8x512xf32>
    %2 = tpu.matmul %0, %1, %cst {dimension_numbers = #tpu.dot_dimension_numbers<[1], [0], [0], [1], [0, 0, 1, 1], [], []>} : vector<8x1024xf32>, vector<1024x512xf32>, vector<8x512xf32> -> vector<8x512xf32>
    %c0_3 = arith.constant 0 : index
    %c0_4 = arith.constant 0 : index
    %3 = vector.load %arg3[%c0_3, %c0_4] : memref<1x512xf32, #tpu.memory_space<vmem>>, vector<1x512xf32>
    %4 = vector.broadcast %3 : vector<1x512xf32> to vector<8x512xf32>
    %5 = arith.addf %2, %4 : vector<8x512xf32>
    %cst_5 = arith.constant 5.000000e-01 : f32
    %6 = vector.broadcast %cst_5 : f32 to vector<8x512xf32>
    %7 = arith.mulf %6, %5 : vector<8x512xf32>
    %cst_6 = arith.constant 4.471500e-02 : f32
    %8 = vector.broadcast %cst_6 : f32 to vector<8x512xf32>
    %9 = arith.mulf %8, %5 : vector<8x512xf32>
    %10 = arith.mulf %9, %5 : vector<8x512xf32>
    %11 = arith.mulf %10, %5 : vector<8x512xf32>
    %12 = arith.addf %5, %11 : vector<8x512xf32>
    %cst_7 = arith.constant 0.797884583 : f32
    %13 = vector.broadcast %cst_7 : f32 to vector<8x512xf32>
    %14 = arith.mulf %13, %12 : vector<8x512xf32>
    %15 = math.tanh %14 : vector<8x512xf32>
    %cst_8 = arith.constant 1.000000e+00 : f32
    %16 = vector.broadcast %cst_8 : f32 to vector<8x512xf32>
    %17 = arith.addf %16, %15 : vector<8x512xf32>
    %18 = arith.mulf %7, %17 : vector<8x512xf32>
    %c0_9 = arith.constant 0 : index
    %c0_10 = arith.constant 0 : index
    %19 = vector.load %arg4[%c0_9, %c0_10] : memref<512x1024xf32, #tpu.memory_space<vmem>>, vector<512x1024xf32>
    %cst_11 = arith.constant dense<0.000000e+00> : vector<8x1024xf32>
    %20 = tpu.matmul %18, %19, %cst_11 {dimension_numbers = #tpu.dot_dimension_numbers<[1], [0], [0], [1], [0, 0, 1, 1], [], []>} : vector<8x512xf32>, vector<512x1024xf32>, vector<8x1024xf32> -> vector<8x1024xf32>
    %c0_12 = arith.constant 0 : index
    %c0_13 = arith.constant 0 : index
    %21 = vector.load %arg5[%c0_12, %c0_13] : memref<1x1024xf32, #tpu.memory_space<vmem>>, vector<1x1024xf32>
    %22 = vector.broadcast %21 : vector<1x1024xf32> to vector<8x1024xf32>
    %23 = arith.addf %20, %22 : vector<8x1024xf32>
    %c0_14 = arith.constant 0 : index
    %c0_15 = arith.constant 0 : index
    %24 = vector.load %arg6[%c0_14, %c0_15] : memref<8x1024xf32, #tpu.memory_space<vmem>>, vector<8x1024xf32>
    tpu.vector_store %arg6[%c0_14, %c0_15], %23 {strides = array<i32>} : memref<8x1024xf32, #tpu.memory_space<vmem>>, vector<8x1024xf32>,
    return
  }
  func.func @transform_0(%arg0: i32) -> (i32, i32) {
    %c0_i32 = arith.constant 0 : i32
    %c0_i32_0 = arith.constant 0 : i32
    return %arg0, %c0_i32 : i32, i32
  }
  func.func @transform_1(%arg0: i32) -> (i32, i32) {
    %c0_i32 = arith.constant 0 : i32
    %c0_i32_0 = arith.constant 0 : i32
    %c0_i32_1 = arith.constant 0 : i32
    return %c0_i32, %c0_i32_0 : i32, i32
  }
  func.func @transform_2(%arg0: i32) -> (i32, i32) {
    %c0_i32 = arith.constant 0 : i32
    %c0_i32_0 = arith.constant 0 : i32
    %c0_i32_1 = arith.constant 0 : i32
    return %c0_i32, %c0_i32_0 : i32, i32
  }
  func.func @transform_3(%arg0: i32) -> (i32, i32) {
    %c0_i32 = arith.constant 0 : i32
    %c0_i32_0 = arith.constant 0 : i32
    %c0_i32_1 = arith.constant 0 : i32
    return %c0_i32, %c0_i32_0 : i32, i32
  }
  func.func @transform_4(%arg0: i32) -> (i32, i32) {
    %c0_i32 = arith.constant 0 : i32
    %c0_i32_0 = arith.constant 0 : i32
    %c0_i32_1 = arith.constant 0 : i32
    return %c0_i32, %c0_i32_0 : i32, i32
  }
  func.func @transform_5(%arg0: i32) -> (i32, i32) {
    %c0_i32 = arith.constant 0 : i32
    %c0_i32_0 = arith.constant 0 : i32
    return %arg0, %c0_i32 : i32, i32
  }
}

</mosaic_0001>

<bundles_post_ra>
// kernel: tpu_custom_call.1
= control target key start
LH: loop header
LB: loop body
LE: loop exit
PB: predicated region body
PF: predicated region fallthrough
CT: control target
= control target key end

     0   :  { %10 = vsyncpa [#allocation3], 0  ;;  %s3768_s0 = inlined_call_operand.hbm [shape: f32[8,1024], index: 0, kind: input, shape index: {}]   ;;  %s3769_s1 = inlined_call_operand.hbm [shape: f32[1024,512], index: 1, kind: input, shape index: {}]   ;;  %s3770_s2 = inlined_call_operand.hbm [shape: f32[1,512], index: 2, kind: input, shape index: {}]   ;;  %s3771_s3 = inlined_call_operand.hbm [shape: f32[512,1024], index: 3, kind: input, shape index: {}]   ;;  %s3772_s4 = inlined_call_operand.hbm [shape: f32[1,1024], index: 4, kind: input, shape index: {}]   ;;  %s3773_s5 = inlined_call_operand.hbm [shape: f32[8,1024], index: 5, kind: output, shape index: {}]  }
   0x1   :  { %11 = vsyncpa [#allocation6], 0 }
   0x2   :  { %12 = vsyncpa [#allocation9], 0 }
   0x3   :  { %13 = vsyncpa [#allocation4], 0  ;;  %s3590_s18 = smov [#allocation5]   ;;  %s3450_s22 = scalar_lea.hbm %s3769_s1, 65536 }
   0x4   :  { %s29_s19 = sshll.u32 %s3590_s18, 4  ;;  %p3451_p0 = scmp.ne.s32.totalorder %s3769_s1, %s3450_s22  ;;  %s30_s19 = int_to_ptr.vmem [resolvable:$true] %s29_s19 }
   0x5   :  { %p3454_p1 = scmp.lt.u32.totalorder %s3450_s22, %s3769_s1 }
   0x7   :  { %p3456_p2 = pnand %p3454_p1, %p3451_p0 }
   0x9   :  { %3459 = shalt.err (!%p3456_p2)
}
   0xa   :  { %s3460_s27 = scalar_lea.vmem %s30_s19, 65536  ;;  %p3465_p4 = scmp.lt.s32.totalorder %s30_s19, %s30_s19 }
   0xb   :  { %p3461_p3 = scmp.ne.s32.totalorder %s30_s19, %s3460_s27  ;;  %p3466_p5 = scmp.lt.s32.totalorder %s3460_s27, %s3460_s27 }
   0xd   :  { %p3467_p6 = por %p3466_p5, %p3465_p4 }
   0xf   :  { %p3468_p7 = pnand %p3467_p6, %p3461_p3 }
  0x11   :  { %3471 = shalt.err (!%p3468_p7)
}
  0x12   :  { %s3591_s28 = smov 512   ;;  %s3592_s29 = smov 32  }
  0x13   :  { %35 = dma.hbm_to_vmem [thread:$0]  %s3769_s1, 65536, %s30_s19, [#allocation6], %s3591_s28, %s3591_s28, %s3592_s29  }
  0x14   :  { %s3593_s7 = smov [#allocation8]   ;;  %s3472_s11 = scalar_lea.hbm %s3771_s3, 65536 }
  0x15   :  { %s51_s8 = sshll.u32 %s3593_s7, 4  ;;  %p3473_p8 = scmp.ne.s32.totalorder %s3771_s3, %s3472_s11  ;;  %s52_s8 = int_to_ptr.vmem [resolvable:$true] %s51_s8 }
  0x16   :  { %p3476_p9 = scmp.lt.u32.totalorder %s3472_s11, %s3771_s3 }
  0x18   :  { %p3478_p10 = pnand %p3476_p9, %p3473_p8 }
  0x1a   :  { %3481 = shalt.err (!%p3478_p10)
}
  0x1b   :  { %s3482_s16 = scalar_lea.vmem %s52_s8, 65536  ;;  %p3487_p12 = scmp.lt.s32.totalorder %s52_s8, %s52_s8 }
  0x1c   :  { %p3483_p11 = scmp.ne.s32.totalorder %s52_s8, %s3482_s16  ;;  %p3488_p13 = scmp.lt.s32.totalorder %s3482_s16, %s3482_s16 }
  0x1e   :  { %p3489_p0 = por %p3488_p13, %p3487_p12 }
  0x20   :  { %p3490_p1 = pnand %p3489_p0, %p3483_p11 }
  0x22   :  { %3493 = shalt.err (!%p3490_p1)
}
  0x23   :  { %s3594_s1 = smov 1024   ;;  %s3595_s17 = smov 64  }
  0x24   :  { %57 = dma.hbm_to_vmem [thread:$0]  %s3771_s3, 65536, %s52_s8, [#allocation9], %s3594_s1, %s3594_s1, %s3595_s17  }
  0x25   :  { %s3596_s20 = smov [#allocation2]   ;;  %s3597_s22 = smov [#allocation7]  }
  0x26   :  { %s20_s21 = sshll.u32 %s3596_s20, 4  ;;  %s42_s23 = sshll.u32 %s3597_s22, 4  ;;  %s21_s21 = int_to_ptr.vmem [resolvable:$true] %s20_s21  ;;  %s43_s23 = int_to_ptr.vmem [resolvable:$true] %s42_s23 }
  0x27   :  { %s3494_s26 = scalar_lea.hbm %s3768_s0, 1024 }
  0x28   :  { %p3495_p2 = scmp.ne.s32.totalorder %s3768_s0, %s3494_s26  ;;  %p3498_p3 = scmp.lt.u32.totalorder %s3494_s26, %s3768_s0 }
  0x2a   :  { %p3500_p4 = pnand %p3498_p3, %p3495_p2 }
  0x2c   :  { %3503 = shalt.err (!%p3500_p4)
}
  0x2d   :  { %s3504_s3 = scalar_lea.vmem %s21_s21, 1024  ;;  %p3509_p6 = scmp.lt.s32.totalorder %s21_s21, %s21_s21 }
  0x2e   :  { %p3505_p5 = scmp.ne.s32.totalorder %s21_s21, %s3504_s3  ;;  %p3510_p7 = scmp.lt.s32.totalorder %s3504_s3, %s3504_s3 }
  0x30   :  { %p3511_p8 = por %p3510_p7, %p3509_p6 }
  0x32   :  { %p3512_p9 = pnand %p3511_p8, %p3505_p5 }
  0x34   :  { %3515 = shalt.err (!%p3512_p9)
}
  0x35   :  { %23 = dma.hbm_to_vmem [thread:$0]  %s3768_s0, 1024, %s21_s21, [#allocation3]  }
  0x36   :  { %s3516_s10 = scalar_lea.hbm %s3770_s2, 64 }
  0x37   :  { %p3517_p10 = scmp.ne.s32.totalorder %s3770_s2, %s3516_s10  ;;  %p3520_p11 = scmp.lt.u32.totalorder %s3516_s10, %s3770_s2 }
  0x39   :  { %p3522_p12 = pnand %p3520_p11, %p3517_p10 }
  0x3b   :  { %3525 = shalt.err (!%p3522_p12)
}
  0x3c   :  { %s3526_s15 = scalar_lea.vmem %s43_s23, 64  ;;  %p3531_p0 = scmp.lt.s32.totalorder %s43_s23, %s43_s23 }
  0x3d   :  { %p3527_p13 = scmp.ne.s32.totalorder %s43_s23, %s3526_s15  ;;  %p3532_p1 = scmp.lt.s32.totalorder %s3526_s15, %s3526_s15 }
  0x3f   :  { %p3533_p2 = por %p3532_p1, %p3531_p0 }
  0x41   :  { %p3534_p3 = pnand %p3533_p2, %p3527_p13 }
  0x43   :  { %3537 = shalt.err (!%p3534_p3)
}
  0x44   :  { %45 = dma.hbm_to_vmem [thread:$0]  %s3770_s2, 64, %s43_s23, [#allocation6]  }
  0x45   :  { %s3598_s1 = smov [#allocation10]   ;;  %s3538_s20 = scalar_lea.hbm %s3772_s4, 128 }
  0x46   :  { %s64_s17 = sshll.u32 %s3598_s1, 4  ;;  %p3539_p4 = scmp.ne.s32.totalorder %s3772_s4, %s3538_s20  ;;  %s65_s17 = int_to_ptr.vmem [resolvable:$true] %s64_s17 }
  0x47   :  { %p3542_p5 = scmp.lt.u32.totalorder %s3538_s20, %s3772_s4 }
  0x49   :  { %p3544_p6 = pnand %p3542_p5, %p3539_p4 }
  0x4b   :  { %3547 = shalt.err (!%p3544_p6)
}
  0x4c   :  { %s3548_s26 = scalar_lea.vmem %s65_s17, 128  ;;  %p3553_p8 = scmp.lt.s32.totalorder %s65_s17, %s65_s17 }
  0x4d   :  { %p3549_p7 = scmp.ne.s32.totalorder %s65_s17, %s3548_s26  ;;  %p3554_p9 = scmp.lt.s32.totalorder %s3548_s26, %s3548_s26 }
  0x4f   :  { %p3555_p10 = por %p3554_p9, %p3553_p8 }
  0x51   :  { %p3556_p11 = pnand %p3555_p10, %p3549_p7 }
  0x53   :  { %3559 = shalt.err (!%p3556_p11)
}
  0x54   :  { %67 = dma.hbm_to_vmem [thread:$0]  %s3772_s4, 128, %s65_s17, [#allocation9]  }
  0x55   :  { %3582 = dma.done.wait [#allocation3], 1024  }
  0x56   :  { %3583 = vsyncadd [#allocation3], 4294966272 }
  0x57   :  { %3584 = dma.done.wait [#allocation6], 65600  }
  0x58   :  { %3585 = vsyncadd [#allocation6], 4294901696 }
  0x59   :  { %3586 = dma.done.wait [#allocation9], 65664  }
  0x5a   :  { %3587 = vsyncadd [#allocation9], 4294901632  ;;  %v92_v0 = vld [vmem:[#allocation5 + $0x8] sm:$0xff]  ;;  %v94_v2 = vld [vmem:[#allocation5 + $0x18] sm:$0xff]  ;;  %s3599_s4 = smov [#allocation11]  }
  0x5b   :  { %v96_v1 = vld [vmem:[#allocation5 + $0x28] sm:$0xff]  ;;  %v98_v4 = vld [vmem:[#allocation5 + $0x38] sm:$0xff]  ;;  %v91_v5 = vld [vmem:[#allocation5] sm:$0xff]  ;;  %s2365_s27 = sshll.u32 %s3599_s4, 4  ;;  %s2366_s27 = int_to_ptr.vmem [resolvable:$true] %s2365_s27 }
  0x5c   :  { %v2376_v3 = vpack.c.bf16 %v96_v1, %v92_v0  ;;  %v95_v6 = vld [vmem:[#allocation5 + $0x20] sm:$0xff]  ;;  %v2632_v7 = vpack.c.bf16 %v98_v4, %v94_v2  ;;  %v93_v9 = vld [vmem:[#allocation5 + $0x10] sm:$0xff]  ;;  %v100_v11 = vld [vmem:[#allocation5 + $0x48] sm:$0xff]  ;;  %s3560_s28 = scalar_lea.vmem %s2366_s27, 1024  ;;  %p3565_p13 = scmp.lt.s32.totalorder %s2366_s27, %s2366_s27 }
  0x5d   :  { %v2378_v8 = vpack.c.bf16 %v95_v6, %v91_v5  ;;  %v97_v10 = vld [vmem:[#allocation5 + $0x30] sm:$0xff]  ;;  %v104_v13 = vld [vmem:[#allocation5 + $0x68] sm:$0xff]  ;;  %v102_v14 = vld [vmem:[#allocation5 + $0x58] sm:$0xff]  ;;  %p3561_p12 = scmp.ne.s32.totalorder %s2366_s27, %s3560_s28  ;;  %p3566_p0 = scmp.lt.s32.totalorder %s3560_s28, %s3560_s28 }
  0x5e   :  { %2377 = vmatprep.subr.bf16.mxu0 %v2376_v3  ;;  %v2634_v12 = vpack.c.bf16 %v97_v10, %v93_v9  ;;  %v106_v15 = vld [vmem:[#allocation5 + $0x78] sm:$0xff]  ;;  %2633 = vmatprep.subr.bf16.mxu1 %v2632_v7  ;;  %v2380_v16 = vpack.c.bf16 %v104_v13, %v100_v11  ;;  %v99_v18 = vld [vmem:[#allocation5 + $0x40] sm:$0xff]  ;;  %v101_v20 = vld [vmem:[#allocation5 + $0x50] sm:$0xff] }
  0x5f   :  { %2379 = vmatpush1.bf16.msra.mxu0 %v2378_v8  ;;  %v2636_v17 = vpack.c.bf16 %v106_v15, %v102_v14  ;;  %v103_v19 = vld [vmem:[#allocation5 + $0x60] sm:$0xff]  ;;  %v105_v22 = vld [vmem:[#allocation5 + $0x70] sm:$0xff]  ;;  %v108_v23 = vld [vmem:[#allocation5 + $0x88] sm:$0xff]  ;;  %p3567_p1 = por %p3566_p0, %p3565_p13 }
  0x60   :  { %2635 = vmatpush1.bf16.msra.mxu1 %v2634_v12  ;;  %v2382_v21 = vpack.c.bf16 %v103_v19, %v99_v18  ;;  %v112_v24 = vld [vmem:[#allocation5 + $0xa8] sm:$0xff]  ;;  %2381 = vmatprep.subr.bf16.mxu0 %v2380_v16  ;;  %v2638_v25 = vpack.c.bf16 %v105_v22, %v101_v20  ;;  %v110_v27 = vld [vmem:[#allocation5 + $0x98] sm:$0xff]  ;;  %v107_v29 = vld [vmem:[#allocation5 + $0x80] sm:$0xff] }
  0x61   :  { %2637 = vmatprep.subr.bf16.mxu1 %v2636_v17  ;;  %v2384_v26 = vpack.c.bf16 %v112_v24, %v108_v23  ;;  %v114_v28 = vld [vmem:[#allocation5 + $0xb8] sm:$0xff]  ;;  %v111_v31 = vld [vmem:[#allocation5 + $0xa0] sm:$0xff]  ;;  %v109_v32 = vld [vmem:[#allocation5 + $0x90] sm:$0xff]  ;;  %p3568_p2 = pnand %p3567_p1, %p3561_p12 }
  0x62   :  { %v2640_v30 = vpack.c.bf16 %v114_v28, %v110_v27  ;;  %v113_v33 = vld [vmem:[#allocation5 + $0xb0] sm:$0xff]  ;;  %v2386_v34 = vpack.c.bf16 %v111_v31, %v107_v29  ;;  %v116_v35 = vld [vmem:[#allocation5 + $0xc8] sm:$0xff]  ;;  %v118_v37 = vld [vmem:[#allocation5 + $0xd8] sm:$0xff] }
  0x63   :  { %2383 = vmatpush1.bf16.msra.mxu0 %v2382_v21  ;;  %v120_v36 = vld [vmem:[#allocation5 + $0xe8] sm:$0xff]  ;;  %v2642_v38 = vpack.c.bf16 %v113_v33, %v109_v32  ;;  %v122_v40 = vld [vmem:[#allocation5 + $0xf8] sm:$0xff]  ;;  %v115_v41 = vld [vmem:[#allocation5 + $0xc0] sm:$0xff] }
  0x64   :  { %2639 = vmatpush1.bf16.msra.mxu1 %v2638_v25  ;;  %2385 = vmatprep.subr.bf16.mxu0 %v2384_v26  ;;  %v2388_v39 = vpack.c.bf16 %v120_v36, %v116_v35  ;;  %v119_v42 = vld [vmem:[#allocation5 + $0xe0] sm:$0xff]  ;;  %v2644_v43 = vpack.c.bf16 %v122_v40, %v118_v37  ;;  %v117_v44 = vld [vmem:[#allocation5 + $0xd0] sm:$0xff]  ;;  %v124_v46 = vld [vmem:[#allocation5 + $0x108] sm:$0xff] }
  0x65   :  { %2641 = vmatprep.subr.bf16.mxu1 %v2640_v30  ;;  %v121_v45 = vld [vmem:[#allocation5 + $0xf0] sm:$0xff]  ;;  %v128_v47 = vld [vmem:[#allocation5 + $0x128] sm:$0xff]  ;;  %v126_v48 = vld [vmem:[#allocation5 + $0x118] sm:$0xff]  ;;  %v2390_v50 = vpack.c.bf16 %v119_v42, %v115_v41 }
  0x66   :  { %v130_v49 = vld [vmem:[#allocation5 + $0x138] sm:$0xff]  ;;  %v2646_v51 = vpack.c.bf16 %v121_v45, %v117_v44  ;;  %v2392_v52 = vpack.c.bf16 %v128_v47, %v124_v46  ;;  %v123_v53 = vld [vmem:[#allocation5 + $0x100] sm:$0xff]  ;;  %v125_v55 = vld [vmem:[#allocation5 + $0x110] sm:$0xff] }
  0x67   :  { %2387 = vmatpush1.bf16.msra.mxu0 %v2386_v34  ;;  %v127_v54 = vld [vmem:[#allocation5 + $0x120] sm:$0xff]  ;;  %v2648_v56 = vpack.c.bf16 %v130_v49, %v126_v48  ;;  %v129_v57 = vld [vmem:[#allocation5 + $0x130] sm:$0xff]  ;;  %v132_v58 = vld [vmem:[#allocation5 + $0x148] sm:$0xff] }
  0x68   :  { %2643 = vmatpush1.bf16.msra.mxu1 %v2642_v38  ;;  %2389 = vmatprep.subr.bf16.mxu0 %v2388_v39  ;;  %v136_v59 = vld [vmem:[#allocation5 + $0x168] sm:$0xff]  ;;  %v134_v60 = vld [vmem:[#allocation5 + $0x158] sm:$0xff]  ;;  %v2394_v62 = vpack.c.bf16 %v127_v54, %v123_v53  ;;  %v2650_v63 = vpack.c.bf16 %v129_v57, %v125_v55  ;;  %v131_v1 = vld [vmem:[#allocation5 + $0x140] sm:$0xff] }
  0x69   :  { %2645 = vmatprep.subr.bf16.mxu1 %v2644_v43  ;;  %v138_v61 = vld [vmem:[#allocation5 + $0x178] sm:$0xff]  ;;  %v2396_v0 = vpack.c.bf16 %v136_v59, %v132_v58  ;;  %v135_v2 = vld [vmem:[#allocation5 + $0x160] sm:$0xff]  ;;  %v133_v3 = vld [vmem:[#allocation5 + $0x150] sm:$0xff] }
  0x6a   :  { %v2652_v4 = vpack.c.bf16 %v138_v61, %v134_v60  ;;  %v137_v5 = vld [vmem:[#allocation5 + $0x170] sm:$0xff]  ;;  %v140_v6 = vld [vmem:[#allocation5 + $0x188] sm:$0xff]  ;;  %v142_v8 = vld [vmem:[#allocation5 + $0x198] sm:$0xff]  ;;  %v2398_v10 = vpack.c.bf16 %v135_v2, %v131_v1 }
  0x6b   :  { %2391 = vmatpush1.bf16.msra.mxu0 %v2390_v50  ;;  %v144_v7 = vld [vmem:[#allocation5 + $0x1a8] sm:$0xff]  ;;  %v146_v9 = vld [vmem:[#allocation5 + $0x1b8] sm:$0xff]  ;;  %v2654_v11 = vpack.c.bf16 %v137_v5, %v133_v3  ;;  %v139_v13 = vld [vmem:[#allocation5 + $0x180] sm:$0xff] }
  0x6c   :  { %2647 = vmatpush1.bf16.msra.mxu1 %v2646_v51  ;;  %2393 = vmatprep.subr.bf16.mxu0 %v2392_v52  ;;  %v2400_v12 = vpack.c.bf16 %v144_v7, %v140_v6  ;;  %v143_v14 = vld [vmem:[#allocation5 + $0x1a0] sm:$0xff]  ;;  %v141_v15 = vld [vmem:[#allocation5 + $0x190] sm:$0xff]  ;;  %v2656_v16 = vpack.c.bf16 %v146_v9, %v142_v8  ;;  %v148_v18 = vld [vmem:[#allocation5 + $0x1c8] sm:$0xff] }
  0x6d   :  { %2649 = vmatprep.subr.bf16.mxu1 %v2648_v56  ;;  %v145_v17 = vld [vmem:[#allocation5 + $0x1b0] sm:$0xff]  ;;  %v152_v19 = vld [vmem:[#allocation5 + $0x1e8] sm:$0xff]  ;;  %v150_v20 = vld [vmem:[#allocation5 + $0x1d8] sm:$0xff]  ;;  %v2402_v22 = vpack.c.bf16 %v143_v14, %v139_v13 }
  0x6e   :  { %v154_v21 = vld [vmem:[#allocation5 + $0x1f8] sm:$0xff]  ;;  %v2658_v23 = vpack.c.bf16 %v145_v17, %v141_v15  ;;  %v2404_v24 = vpack.c.bf16 %v152_v19, %v148_v18  ;;  %v147_v25 = vld [vmem:[#allocation5 + $0x1c0] sm:$0xff]  ;;  %v149_v27 = vld [vmem:[#allocation5 + $0x1d0] sm:$0xff] }
  0x6f   :  { %2395 = vmatpush1.bf16.msra.mxu0 %v2394_v62  ;;  %v151_v26 = vld [vmem:[#allocation5 + $0x1e0] sm:$0xff]  ;;  %v2660_v28 = vpack.c.bf16 %v154_v21, %v150_v20  ;;  %v153_v29 = vld [vmem:[#allocation5 + $0x1f0] sm:$0xff]  ;;  %v156_v30 = vld [vmem:[#allocation5 + $0x208] sm:$0xff] }
  0x70   :  { %2651 = vmatpush1.bf16.msra.mxu1 %v2650_v63  ;;  %2397 = vmatprep.subr.bf16.mxu0 %v2396_v0  ;;  %v160_v31 = vld [vmem:[#allocation5 + $0x228] sm:$0xff]  ;;  %v158_v32 = vld [vmem:[#allocation5 + $0x218] sm:$0xff]  ;;  %v2406_v34 = vpack.c.bf16 %v151_v26, %v147_v25  ;;  %v2662_v35 = vpack.c.bf16 %v153_v29, %v149_v27  ;;  %v155_v37 = vld [vmem:[#allocation5 + $0x200] sm:$0xff] }
  0x71   :  { %2653 = vmatprep.subr.bf16.mxu1 %v2652_v4  ;;  %v162_v33 = vld [vmem:[#allocation5 + $0x238] sm:$0xff]  ;;  %v2408_v36 = vpack.c.bf16 %v160_v31, %v156_v30  ;;  %v159_v38 = vld [vmem:[#allocation5 + $0x220] sm:$0xff]  ;;  %v157_v39 = vld [vmem:[#allocation5 + $0x210] sm:$0xff] }
  0x72   :  { %v2664_v40 = vpack.c.bf16 %v162_v33, %v158_v32  ;;  %v161_v41 = vld [vmem:[#allocation5 + $0x230] sm:$0xff]  ;;  %v164_v42 = vld [vmem:[#allocation5 + $0x248] sm:$0xff]  ;;  %v166_v44 = vld [vmem:[#allocation5 + $0x258] sm:$0xff]  ;;  %v2410_v46 = vpack.c.bf16 %v159_v38, %v155_v37 }
  0x73   :  { %2399 = vmatpush1.bf16.msra.mxu0 %v2398_v10  ;;  %v168_v43 = vld [vmem:[#allocation5 + $0x268] sm:$0xff]  ;;  %v170_v45 = vld [vmem:[#allocation5 + $0x278] sm:$0xff]  ;;  %v2666_v47 = vpack.c.bf16 %v161_v41, %v157_v39  ;;  %v163_v49 = vld [vmem:[#allocation5 + $0x240] sm:$0xff] }
  0x74   :  { %2655 = vmatpush1.bf16.msra.mxu1 %v2654_v11  ;;  %2401 = vmatprep.subr.bf16.mxu0 %v2400_v12  ;;  %v2412_v48 = vpack.c.bf16 %v168_v43, %v164_v42  ;;  %v167_v50 = vld [vmem:[#allocation5 + $0x260] sm:$0xff]  ;;  %v165_v51 = vld [vmem:[#allocation5 + $0x250] sm:$0xff]  ;;  %v2668_v52 = vpack.c.bf16 %v170_v45, %v166_v44  ;;  %v172_v54 = vld [vmem:[#allocation5 + $0x288] sm:$0xff] }
  0x75   :  { %2657 = vmatprep.subr.bf16.mxu1 %v2656_v16  ;;  %v169_v53 = vld [vmem:[#allocation5 + $0x270] sm:$0xff]  ;;  %v176_v55 = vld [vmem:[#allocation5 + $0x2a8] sm:$0xff]  ;;  %v174_v56 = vld [vmem:[#allocation5 + $0x298] sm:$0xff]  ;;  %v2414_v58 = vpack.c.bf16 %v167_v50, %v163_v49 }
  0x76   :  { %v178_v57 = vld [vmem:[#allocation5 + $0x2b8] sm:$0xff]  ;;  %v2670_v59 = vpack.c.bf16 %v169_v53, %v165_v51  ;;  %v2416_v60 = vpack.c.bf16 %v176_v55, %v172_v54  ;;  %v171_v61 = vld [vmem:[#allocation5 + $0x280] sm:$0xff]  ;;  %v173_v63 = vld [vmem:[#allocation5 + $0x290] sm:$0xff] }
  0x77   :  { %2403 = vmatpush1.bf16.msra.mxu0 %v2402_v22  ;;  %v175_v62 = vld [vmem:[#allocation5 + $0x2a0] sm:$0xff]  ;;  %v2672_v0 = vpack.c.bf16 %v178_v57, %v174_v56  ;;  %v177_v1 = vld [vmem:[#allocation5 + $0x2b0] sm:$0xff]  ;;  %v180_v2 = vld [vmem:[#allocation5 + $0x2c8] sm:$0xff] }
  0x78   :  { %2659 = vmatpush1.bf16.msra.mxu1 %v2658_v23  ;;  %2405 = vmatprep.subr.bf16.mxu0 %v2404_v24  ;;  %v184_v3 = vld [vmem:[#allocation5 + $0x2e8] sm:$0xff]  ;;  %v182_v4 = vld [vmem:[#allocation5 + $0x2d8] sm:$0xff]  ;;  %v2418_v6 = vpack.c.bf16 %v175_v62, %v171_v61  ;;  %v179_v7 = vld [vmem:[#allocation5 + $0x2c0] sm:$0xff]  ;;  %v2674_v8 = vpack.c.bf16 %v177_v1, %v173_v63 }
  0x79   :  { %2661 = vmatprep.subr.bf16.mxu1 %v2660_v28  ;;  %v186_v5 = vld [vmem:[#allocation5 + $0x2f8] sm:$0xff]  ;;  %v2420_v9 = vpack.c.bf16 %v184_v3, %v180_v2  ;;  %v183_v10 = vld [vmem:[#allocation5 + $0x2e0] sm:$0xff]  ;;  %v181_v11 = vld [vmem:[#allocation5 + $0x2d0] sm:$0xff] }
  0x7a   :  { %v185_v12 = vld [vmem:[#allocation5 + $0x2f0] sm:$0xff]  ;;  %v2676_v13 = vpack.c.bf16 %v186_v5, %v182_v4  ;;  %v188_v14 = vld [vmem:[#allocation5 + $0x308] sm:$0xff]  ;;  %v190_v17 = vld [vmem:[#allocation5 + $0x318] sm:$0xff]  ;;  %v2422_v19 = vpack.c.bf16 %v183_v10, %v179_v7 }
  0x7b   :  { %2407 = vmatpush1.bf16.msra.mxu0 %v2406_v34  ;;  %v192_v15 = vld [vmem:[#allocation5 + $0x328] sm:$0xff]  ;;  %v194_v18 = vld [vmem:[#allocation5 + $0x338] sm:$0xff]  ;;  %v2678_v20 = vpack.c.bf16 %v185_v12, %v181_v11  ;;  %v187_v22 = vld [vmem:[#allocation5 + $0x300] sm:$0xff] }
  0x7c   :  { %2663 = vmatpush1.bf16.msra.mxu1 %v2662_v35  ;;  %2409 = vmatprep.subr.bf16.mxu0 %v2408_v36  ;;  %v84_v16 = vld [vmem:[#allocation2 + $0x8] sm:$0xff]  ;;  %v2424_v21 = vpack.c.bf16 %v192_v15, %v188_v14  ;;  %v191_v23 = vld [vmem:[#allocation5 + $0x320] sm:$0xff]  ;;  %v189_v24 = vld [vmem:[#allocation5 + $0x310] sm:$0xff]  ;;  %v2680_v25 = vpack.c.bf16 %v194_v18, %v190_v17 }
  0x7d   :  { %2665 = vmatprep.subr.bf16.mxu1 %v2664_v40  ;;  %689 = vmatprep.mubr.f32.mxu0 %v84_v16  ;;  %v193_v26 = vld [vmem:[#allocation5 + $0x330] sm:$0xff]  ;;  %v196_v27 = vld [vmem:[#allocation5 + $0x348] sm:$0xff]  ;;  %v198_v29 = vld [vmem:[#allocation5 + $0x358] sm:$0xff]  ;;  %v2426_v31 = vpack.c.bf16 %v191_v23, %v187_v22 }
  0x7e   :  { %973 = vmatprep.mubr.f32.mxu1 %v84_v16  ;;  %v200_v28 = vld [vmem:[#allocation5 + $0x368] sm:$0xff]  ;;  %v202_v30 = vld [vmem:[#allocation5 + $0x378] sm:$0xff]  ;;  %v2682_v32 = vpack.c.bf16 %v193_v26, %v189_v24  ;;  %v195_v34 = vld [vmem:[#allocation5 + $0x340] sm:$0xff] }
  0x7f   :  { %2411 = vmatpush1.bf16.msra.mxu0 %v2410_v46  ;;  %v2428_v33 = vpack.c.bf16 %v200_v28, %v196_v27  ;;  %v199_v35 = vld [vmem:[#allocation5 + $0x360] sm:$0xff]  ;;  %v197_v36 = vld [vmem:[#allocation5 + $0x350] sm:$0xff]  ;;  %v2684_v37 = vpack.c.bf16 %v202_v30, %v198_v29  ;;  %v204_v39 = vld [vmem:[#allocation5 + $0x388] sm:$0xff] }
  0x80   :  { %2667 = vmatpush1.bf16.msra.mxu1 %v2666_v47  ;;  %2413 = vmatprep.subr.bf16.mxu0 %v2412_v48  ;;  %v201_v38 = vld [vmem:[#allocation5 + $0x370] sm:$0xff]  ;;  %v208_v40 = vld [vmem:[#allocation5 + $0x3a8] sm:$0xff]  ;;  %v206_v41 = vld [vmem:[#allocation5 + $0x398] sm:$0xff]  ;;  %v2430_v43 = vpack.c.bf16 %v199_v35, %v195_v34 }
  0x81   :  { %2669 = vmatprep.subr.bf16.mxu1 %v2668_v52  ;;  %v210_v42 = vld [vmem:[#allocation5 + $0x3b8] sm:$0xff]  ;;  %v2686_v44 = vpack.c.bf16 %v201_v38, %v197_v36  ;;  %v2432_v45 = vpack.c.bf16 %v208_v40, %v204_v39  ;;  %v203_v46 = vld [vmem:[#allocation5 + $0x380] sm:$0xff]  ;;  %v205_v48 = vld [vmem:[#allocation5 + $0x390] sm:$0xff] }
  0x82   :  { %v207_v47 = vld [vmem:[#allocation5 + $0x3a0] sm:$0xff]  ;;  %v2688_v49 = vpack.c.bf16 %v210_v42, %v206_v41  ;;  %v209_v50 = vld [vmem:[#allocation5 + $0x3b0] sm:$0xff]  ;;  %v212_v51 = vld [vmem:[#allocation5 + $0x3c8] sm:$0xff] }
  0x83   :  { %2415 = vmatpush1.bf16.msra.mxu0 %v2414_v58  ;;  %v216_v52 = vld [vmem:[#allocation5 + $0x3e8] sm:$0xff]  ;;  %v214_v53 = vld [vmem:[#allocation5 + $0x3d8] sm:$0xff]  ;;  %v2434_v55 = vpack.c.bf16 %v207_v47, %v203_v46  ;;  %v2690_v56 = vpack.c.bf16 %v209_v50, %v205_v48  ;;  %v211_v58 = vld [vmem:[#allocation5 + $0x3c0] sm:$0xff] }
  0x84   :  { %2671 = vmatpush1.bf16.msra.mxu1 %v2670_v59  ;;  %2417 = vmatprep.subr.bf16.mxu0 %v2416_v60  ;;  %v218_v54 = vld [vmem:[#allocation5 + $0x3f8] sm:$0xff]  ;;  %v2436_v57 = vpack.c.bf16 %v216_v52, %v212_v51  ;;  %v215_v59 = vld [vmem:[#allocation5 + $0x3e0] sm:$0xff]  ;;  %v213_v60 = vld [vmem:[#allocation5 + $0x3d0] sm:$0xff] }
  0x85   :  { %2673 = vmatprep.subr.bf16.mxu1 %v2672_v0  ;;  %v2692_v61 = vpack.c.bf16 %v218_v54, %v214_v53  ;;  %v217_v62 = vld [vmem:[#allocation5 + $0x3f0] sm:$0xff]  ;;  %v220_v63 = vld [vmem:[#allocation5 + $0x408] sm:$0xff]  ;;  %v222_v1 = vld [vmem:[#allocation5 + $0x418] sm:$0xff]  ;;  %v2438_v3 = vpack.c.bf16 %v215_v59, %v211_v58 }
  0x86   :  { %v224_v0 = vld [vmem:[#allocation5 + $0x428] sm:$0xff]  ;;  %v226_v2 = vld [vmem:[#allocation5 + $0x438] sm:$0xff]  ;;  %v2694_v4 = vpack.c.bf16 %v217_v62, %v213_v60  ;;  %v223_v7 = vld [vmem:[#allocation5 + $0x420] sm:$0xff] }
  0x87   :  { %2419 = vmatpush1.bf16.msra.mxu0 %v2418_v6  ;;  %v2440_v5 = vpack.c.bf16 %v224_v0, %v220_v63  ;;  %v219_v6 = vld [vmem:[#allocation5 + $0x400] sm:$0xff]  ;;  %v225_v10 = vld [vmem:[#allocation5 + $0x430] sm:$0xff]  ;;  %v228_v11 = vld [vmem:[#allocation5 + $0x448] sm:$0xff] }
  0x88   :  { %2675 = vmatpush1.bf16.msra.mxu1 %v2674_v8  ;;  %2421 = vmatprep.subr.bf16.mxu0 %v2420_v9  ;;  %v221_v8 = vld [vmem:[#allocation5 + $0x410] sm:$0xff]  ;;  %v2696_v9 = vpack.c.bf16 %v226_v2, %v222_v1  ;;  %v232_v12 = vld [vmem:[#allocation5 + $0x468] sm:$0xff]  ;;  %v234_v14 = vld [vmem:[#allocation5 + $0x478] sm:$0xff]  ;;  %v2442_v16 = vpack.c.bf16 %v223_v7, %v219_v6 }
  0x89   :  { %2677 = vmatprep.subr.bf16.mxu1 %v2676_v13  ;;  %v230_v13 = vld [vmem:[#allocation5 + $0x458] sm:$0xff]  ;;  %v83_v15 = vld [vmem:[#allocation2] sm:$0xff]  ;;  %v2698_v17 = vpack.c.bf16 %v225_v10, %v221_v8  ;;  %v2444_v18 = vpack.c.bf16 %v232_v12, %v228_v11  ;;  %v233_v23 = vld [vmem:[#allocation5 + $0x470] sm:$0xff] }
  0x8a   :  { %v2700_v22 = vpack.c.bf16 %v234_v14, %v230_v13  ;;  %v236_v24 = vld [vmem:[#allocation5 + $0x488] sm:$0xff]  ;;  %v238_v26 = vld [vmem:[#allocation5 + $0x498] sm:$0xff]  ;;  %v241_v35 = vld [vmem:[#allocation5 + $0x4b0] sm:$0xff] }
  0x8b   :  { %2423 = vmatpush1.bf16.msra.mxu0 %v2422_v19  ;;  %v227_v19 = vld [vmem:[#allocation5 + $0x440] sm:$0xff]  ;;  %v242_v27 = vld [vmem:[#allocation5 + $0x4b8] sm:$0xff]  ;;  %v244_v36 = vld [vmem:[#allocation5 + $0x4c8] sm:$0xff] }
  0x8c   :  { %2679 = vmatpush1.bf16.msra.mxu1 %v2678_v20  ;;  %2425 = vmatprep.subr.bf16.mxu0 %v2424_v21  ;;  %v231_v20 = vld [vmem:[#allocation5 + $0x460] sm:$0xff]  ;;  %v229_v21 = vld [vmem:[#allocation5 + $0x450] sm:$0xff]  ;;  %v2704_v34 = vpack.c.bf16 %v242_v27, %v238_v26  ;;  %v246_v38 = vld [vmem:[#allocation5 + $0x4d8] sm:$0xff] }
  0x8d   :  { %2681 = vmatprep.subr.bf16.mxu1 %v2680_v25  ;;  %v240_v25 = vld [vmem:[#allocation5 + $0x4a8] sm:$0xff]  ;;  %v2446_v28 = vpack.c.bf16 %v231_v20, %v227_v19  ;;  %v2702_v29 = vpack.c.bf16 %v233_v23, %v229_v21  ;;  %v250_v39 = vld [vmem:[#allocation5 + $0x4f8] sm:$0xff]  ;;  %v249_v47 = vld [vmem:[#allocation5 + $0x4f0] sm:$0xff] }
  0x8e   :  { %v2448_v30 = vpack.c.bf16 %v240_v25, %v236_v24  ;;  %v2708_v46 = vpack.c.bf16 %v250_v39, %v246_v38  ;;  %v252_v48 = vld [vmem:[#allocation5 + $0x508] sm:$0xff]  ;;  %v254_v50 = vld [vmem:[#allocation5 + $0x518] sm:$0xff]  ;;  %v257_v59 = vld [vmem:[#allocation5 + $0x530] sm:$0xff] }
  0x8f   :  { %2427 = vmatpush1.bf16.msra.mxu0 %v2426_v31  ;;  %v235_v31 = vld [vmem:[#allocation5 + $0x480] sm:$0xff]  ;;  %v258_v51 = vld [vmem:[#allocation5 + $0x538] sm:$0xff]  ;;  %v260_v60 = vld [vmem:[#allocation5 + $0x548] sm:$0xff] }
  0x90   :  { %2683 = vmatpush1.bf16.msra.mxu1 %v2682_v32  ;;  %2429 = vmatprep.subr.bf16.mxu0 %v2428_v33  ;;  %v239_v32 = vld [vmem:[#allocation5 + $0x4a0] sm:$0xff]  ;;  %v237_v33 = vld [vmem:[#allocation5 + $0x490] sm:$0xff]  ;;  %v2712_v58 = vpack.c.bf16 %v258_v51, %v254_v50  ;;  %v262_v62 = vld [vmem:[#allocation5 + $0x558] sm:$0xff] }
  0x91   :  { %2685 = vmatprep.subr.bf16.mxu1 %v2684_v37  ;;  %v248_v37 = vld [vmem:[#allocation5 + $0x4e8] sm:$0xff]  ;;  %v2450_v40 = vpack.c.bf16 %v239_v32, %v235_v31  ;;  %v2706_v41 = vpack.c.bf16 %v241_v35, %v237_v33  ;;  %v266_v63 = vld [vmem:[#allocation5 + $0x578] sm:$0xff]  ;;  %v265_v7 = vld [vmem:[#allocation5 + $0x570] sm:$0xff] }
  0x92   :  { %v2452_v42 = vpack.c.bf16 %v248_v37, %v244_v36  ;;  %v2716_v6 = vpack.c.bf16 %v266_v63, %v262_v62  ;;  %v268_v8 = vld [vmem:[#allocation5 + $0x588] sm:$0xff]  ;;  %v270_v10 = vld [vmem:[#allocation5 + $0x598] sm:$0xff]  ;;  %v267_v13 = vld [vmem:[#allocation5 + $0x580] sm:$0xff] }
  0x93   :  { %2431 = vmatpush1.bf16.msra.mxu0 %v2430_v43  ;;  %v243_v43 = vld [vmem:[#allocation5 + $0x4c0] sm:$0xff]  ;;  %v274_v11 = vld [vmem:[#allocation5 + $0x5b8] sm:$0xff]  ;;  %v276_v20 = vld [vmem:[#allocation5 + $0x5c8] sm:$0xff] }
  0x94   :  { %2687 = vmatpush1.bf16.msra.mxu1 %v2686_v44  ;;  %2433 = vmatprep.subr.bf16.mxu0 %v2432_v45  ;;  %v247_v44 = vld [vmem:[#allocation5 + $0x4e0] sm:$0xff]  ;;  %v245_v45 = vld [vmem:[#allocation5 + $0x4d0] sm:$0xff]  ;;  %v2720_v19 = vpack.c.bf16 %v274_v11, %v270_v10  ;;  %v280_v21 = vld [vmem:[#allocation5 + $0x5e8] sm:$0xff] }
  0x95   :  { %2689 = vmatprep.subr.bf16.mxu1 %v2688_v49  ;;  %v256_v49 = vld [vmem:[#allocation5 + $0x528] sm:$0xff]  ;;  %v2454_v52 = vpack.c.bf16 %v247_v44, %v243_v43  ;;  %v2710_v53 = vpack.c.bf16 %v249_v47, %v245_v45  ;;  %v278_v23 = vld [vmem:[#allocation5 + $0x5d8] sm:$0xff]  ;;  %v2468_v27 = vpack.c.bf16 %v280_v21, %v276_v20  ;;  %v281_v32 = vld [vmem:[#allocation5 + $0x5f0] sm:$0xff] }
  0x96   :  { %v2456_v54 = vpack.c.bf16 %v256_v49, %v252_v48  ;;  %v282_v24 = vld [vmem:[#allocation5 + $0x5f8] sm:$0xff]  ;;  %v284_v33 = vld [vmem:[#allocation5 + $0x608] sm:$0xff]  ;;  %v289_v44 = vld [vmem:[#allocation5 + $0x630] sm:$0xff] }
  0x97   :  { %2435 = vmatpush1.bf16.msra.mxu0 %v2434_v55  ;;  %v251_v55 = vld [vmem:[#allocation5 + $0x500] sm:$0xff]  ;;  %v2724_v31 = vpack.c.bf16 %v282_v24, %v278_v23  ;;  %v286_v35 = vld [vmem:[#allocation5 + $0x618] sm:$0xff]  ;;  %v292_v45 = vld [vmem:[#allocation5 + $0x648] sm:$0xff] }
  0x98   :  { %2691 = vmatpush1.bf16.msra.mxu1 %v2690_v56  ;;  %2437 = vmatprep.subr.bf16.mxu0 %v2436_v57  ;;  %v255_v56 = vld [vmem:[#allocation5 + $0x520] sm:$0xff]  ;;  %v253_v57 = vld [vmem:[#allocation5 + $0x510] sm:$0xff]  ;;  %v290_v36 = vld [vmem:[#allocation5 + $0x638] sm:$0xff] }
  0x99   :  { %2693 = vmatprep.subr.bf16.mxu1 %v2692_v61  ;;  %v264_v61 = vld [vmem:[#allocation5 + $0x568] sm:$0xff]  ;;  %v2458_v0 = vpack.c.bf16 %v255_v56, %v251_v55  ;;  %v2714_v1 = vpack.c.bf16 %v257_v59, %v253_v57  ;;  %v2728_v43 = vpack.c.bf16 %v290_v36, %v286_v35  ;;  %v294_v47 = vld [vmem:[#allocation5 + $0x658] sm:$0xff]  ;;  %v297_v56 = vld [vmem:[#allocation5 + $0x670] sm:$0xff] }
  0x9a   :  { %v2460_v2 = vpack.c.bf16 %v264_v61, %v260_v60  ;;  %v298_v48 = vld [vmem:[#allocation5 + $0x678] sm:$0xff]  ;;  %v300_v57 = vld [vmem:[#allocation5 + $0x688] sm:$0xff]  ;;  %v315_v24 = vld [vmem:[#allocation5 + $0x700] sm:$0xff] }
  0x9b   :  { %2439 = vmatpush1.bf16.msra.mxu0 %v2438_v3  ;;  %v259_v3 = vld [vmem:[#allocation5 + $0x540] sm:$0xff]  ;;  %v2732_v55 = vpack.c.bf16 %v298_v48, %v294_v47  ;;  %v302_v59 = vld [vmem:[#allocation5 + $0x698] sm:$0xff] }
  0x9c   :  { %2695 = vmatpush1.bf16.msra.mxu1 %v2694_v4  ;;  %2441 = vmatprep.subr.bf16.mxu0 %v2440_v5  ;;  %v263_v4 = vld [vmem:[#allocation5 + $0x560] sm:$0xff]  ;;  %v261_v5 = vld [vmem:[#allocation5 + $0x550] sm:$0xff]  ;;  %v306_v60 = vld [vmem:[#allocation5 + $0x6b8] sm:$0xff] }
  0x9d   :  { %2697 = vmatprep.subr.bf16.mxu1 %v2696_v9  ;;  %v272_v9 = vld [vmem:[#allocation5 + $0x5a8] sm:$0xff]  ;;  %v2462_v12 = vpack.c.bf16 %v263_v4, %v259_v3  ;;  %v2718_v14 = vpack.c.bf16 %v265_v7, %v261_v5  ;;  %v2736_v3 = vpack.c.bf16 %v306_v60, %v302_v59  ;;  %v305_v4 = vld [vmem:[#allocation5 + $0x6b0] sm:$0xff]  ;;  %v310_v7 = vld [vmem:[#allocation5 + $0x6d8] sm:$0xff] }
  0x9e   :  { %690 = vmatmul.mubr.f32.vlgmr.msra.gmra.mrb[0].mxu0 %v83_v15  ;;  %v308_v5 = vld [vmem:[#allocation5 + $0x6c8] sm:$0xff]  ;;  %v322_v20 = vld [vmem:[#allocation5 + $0x738] sm:$0xff]  ;;  %v323_v36 = vld [vmem:[#allocation5 + $0x740] sm:$0xff] }
  0x9f   :  { %2443 = vmatpush1.bf16.msra.mxu0 %v2442_v16  ;;  %974 = vmatmul.mubr.f32.vlgmr.msra.gmra.mrb[0].mxu1 %v83_v15  ;;  %v2464_v15 = vpack.c.bf16 %v272_v9, %v268_v8  ;;  %v271_v16 = vld [vmem:[#allocation5 + $0x5a0] sm:$0xff]  ;;  %v314_v8 = vld [vmem:[#allocation5 + $0x6f8] sm:$0xff] }
  0xa0   :  { %2699 = vmatpush1.bf16.msra.mxu1 %v2698_v17  ;;  %2445 = vmatprep.subr.bf16.mxu0 %v2444_v18  ;;  %v269_v17 = vld [vmem:[#allocation5 + $0x590] sm:$0xff]  ;;  %v2466_v25 = vpack.c.bf16 %v271_v16, %v267_v13  ;;  %v311_v13 = vld [vmem:[#allocation5 + $0x6e0] sm:$0xff] }
  0xa1   :  { %2701 = vmatprep.subr.bf16.mxu1 %v2700_v22  ;;  %v273_v18 = vld [vmem:[#allocation5 + $0x5b0] sm:$0xff]  ;;  %v86_v22 = vld [vmem:[#allocation2 + $0x18] sm:$0xff]  ;;  %v331_v48 = vld [vmem:[#allocation5 + $0x780] sm:$0xff] }
  0xa2   :  { %760 = vmatprep.mubr.f32.mxu0 %v86_v22  ;;  %1044 = vmatprep.mubr.f32.mxu1 %v86_v22  ;;  %v2722_v26 = vpack.c.bf16 %v273_v18, %v269_v17  ;;  %v313_v16 = vld [vmem:[#allocation5 + $0x6f0] sm:$0xff]  ;;  %v316_v17 = vld [vmem:[#allocation5 + $0x708] sm:$0xff]  ;;  %v339_v60 = vld [vmem:[#allocation5 + $0x7c0] sm:$0xff] }
  0xa3   :  { %2447 = vmatpush1.bf16.msra.mxu0 %v2446_v28  ;;  %v275_v28 = vld [vmem:[#allocation5 + $0x5c0] sm:$0xff]  ;;  %v320_v18 = vld [vmem:[#allocation5 + $0x728] sm:$0xff] }
  0xa4   :  { %2703 = vmatpush1.bf16.msra.mxu1 %v2702_v29  ;;  %2449 = vmatprep.subr.bf16.mxu0 %v2448_v30  ;;  %v279_v29 = vld [vmem:[#allocation5 + $0x5e0] sm:$0xff]  ;;  %v277_v30 = vld [vmem:[#allocation5 + $0x5d0] sm:$0xff]  ;;  %v2488_v23 = vpack.c.bf16 %v320_v18, %v316_v17 }
  0xa5   :  { %2705 = vmatprep.subr.bf16.mxu1 %v2704_v34  ;;  %v288_v34 = vld [vmem:[#allocation5 + $0x628] sm:$0xff]  ;;  %v2470_v37 = vpack.c.bf16 %v279_v29, %v275_v28  ;;  %v2726_v38 = vpack.c.bf16 %v281_v32, %v277_v30  ;;  %v321_v28 = vld [vmem:[#allocation5 + $0x730] sm:$0xff]  ;;  %v330_v32 = vld [vmem:[#allocation5 + $0x778] sm:$0xff] }
  0xa6   :  { %v2472_v39 = vpack.c.bf16 %v288_v34, %v284_v33  ;;  %v324_v29 = vld [vmem:[#allocation5 + $0x748] sm:$0xff]  ;;  %v85_v17 = vld [vmem:[#allocation2 + $0x10] sm:$0xff] }
  0xa7   :  { %2451 = vmatpush1.bf16.msra.mxu0 %v2450_v40  ;;  %v283_v40 = vld [vmem:[#allocation5 + $0x600] sm:$0xff]  ;;  %v328_v30 = vld [vmem:[#allocation5 + $0x768] sm:$0xff] }
  0xa8   :  { %2707 = vmatpush1.bf16.msra.mxu1 %v2706_v41  ;;  %2453 = vmatprep.subr.bf16.mxu0 %v2452_v42  ;;  %v287_v41 = vld [vmem:[#allocation5 + $0x620] sm:$0xff]  ;;  %v285_v42 = vld [vmem:[#allocation5 + $0x610] sm:$0xff]  ;;  %v2492_v35 = vpack.c.bf16 %v328_v30, %v324_v29  ;;  %v370_v29 = vld [vmem:[#allocation5 + $0x8b8] sm:$0xff] }
  0xa9   :  { %2709 = vmatprep.subr.bf16.mxu1 %v2708_v46  ;;  %v296_v46 = vld [vmem:[#allocation5 + $0x668] sm:$0xff]  ;;  %v2474_v49 = vpack.c.bf16 %v287_v41, %v283_v40  ;;  %v2730_v50 = vpack.c.bf16 %v289_v44, %v285_v42  ;;  %v329_v40 = vld [vmem:[#allocation5 + $0x770] sm:$0xff]  ;;  %v338_v44 = vld [vmem:[#allocation5 + $0x7b8] sm:$0xff] }
  0xaa   :  { %v2476_v51 = vpack.c.bf16 %v296_v46, %v292_v45  ;;  %v332_v41 = vld [vmem:[#allocation5 + $0x788] sm:$0xff] }
  0xab   :  { %2455 = vmatpush1.bf16.msra.mxu0 %v2454_v52  ;;  %v291_v52 = vld [vmem:[#allocation5 + $0x640] sm:$0xff]  ;;  %v336_v42 = vld [vmem:[#allocation5 + $0x7a8] sm:$0xff] }
  0xac   :  { %2711 = vmatpush1.bf16.msra.mxu1 %v2710_v53  ;;  %2457 = vmatprep.subr.bf16.mxu0 %v2456_v54  ;;  %v295_v53 = vld [vmem:[#allocation5 + $0x660] sm:$0xff]  ;;  %v293_v54 = vld [vmem:[#allocation5 + $0x650] sm:$0xff]  ;;  %v2496_v47 = vpack.c.bf16 %v336_v42, %v332_v41  ;;  %v88_v30 = vld [vmem:[#allocation2 + $0x28] sm:$0xff] }
  0xad   :  { %2713 = vmatprep.subr.bf16.mxu1 %v2712_v58  ;;  %v304_v58 = vld [vmem:[#allocation5 + $0x6a8] sm:$0xff]  ;;  %v2478_v61 = vpack.c.bf16 %v295_v53, %v291_v52  ;;  %v2734_v62 = vpack.c.bf16 %v297_v56, %v293_v54  ;;  %v337_v52 = vld [vmem:[#allocation5 + $0x7b0] sm:$0xff]  ;;  %v346_v56 = vld [vmem:[#allocation5 + $0x7f8] sm:$0xff] }
  0xae   :  { %v2480_v63 = vpack.c.bf16 %v304_v58, %v300_v57  ;;  %v340_v53 = vld [vmem:[#allocation5 + $0x7c8] sm:$0xff]  ;;  %v374_v41 = vld [vmem:[#allocation5 + $0x8d8] sm:$0xff] }
  0xaf   :  { %2459 = vmatpush1.bf16.msra.mxu0 %v2458_v0  ;;  %v299_v0 = vld [vmem:[#allocation5 + $0x680] sm:$0xff]  ;;  %v344_v54 = vld [vmem:[#allocation5 + $0x7e8] sm:$0xff]  ;;  %v378_v42 = vld [vmem:[#allocation5 + $0x8f8] sm:$0xff] }
  0xb0   :  { %2715 = vmatpush1.bf16.msra.mxu1 %v2714_v1  ;;  %2461 = vmatprep.subr.bf16.mxu0 %v2460_v2  ;;  %v303_v1 = vld [vmem:[#allocation5 + $0x6a0] sm:$0xff]  ;;  %v301_v2 = vld [vmem:[#allocation5 + $0x690] sm:$0xff]  ;;  %v2500_v59 = vpack.c.bf16 %v344_v54, %v340_v53  ;;  %v382_v53 = vld [vmem:[#allocation5 + $0x918] sm:$0xff] }
  0xb1   :  { %2717 = vmatprep.subr.bf16.mxu1 %v2716_v6  ;;  %v312_v6 = vld [vmem:[#allocation5 + $0x6e8] sm:$0xff]  ;;  %v2482_v9 = vpack.c.bf16 %v303_v1, %v299_v0  ;;  %v2738_v10 = vpack.c.bf16 %v305_v4, %v301_v2  ;;  %v345_v0 = vld [vmem:[#allocation5 + $0x7f0] sm:$0xff]  ;;  %v354_v4 = vld [vmem:[#allocation5 + $0x838] sm:$0xff] }
  0xb2   :  { %v2484_v11 = vpack.c.bf16 %v312_v6, %v308_v5  ;;  %v348_v1 = vld [vmem:[#allocation5 + $0x808] sm:$0xff]  ;;  %v386_v54 = vld [vmem:[#allocation5 + $0x938] sm:$0xff] }
  0xb3   :  { %2463 = vmatpush1.bf16.msra.mxu0 %v2462_v12  ;;  %v307_v12 = vld [vmem:[#allocation5 + $0x6c0] sm:$0xff]  ;;  %v352_v2 = vld [vmem:[#allocation5 + $0x828] sm:$0xff] }
  0xb4   :  { %2719 = vmatpush1.bf16.msra.mxu1 %v2718_v14  ;;  %2465 = vmatprep.subr.bf16.mxu0 %v2464_v15  ;;  %v309_v14 = vld [vmem:[#allocation5 + $0x6d0] sm:$0xff]  ;;  %v2740_v15 = vpack.c.bf16 %v314_v8, %v310_v7  ;;  %v2486_v21 = vpack.c.bf16 %v311_v13, %v307_v12  ;;  %v2504_v7 = vpack.c.bf16 %v352_v2, %v348_v1  ;;  %v347_v8 = vld [vmem:[#allocation5 + $0x800] sm:$0xff]  ;;  %v356_v13 = vld [vmem:[#allocation5 + $0x848] sm:$0xff] }
  0xb5   :  { %2721 = vmatprep.subr.bf16.mxu1 %v2720_v19  ;;  %v318_v19 = vld [vmem:[#allocation5 + $0x718] sm:$0xff]  ;;  %v2742_v22 = vpack.c.bf16 %v313_v16, %v309_v14  ;;  %v353_v12 = vld [vmem:[#allocation5 + $0x830] sm:$0xff]  ;;  %v360_v14 = vld [vmem:[#allocation5 + $0x868] sm:$0xff] }
  0xb6   :  { %v362_v16 = vld [vmem:[#allocation5 + $0x878] sm:$0xff] }
  0xb7   :  { %2467 = vmatpush1.bf16.msra.mxu0 %v2466_v25  ;;  %v319_v25 = vld [vmem:[#allocation5 + $0x720] sm:$0xff]  ;;  %v390_v1 = vld [vmem:[#allocation5 + $0x958] sm:$0xff] }
  0xb8   :  { %2723 = vmatpush1.bf16.msra.mxu1 %v2722_v26  ;;  %2469 = vmatprep.subr.bf16.mxu0 %v2468_v27  ;;  %v317_v26 = vld [vmem:[#allocation5 + $0x710] sm:$0xff]  ;;  %v2744_v27 = vpack.c.bf16 %v322_v20, %v318_v19  ;;  %v2490_v33 = vpack.c.bf16 %v319_v25, %v315_v24  ;;  %v2508_v20 = vpack.c.bf16 %v360_v14, %v356_v13  ;;  %v394_v2 = vld [vmem:[#allocation5 + $0x978] sm:$0xff] }
  0xb9   :  { %2725 = vmatprep.subr.bf16.mxu1 %v2724_v31  ;;  %v326_v31 = vld [vmem:[#allocation5 + $0x758] sm:$0xff]  ;;  %v2746_v34 = vpack.c.bf16 %v321_v28, %v317_v26  ;;  %v361_v25 = vld [vmem:[#allocation5 + $0x870] sm:$0xff]  ;;  %v364_v26 = vld [vmem:[#allocation5 + $0x888] sm:$0xff] }
  0xba   :  { %v366_v28 = vld [vmem:[#allocation5 + $0x898] sm:$0xff] }
  0xbb   :  { %2471 = vmatpush1.bf16.msra.mxu0 %v2470_v37  ;;  %v327_v37 = vld [vmem:[#allocation5 + $0x760] sm:$0xff]  ;;  %v398_v13 = vld [vmem:[#allocation5 + $0x998] sm:$0xff] }
  0xbc   :  { %2727 = vmatpush1.bf16.msra.mxu1 %v2726_v38  ;;  %2473 = vmatprep.subr.bf16.mxu0 %v2472_v39  ;;  %v325_v38 = vld [vmem:[#allocation5 + $0x750] sm:$0xff]  ;;  %v2748_v39 = vpack.c.bf16 %v330_v32, %v326_v31  ;;  %v2494_v45 = vpack.c.bf16 %v327_v37, %v323_v36  ;;  %v2768_v37 = vpack.c.bf16 %v370_v29, %v366_v28  ;;  %v402_v14 = vld [vmem:[#allocation5 + $0x9b8] sm:$0xff] }
  0xbd   :  { %2729 = vmatprep.subr.bf16.mxu1 %v2728_v43  ;;  %v334_v43 = vld [vmem:[#allocation5 + $0x798] sm:$0xff]  ;;  %v2750_v46 = vpack.c.bf16 %v329_v40, %v325_v38  ;;  %v365_v36 = vld [vmem:[#allocation5 + $0x890] sm:$0xff]  ;;  %v376_v40 = vld [vmem:[#allocation5 + $0x8e8] sm:$0xff] }
  0xbe   :  { %v369_v38 = vld [vmem:[#allocation5 + $0x8b0] sm:$0xff] }
  0xbf   :  { %2475 = vmatpush1.bf16.msra.mxu0 %v2474_v49  ;;  %v335_v49 = vld [vmem:[#allocation5 + $0x7a0] sm:$0xff] }
  0xc0   :  { %2731 = vmatpush1.bf16.msra.mxu1 %v2730_v50  ;;  %2477 = vmatprep.subr.bf16.mxu0 %v2476_v51  ;;  %v333_v50 = vld [vmem:[#allocation5 + $0x790] sm:$0xff]  ;;  %v2752_v51 = vpack.c.bf16 %v338_v44, %v334_v43  ;;  %v2498_v57 = vpack.c.bf16 %v335_v49, %v331_v48  ;;  %v2770_v44 = vpack.c.bf16 %v369_v38, %v365_v36  ;;  %v416_v36 = vld [vmem:[#allocation5 + $0xa28] sm:$0xff]  ;;  %v418_v38 = vld [vmem:[#allocation5 + $0xa38] sm:$0xff] }
  0xc1   :  { %2733 = vmatprep.subr.bf16.mxu1 %v2732_v55  ;;  %v342_v55 = vld [vmem:[#allocation5 + $0x7d8] sm:$0xff]  ;;  %v2754_v58 = vpack.c.bf16 %v337_v52, %v333_v50  ;;  %v373_v48 = vld [vmem:[#allocation5 + $0x8d0] sm:$0xff]  ;;  %v2772_v49 = vpack.c.bf16 %v378_v42, %v374_v41  ;;  %v384_v52 = vld [vmem:[#allocation5 + $0x928] sm:$0xff] }
  0xc2   :  { %v377_v50 = vld [vmem:[#allocation5 + $0x8f0] sm:$0xff]  ;;  %v411_v42 = vld [vmem:[#allocation5 + $0xa00] sm:$0xff] }
  0xc3   :  { %2479 = vmatpush1.bf16.msra.mxu0 %v2478_v61  ;;  %v343_v61 = vld [vmem:[#allocation5 + $0x7e0] sm:$0xff] }
  0xc4   :  { %2735 = vmatpush1.bf16.msra.mxu1 %v2734_v62  ;;  %2481 = vmatprep.subr.bf16.mxu0 %v2480_v63  ;;  %v341_v62 = vld [vmem:[#allocation5 + $0x7d0] sm:$0xff]  ;;  %v2756_v63 = vpack.c.bf16 %v346_v56, %v342_v55  ;;  %v2502_v5 = vpack.c.bf16 %v343_v61, %v339_v60  ;;  %v2774_v56 = vpack.c.bf16 %v377_v50, %v373_v48  ;;  %v424_v48 = vld [vmem:[#allocation5 + $0xa68] sm:$0xff]  ;;  %v426_v50 = vld [vmem:[#allocation5 + $0xa78] sm:$0xff] }
  0xc5   :  { %2737 = vmatprep.subr.bf16.mxu1 %v2736_v3  ;;  %v350_v3 = vld [vmem:[#allocation5 + $0x818] sm:$0xff]  ;;  %v2758_v6 = vpack.c.bf16 %v345_v0, %v341_v62  ;;  %v381_v60 = vld [vmem:[#allocation5 + $0x910] sm:$0xff]  ;;  %v2776_v61 = vpack.c.bf16 %v386_v54, %v382_v53  ;;  %v392_v0 = vld [vmem:[#allocation5 + $0x968] sm:$0xff] }
  0xc6   :  { %v385_v62 = vld [vmem:[#allocation5 + $0x930] sm:$0xff]  ;;  %v419_v54 = vld [vmem:[#allocation5 + $0xa40] sm:$0xff] }
  0xc7   :  { %2483 = vmatpush1.bf16.msra.mxu0 %v2482_v9  ;;  %v351_v9 = vld [vmem:[#allocation5 + $0x820] sm:$0xff] }
  0xc8   :  { %2739 = vmatpush1.bf16.msra.mxu1 %v2738_v10  ;;  %2485 = vmatprep.subr.bf16.mxu0 %v2484_v11  ;;  %v349_v10 = vld [vmem:[#allocation5 + $0x810] sm:$0xff]  ;;  %v2760_v11 = vpack.c.bf16 %v354_v4, %v350_v3  ;;  %v2506_v18 = vpack.c.bf16 %v351_v9, %v347_v8  ;;  %v2778_v4 = vpack.c.bf16 %v385_v62, %v381_v60  ;;  %v432_v60 = vld [vmem:[#allocation5 + $0xaa8] sm:$0xff]  ;;  %v434_v62 = vld [vmem:[#allocation5 + $0xab8] sm:$0xff] }
  0xc9   :  { %2741 = vmatprep.subr.bf16.mxu1 %v2740_v15  ;;  %v358_v15 = vld [vmem:[#allocation5 + $0x858] sm:$0xff]  ;;  %v2762_v19 = vpack.c.bf16 %v353_v12, %v349_v10  ;;  %v389_v8 = vld [vmem:[#allocation5 + $0x950] sm:$0xff]  ;;  %v2780_v9 = vpack.c.bf16 %v394_v2, %v390_v1  ;;  %v400_v12 = vld [vmem:[#allocation5 + $0x9a8] sm:$0xff] }
  0xca   :  { %v2764_v24 = vpack.c.bf16 %v362_v16, %v358_v15  ;;  %v393_v10 = vld [vmem:[#allocation5 + $0x970] sm:$0xff]  ;;  %v427_v2 = vld [vmem:[#allocation5 + $0xa80] sm:$0xff] }
  0xcb   :  { %2487 = vmatpush1.bf16.msra.mxu0 %v2486_v21  ;;  %v355_v21 = vld [vmem:[#allocation5 + $0x840] sm:$0xff]  ;;  %v2782_v16 = vpack.c.bf16 %v393_v10, %v389_v8  ;;  %v440_v8 = vld [vmem:[#allocation5 + $0xae8] sm:$0xff]  ;;  %v442_v10 = vld [vmem:[#allocation5 + $0xaf8] sm:$0xff] }
  0xcc   :  { %2743 = vmatpush1.bf16.msra.mxu1 %v2742_v22  ;;  %2489 = vmatprep.subr.bf16.mxu0 %v2488_v23  ;;  %v359_v22 = vld [vmem:[#allocation5 + $0x860] sm:$0xff]  ;;  %v357_v23 = vld [vmem:[#allocation5 + $0x850] sm:$0xff] }
  0xcd   :  { %2745 = vmatprep.subr.bf16.mxu1 %v2744_v27  ;;  %v368_v27 = vld [vmem:[#allocation5 + $0x8a8] sm:$0xff]  ;;  %v2510_v31 = vpack.c.bf16 %v359_v22, %v355_v21  ;;  %v2766_v32 = vpack.c.bf16 %v361_v25, %v357_v23  ;;  %v2784_v21 = vpack.c.bf16 %v402_v14, %v398_v13  ;;  %v401_v22 = vld [vmem:[#allocation5 + $0x9b0] sm:$0xff]  ;;  %v406_v25 = vld [vmem:[#allocation5 + $0x9d8] sm:$0xff] }
  0xce   :  { %v404_v23 = vld [vmem:[#allocation5 + $0x9c8] sm:$0xff]  ;;  %v435_v14 = vld [vmem:[#allocation5 + $0xac0] sm:$0xff] }
  0xcf   :  { %2491 = vmatpush1.bf16.msra.mxu0 %v2490_v33  ;;  %v2512_v33 = vpack.c.bf16 %v368_v27, %v364_v26  ;;  %v410_v26 = vld [vmem:[#allocation5 + $0x9f8] sm:$0xff] }
  0xd0   :  { %2747 = vmatpush1.bf16.msra.mxu1 %v2746_v34  ;;  %2493 = vmatprep.subr.bf16.mxu0 %v2492_v35  ;;  %v363_v34 = vld [vmem:[#allocation5 + $0x880] sm:$0xff] }
  0xd1   :  { %2749 = vmatprep.subr.bf16.mxu1 %v2748_v39  ;;  %v367_v35 = vld [vmem:[#allocation5 + $0x8a0] sm:$0xff]  ;;  %v372_v39 = vld [vmem:[#allocation5 + $0x8c8] sm:$0xff] }
  0xd2   :  { %v2514_v43 = vpack.c.bf16 %v367_v35, %v363_v34  ;;  %v409_v34 = vld [vmem:[#allocation5 + $0x9f0] sm:$0xff]  ;;  %v412_v35 = vld [vmem:[#allocation5 + $0xa08] sm:$0xff] }
  0xd3   :  { %2495 = vmatpush1.bf16.msra.mxu0 %v2494_v45  ;;  %v2516_v45 = vpack.c.bf16 %v376_v40, %v372_v39  ;;  %v2536_v41 = vpack.c.bf16 %v416_v36, %v412_v35 }
  0xd4   :  { %2751 = vmatpush1.bf16.msra.mxu1 %v2750_v46  ;;  %2497 = vmatprep.subr.bf16.mxu0 %v2496_v47  ;;  %v371_v46 = vld [vmem:[#allocation5 + $0x8c0] sm:$0xff] }
  0xd5   :  { %2753 = vmatprep.subr.bf16.mxu1 %v2752_v51  ;;  %v375_v47 = vld [vmem:[#allocation5 + $0x8e0] sm:$0xff]  ;;  %v380_v51 = vld [vmem:[#allocation5 + $0x908] sm:$0xff] }
  0xd6   :  { %v2518_v55 = vpack.c.bf16 %v375_v47, %v371_v46  ;;  %v417_v46 = vld [vmem:[#allocation5 + $0xa30] sm:$0xff]  ;;  %v420_v47 = vld [vmem:[#allocation5 + $0xa48] sm:$0xff] }
  0xd7   :  { %2499 = vmatpush1.bf16.msra.mxu0 %v2498_v57  ;;  %v2520_v57 = vpack.c.bf16 %v384_v52, %v380_v51  ;;  %v2540_v53 = vpack.c.bf16 %v424_v48, %v420_v47 }
  0xd8   :  { %2755 = vmatpush1.bf16.msra.mxu1 %v2754_v58  ;;  %2501 = vmatprep.subr.bf16.mxu0 %v2500_v59  ;;  %v379_v58 = vld [vmem:[#allocation5 + $0x900] sm:$0xff] }
  0xd9   :  { %2757 = vmatprep.subr.bf16.mxu1 %v2756_v63  ;;  %v383_v59 = vld [vmem:[#allocation5 + $0x920] sm:$0xff]  ;;  %v388_v63 = vld [vmem:[#allocation5 + $0x948] sm:$0xff] }
  0xda   :  { %v2522_v3 = vpack.c.bf16 %v383_v59, %v379_v58  ;;  %v425_v58 = vld [vmem:[#allocation5 + $0xa70] sm:$0xff]  ;;  %v428_v59 = vld [vmem:[#allocation5 + $0xa88] sm:$0xff] }
  0xdb   :  { %2503 = vmatpush1.bf16.msra.mxu0 %v2502_v5  ;;  %v2524_v5 = vpack.c.bf16 %v392_v0, %v388_v63  ;;  %v2544_v1 = vpack.c.bf16 %v432_v60, %v428_v59 }
  0xdc   :  { %2759 = vmatpush1.bf16.msra.mxu1 %v2758_v6  ;;  %2505 = vmatprep.subr.bf16.mxu0 %v2504_v7  ;;  %v387_v6 = vld [vmem:[#allocation5 + $0x940] sm:$0xff] }
  0xdd   :  { %2761 = vmatprep.subr.bf16.mxu1 %v2760_v11  ;;  %v391_v7 = vld [vmem:[#allocation5 + $0x960] sm:$0xff]  ;;  %v396_v11 = vld [vmem:[#allocation5 + $0x988] sm:$0xff] }
  0xde   :  { %761 = vmatmul.mubr.f32.vlgmr.msra.gmra.mrb[0].mxu0 %v85_v17  ;;  %v2526_v15 = vpack.c.bf16 %v391_v7, %v387_v6  ;;  %v433_v6 = vld [vmem:[#allocation5 + $0xab0] sm:$0xff]  ;;  %v436_v7 = vld [vmem:[#allocation5 + $0xac8] sm:$0xff] }
  0xdf   :  { %2507 = vmatpush1.bf16.msra.mxu0 %v2506_v18  ;;  %1045 = vmatmul.mubr.f32.vlgmr.msra.gmra.mrb[0].mxu1 %v85_v17  ;;  %v2528_v17 = vpack.c.bf16 %v400_v12, %v396_v11  ;;  %v395_v18 = vld [vmem:[#allocation5 + $0x980] sm:$0xff]  ;;  %v2548_v13 = vpack.c.bf16 %v440_v8, %v436_v7 }
  0xe0   :  { %2763 = vmatpush1.bf16.msra.mxu1 %v2762_v19  ;;  %2509 = vmatprep.subr.bf16.mxu0 %v2508_v20  ;;  %v399_v19 = vld [vmem:[#allocation5 + $0x9a0] sm:$0xff]  ;;  %v397_v20 = vld [vmem:[#allocation5 + $0x990] sm:$0xff] }
  0xe1   :  { %2765 = vmatprep.subr.bf16.mxu1 %v2764_v24  ;;  %831 = vmatprep.mubr.f32.mxu0 %v88_v30  ;;  %v408_v24 = vld [vmem:[#allocation5 + $0x9e8] sm:$0xff]  ;;  %v2530_v27 = vpack.c.bf16 %v399_v19, %v395_v18  ;;  %v2786_v28 = vpack.c.bf16 %v401_v22, %v397_v20  ;;  %v441_v18 = vld [vmem:[#allocation5 + $0xaf0] sm:$0xff]  ;;  %v450_v22 = vld [vmem:[#allocation5 + $0xb38] sm:$0xff] }
  0xe2   :  { %1115 = vmatprep.mubr.f32.mxu1 %v88_v30  ;;  %v2532_v29 = vpack.c.bf16 %v408_v24, %v404_v23  ;;  %v403_v30 = vld [vmem:[#allocation5 + $0x9c0] sm:$0xff]  ;;  %v444_v19 = vld [vmem:[#allocation5 + $0xb08] sm:$0xff] }
  0xe3   :  { %2511 = vmatpush1.bf16.msra.mxu0 %v2510_v31  ;;  %v407_v31 = vld [vmem:[#allocation5 + $0x9e0] sm:$0xff]  ;;  %v448_v20 = vld [vmem:[#allocation5 + $0xb28] sm:$0xff] }
  0xe4   :  { %2767 = vmatpush1.bf16.msra.mxu1 %v2766_v32  ;;  %2513 = vmatprep.subr.bf16.mxu0 %v2512_v33  ;;  %v405_v32 = vld [vmem:[#allocation5 + $0x9d0] sm:$0xff]  ;;  %v2788_v33 = vpack.c.bf16 %v410_v26, %v406_v25  ;;  %v2534_v39 = vpack.c.bf16 %v407_v31, %v403_v30  ;;  %v2552_v25 = vpack.c.bf16 %v448_v20, %v444_v19  ;;  %v443_v26 = vld [vmem:[#allocation5 + $0xb00] sm:$0xff]  ;;  %v452_v31 = vld [vmem:[#allocation5 + $0xb48] sm:$0xff] }
  0xe5   :  { %2769 = vmatprep.subr.bf16.mxu1 %v2768_v37  ;;  %v414_v37 = vld [vmem:[#allocation5 + $0xa18] sm:$0xff]  ;;  %v2790_v40 = vpack.c.bf16 %v409_v34, %v405_v32  ;;  %v449_v30 = vld [vmem:[#allocation5 + $0xb30] sm:$0xff]  ;;  %v456_v32 = vld [vmem:[#allocation5 + $0xb68] sm:$0xff] }
  0xe6   :  { %v458_v34 = vld [vmem:[#allocation5 + $0xb78] sm:$0xff]  ;;  %v87_v19 = vld [vmem:[#allocation2 + $0x20] sm:$0xff] }
  0xe7   :  { %2515 = vmatpush1.bf16.msra.mxu0 %v2514_v43  ;;  %v415_v43 = vld [vmem:[#allocation5 + $0xa20] sm:$0xff] }
  0xe8   :  { %2771 = vmatpush1.bf16.msra.mxu1 %v2770_v44  ;;  %2517 = vmatprep.subr.bf16.mxu0 %v2516_v45  ;;  %v413_v44 = vld [vmem:[#allocation5 + $0xa10] sm:$0xff]  ;;  %v2792_v45 = vpack.c.bf16 %v418_v38, %v414_v37  ;;  %v2538_v51 = vpack.c.bf16 %v415_v43, %v411_v42  ;;  %v2556_v37 = vpack.c.bf16 %v456_v32, %v452_v31  ;;  %v451_v38 = vld [vmem:[#allocation5 + $0xb40] sm:$0xff]  ;;  %v460_v43 = vld [vmem:[#allocation5 + $0xb88] sm:$0xff] }
  0xe9   :  { %2773 = vmatprep.subr.bf16.mxu1 %v2772_v49  ;;  %v422_v49 = vld [vmem:[#allocation5 + $0xa58] sm:$0xff]  ;;  %v2794_v52 = vpack.c.bf16 %v417_v46, %v413_v44  ;;  %v457_v42 = vld [vmem:[#allocation5 + $0xb70] sm:$0xff]  ;;  %v464_v44 = vld [vmem:[#allocation5 + $0xba8] sm:$0xff] }
  0xea   :  { %v466_v46 = vld [vmem:[#allocation5 + $0xbb8] sm:$0xff] }
  0xeb   :  { %2519 = vmatpush1.bf16.msra.mxu0 %v2518_v55  ;;  %v423_v55 = vld [vmem:[#allocation5 + $0xa60] sm:$0xff]  ;;  %v498_v31 = vld [vmem:[#allocation5 + $0xcb8] sm:$0xff] }
  0xec   :  { %2775 = vmatpush1.bf16.msra.mxu1 %v2774_v56  ;;  %2521 = vmatprep.subr.bf16.mxu0 %v2520_v57  ;;  %v421_v56 = vld [vmem:[#allocation5 + $0xa50] sm:$0xff]  ;;  %v2796_v57 = vpack.c.bf16 %v426_v50, %v422_v49  ;;  %v2542_v63 = vpack.c.bf16 %v423_v55, %v419_v54  ;;  %v2560_v49 = vpack.c.bf16 %v464_v44, %v460_v43  ;;  %v459_v50 = vld [vmem:[#allocation5 + $0xb80] sm:$0xff]  ;;  %v468_v55 = vld [vmem:[#allocation5 + $0xbc8] sm:$0xff] }
  0xed   :  { %2777 = vmatprep.subr.bf16.mxu1 %v2776_v61  ;;  %v430_v61 = vld [vmem:[#allocation5 + $0xa98] sm:$0xff]  ;;  %v2798_v0 = vpack.c.bf16 %v425_v58, %v421_v56  ;;  %v465_v54 = vld [vmem:[#allocation5 + $0xbb0] sm:$0xff]  ;;  %v472_v56 = vld [vmem:[#allocation5 + $0xbe8] sm:$0xff] }
  0xee   :  { %v474_v58 = vld [vmem:[#allocation5 + $0xbf8] sm:$0xff] }
  0xef   :  { %2523 = vmatpush1.bf16.msra.mxu0 %v2522_v3  ;;  %v431_v3 = vld [vmem:[#allocation5 + $0xaa0] sm:$0xff]  ;;  %v90_v32 = vld [vmem:[#allocation2 + $0x38] sm:$0xff] }
  0xf0   :  { %2779 = vmatpush1.bf16.msra.mxu1 %v2778_v4  ;;  %2525 = vmatprep.subr.bf16.mxu0 %v2524_v5  ;;  %v429_v4 = vld [vmem:[#allocation5 + $0xa90] sm:$0xff]  ;;  %v2800_v5 = vpack.c.bf16 %v434_v62, %v430_v61  ;;  %v2546_v11 = vpack.c.bf16 %v431_v3, %v427_v2  ;;  %v2564_v61 = vpack.c.bf16 %v472_v56, %v468_v55  ;;  %v467_v62 = vld [vmem:[#allocation5 + $0xbc0] sm:$0xff]  ;;  %v476_v3 = vld [vmem:[#allocation5 + $0xc08] sm:$0xff] }
  0xf1   :  { %2781 = vmatprep.subr.bf16.mxu1 %v2780_v9  ;;  %v438_v9 = vld [vmem:[#allocation5 + $0xad8] sm:$0xff]  ;;  %v2802_v12 = vpack.c.bf16 %v433_v6, %v429_v4  ;;  %v473_v2 = vld [vmem:[#allocation5 + $0xbf0] sm:$0xff]  ;;  %v480_v4 = vld [vmem:[#allocation5 + $0xc28] sm:$0xff] }
  0xf2   :  { %v482_v6 = vld [vmem:[#allocation5 + $0xc38] sm:$0xff] }
  0xf3   :  { %2527 = vmatpush1.bf16.msra.mxu0 %v2526_v15  ;;  %v439_v15 = vld [vmem:[#allocation5 + $0xae0] sm:$0xff]  ;;  %v502_v43 = vld [vmem:[#allocation5 + $0xcd8] sm:$0xff] }
  0xf4   :  { %2783 = vmatpush1.bf16.msra.mxu1 %v2782_v16  ;;  %2529 = vmatprep.subr.bf16.mxu0 %v2528_v17  ;;  %v437_v16 = vld [vmem:[#allocation5 + $0xad0] sm:$0xff]  ;;  %v2804_v17 = vpack.c.bf16 %v442_v10, %v438_v9  ;;  %v2550_v23 = vpack.c.bf16 %v439_v15, %v435_v14  ;;  %v2568_v9 = vpack.c.bf16 %v480_v4, %v476_v3  ;;  %v475_v10 = vld [vmem:[#allocation5 + $0xc00] sm:$0xff]  ;;  %v484_v15 = vld [vmem:[#allocation5 + $0xc48] sm:$0xff] }
  0xf5   :  { %2785 = vmatprep.subr.bf16.mxu1 %v2784_v21  ;;  %v446_v21 = vld [vmem:[#allocation5 + $0xb18] sm:$0xff]  ;;  %v2806_v24 = vpack.c.bf16 %v441_v18, %v437_v16  ;;  %v481_v14 = vld [vmem:[#allocation5 + $0xc30] sm:$0xff]  ;;  %v488_v16 = vld [vmem:[#allocation5 + $0xc68] sm:$0xff] }
  0xf6   :  { %v490_v18 = vld [vmem:[#allocation5 + $0xc78] sm:$0xff] }
  0xf7   :  { %2531 = vmatpush1.bf16.msra.mxu0 %v2530_v27  ;;  %v447_v27 = vld [vmem:[#allocation5 + $0xb20] sm:$0xff]  ;;  %v506_v44 = vld [vmem:[#allocation5 + $0xcf8] sm:$0xff] }
  0xf8   :  { %2787 = vmatpush1.bf16.msra.mxu1 %v2786_v28  ;;  %2533 = vmatprep.subr.bf16.mxu0 %v2532_v29  ;;  %v445_v28 = vld [vmem:[#allocation5 + $0xb10] sm:$0xff]  ;;  %v2808_v29 = vpack.c.bf16 %v450_v22, %v446_v21  ;;  %v2554_v35 = vpack.c.bf16 %v447_v27, %v443_v26  ;;  %v2572_v22 = vpack.c.bf16 %v488_v16, %v484_v15  ;;  %v510_v55 = vld [vmem:[#allocation5 + $0xd18] sm:$0xff] }
  0xf9   :  { %2789 = vmatprep.subr.bf16.mxu1 %v2788_v33  ;;  %v454_v33 = vld [vmem:[#allocation5 + $0xb58] sm:$0xff]  ;;  %v2810_v36 = vpack.c.bf16 %v449_v30, %v445_v28  ;;  %v489_v27 = vld [vmem:[#allocation5 + $0xc70] sm:$0xff]  ;;  %v492_v28 = vld [vmem:[#allocation5 + $0xc88] sm:$0xff] }
  0xfa   :  { %v494_v30 = vld [vmem:[#allocation5 + $0xc98] sm:$0xff] }
  0xfb   :  { %2535 = vmatpush1.bf16.msra.mxu0 %v2534_v39  ;;  %v455_v39 = vld [vmem:[#allocation5 + $0xb60] sm:$0xff]  ;;  %v514_v56 = vld [vmem:[#allocation5 + $0xd38] sm:$0xff] }
  0xfc   :  { %2791 = vmatpush1.bf16.msra.mxu1 %v2790_v40  ;;  %2537 = vmatprep.subr.bf16.mxu0 %v2536_v41  ;;  %v453_v40 = vld [vmem:[#allocation5 + $0xb50] sm:$0xff]  ;;  %v2812_v41 = vpack.c.bf16 %v458_v34, %v454_v33  ;;  %v2558_v47 = vpack.c.bf16 %v455_v39, %v451_v38  ;;  %v2832_v39 = vpack.c.bf16 %v498_v31, %v494_v30  ;;  %v518_v3 = vld [vmem:[#allocation5 + $0xd58] sm:$0xff] }
  0xfd   :  { %2793 = vmatprep.subr.bf16.mxu1 %v2792_v45  ;;  %v462_v45 = vld [vmem:[#allocation5 + $0xb98] sm:$0xff]  ;;  %v2814_v48 = vpack.c.bf16 %v457_v42, %v453_v40  ;;  %v493_v38 = vld [vmem:[#allocation5 + $0xc90] sm:$0xff]  ;;  %v504_v42 = vld [vmem:[#allocation5 + $0xce8] sm:$0xff] }
  0xfe   :  { %v497_v40 = vld [vmem:[#allocation5 + $0xcb0] sm:$0xff]  ;;  %v522_v4 = vld [vmem:[#allocation5 + $0xd78] sm:$0xff] }
  0xff   :  { %2539 = vmatpush1.bf16.msra.mxu0 %v2538_v51  ;;  %v463_v51 = vld [vmem:[#allocation5 + $0xba0] sm:$0xff]  ;;  %v526_v15 = vld [vmem:[#allocation5 + $0xd98] sm:$0xff] }
 0x100   :  { %2795 = vmatpush1.bf16.msra.mxu1 %v2794_v52  ;;  %2541 = vmatprep.subr.bf16.mxu0 %v2540_v53  ;;  %v461_v52 = vld [vmem:[#allocation5 + $0xb90] sm:$0xff]  ;;  %v2816_v53 = vpack.c.bf16 %v466_v46, %v462_v45  ;;  %v2562_v59 = vpack.c.bf16 %v463_v51, %v459_v50  ;;  %v2834_v46 = vpack.c.bf16 %v497_v40, %v493_v38  ;;  %v530_v16 = vld [vmem:[#allocation5 + $0xdb8] sm:$0xff]  ;;  %v544_v38 = vld [vmem:[#allocation5 + $0xe28] sm:$0xff] }
 0x101   :  { %2797 = vmatprep.subr.bf16.mxu1 %v2796_v57  ;;  %v470_v57 = vld [vmem:[#allocation5 + $0xbd8] sm:$0xff]  ;;  %v2818_v60 = vpack.c.bf16 %v465_v54, %v461_v52  ;;  %v501_v50 = vld [vmem:[#allocation5 + $0xcd0] sm:$0xff]  ;;  %v2836_v51 = vpack.c.bf16 %v506_v44, %v502_v43  ;;  %v512_v54 = vld [vmem:[#allocation5 + $0xd28] sm:$0xff] }
 0x102   :  { %v505_v52 = vld [vmem:[#allocation5 + $0xcf0] sm:$0xff]  ;;  %v546_v40 = vld [vmem:[#allocation5 + $0xe38] sm:$0xff]  ;;  %v539_v44 = vld [vmem:[#allocation5 + $0xe00] sm:$0xff] }
 0x103   :  { %2543 = vmatpush1.bf16.msra.mxu0 %v2542_v63  ;;  %v471_v63 = vld [vmem:[#allocation5 + $0xbe0] sm:$0xff] }
 0x104   :  { %2799 = vmatpush1.bf16.msra.mxu1 %v2798_v0  ;;  %2545 = vmatprep.subr.bf16.mxu0 %v2544_v1  ;;  %v469_v0 = vld [vmem:[#allocation5 + $0xbd0] sm:$0xff]  ;;  %v2820_v1 = vpack.c.bf16 %v474_v58, %v470_v57  ;;  %v2566_v7 = vpack.c.bf16 %v471_v63, %v467_v62  ;;  %v2838_v58 = vpack.c.bf16 %v505_v52, %v501_v50  ;;  %v552_v50 = vld [vmem:[#allocation5 + $0xe68] sm:$0xff]  ;;  %v554_v52 = vld [vmem:[#allocation5 + $0xe78] sm:$0xff] }
 0x105   :  { %2801 = vmatprep.subr.bf16.mxu1 %v2800_v5  ;;  %v478_v5 = vld [vmem:[#allocation5 + $0xc18] sm:$0xff]  ;;  %v2822_v8 = vpack.c.bf16 %v473_v2, %v469_v0  ;;  %v509_v62 = vld [vmem:[#allocation5 + $0xd10] sm:$0xff]  ;;  %v2840_v63 = vpack.c.bf16 %v514_v56, %v510_v55  ;;  %v520_v2 = vld [vmem:[#allocation5 + $0xd68] sm:$0xff] }
 0x106   :  { %v513_v0 = vld [vmem:[#allocation5 + $0xd30] sm:$0xff]  ;;  %v547_v56 = vld [vmem:[#allocation5 + $0xe40] sm:$0xff] }
 0x107   :  { %2547 = vmatpush1.bf16.msra.mxu0 %v2546_v11  ;;  %v479_v11 = vld [vmem:[#allocation5 + $0xc20] sm:$0xff] }
 0x108   :  { %2803 = vmatpush1.bf16.msra.mxu1 %v2802_v12  ;;  %2549 = vmatprep.subr.bf16.mxu0 %v2548_v13  ;;  %v477_v12 = vld [vmem:[#allocation5 + $0xc10] sm:$0xff]  ;;  %v2824_v13 = vpack.c.bf16 %v482_v6, %v478_v5  ;;  %v2570_v20 = vpack.c.bf16 %v479_v11, %v475_v10  ;;  %v2842_v6 = vpack.c.bf16 %v513_v0, %v509_v62  ;;  %v560_v62 = vld [vmem:[#allocation5 + $0xea8] sm:$0xff]  ;;  %v562_v0 = vld [vmem:[#allocation5 + $0xeb8] sm:$0xff] }
 0x109   :  { %2805 = vmatprep.subr.bf16.mxu1 %v2804_v17  ;;  %v486_v17 = vld [vmem:[#allocation5 + $0xc58] sm:$0xff]  ;;  %v2826_v21 = vpack.c.bf16 %v481_v14, %v477_v12  ;;  %v517_v10 = vld [vmem:[#allocation5 + $0xd50] sm:$0xff]  ;;  %v2844_v11 = vpack.c.bf16 %v522_v4, %v518_v3  ;;  %v528_v14 = vld [vmem:[#allocation5 + $0xda8] sm:$0xff] }
 0x10a   :  { %v2828_v26 = vpack.c.bf16 %v490_v18, %v486_v17  ;;  %v521_v12 = vld [vmem:[#allocation5 + $0xd70] sm:$0xff]  ;;  %v555_v4 = vld [vmem:[#allocation5 + $0xe80] sm:$0xff] }
 0x10b   :  { %2551 = vmatpush1.bf16.msra.mxu0 %v2550_v23  ;;  %v483_v23 = vld [vmem:[#allocation5 + $0xc40] sm:$0xff]  ;;  %v2846_v18 = vpack.c.bf16 %v521_v12, %v517_v10  ;;  %v568_v10 = vld [vmem:[#allocation5 + $0xee8] sm:$0xff]  ;;  %v570_v12 = vld [vmem:[#allocation5 + $0xef8] sm:$0xff] }
 0x10c   :  { %2807 = vmatpush1.bf16.msra.mxu1 %v2806_v24  ;;  %2553 = vmatprep.subr.bf16.mxu0 %v2552_v25  ;;  %v487_v24 = vld [vmem:[#allocation5 + $0xc60] sm:$0xff]  ;;  %v485_v25 = vld [vmem:[#allocation5 + $0xc50] sm:$0xff] }
 0x10d   :  { %2809 = vmatprep.subr.bf16.mxu1 %v2808_v29  ;;  %v496_v29 = vld [vmem:[#allocation5 + $0xca8] sm:$0xff]  ;;  %v2574_v33 = vpack.c.bf16 %v487_v24, %v483_v23  ;;  %v2830_v34 = vpack.c.bf16 %v489_v27, %v485_v25  ;;  %v2848_v23 = vpack.c.bf16 %v530_v16, %v526_v15  ;;  %v529_v24 = vld [vmem:[#allocation5 + $0xdb0] sm:$0xff]  ;;  %v534_v27 = vld [vmem:[#allocation5 + $0xdd8] sm:$0xff] }
 0x10e   :  { %v532_v25 = vld [vmem:[#allocation5 + $0xdc8] sm:$0xff]  ;;  %v563_v16 = vld [vmem:[#allocation5 + $0xec0] sm:$0xff] }
 0x10f   :  { %2555 = vmatpush1.bf16.msra.mxu0 %v2554_v35  ;;  %v2576_v35 = vpack.c.bf16 %v496_v29, %v492_v28  ;;  %v538_v28 = vld [vmem:[#allocation5 + $0xdf8] sm:$0xff] }
 0x110   :  { %2811 = vmatpush1.bf16.msra.mxu1 %v2810_v36  ;;  %2557 = vmatprep.subr.bf16.mxu0 %v2556_v37  ;;  %v491_v36 = vld [vmem:[#allocation5 + $0xc80] sm:$0xff] }
 0x111   :  { %2813 = vmatprep.subr.bf16.mxu1 %v2812_v41  ;;  %v495_v37 = vld [vmem:[#allocation5 + $0xca0] sm:$0xff]  ;;  %v500_v41 = vld [vmem:[#allocation5 + $0xcc8] sm:$0xff] }
 0x112   :  { %v2578_v45 = vpack.c.bf16 %v495_v37, %v491_v36  ;;  %v537_v36 = vld [vmem:[#allocation5 + $0xdf0] sm:$0xff]  ;;  %v540_v37 = vld [vmem:[#allocation5 + $0xe08] sm:$0xff] }
 0x113   :  { %2559 = vmatpush1.bf16.msra.mxu0 %v2558_v47  ;;  %v2580_v47 = vpack.c.bf16 %v504_v42, %v500_v41  ;;  %v2600_v43 = vpack.c.bf16 %v544_v38, %v540_v37 }
 0x114   :  { %2815 = vmatpush1.bf16.msra.mxu1 %v2814_v48  ;;  %2561 = vmatprep.subr.bf16.mxu0 %v2560_v49  ;;  %v499_v48 = vld [vmem:[#allocation5 + $0xcc0] sm:$0xff] }
 0x115   :  { %2817 = vmatprep.subr.bf16.mxu1 %v2816_v53  ;;  %v503_v49 = vld [vmem:[#allocation5 + $0xce0] sm:$0xff]  ;;  %v508_v53 = vld [vmem:[#allocation5 + $0xd08] sm:$0xff] }
 0x116   :  { %v2582_v57 = vpack.c.bf16 %v503_v49, %v499_v48  ;;  %v545_v48 = vld [vmem:[#allocation5 + $0xe30] sm:$0xff]  ;;  %v548_v49 = vld [vmem:[#allocation5 + $0xe48] sm:$0xff] }
 0x117   :  { %2563 = vmatpush1.bf16.msra.mxu0 %v2562_v59  ;;  %v2584_v59 = vpack.c.bf16 %v512_v54, %v508_v53  ;;  %v2604_v55 = vpack.c.bf16 %v552_v50, %v548_v49 }
 0x118   :  { %2819 = vmatpush1.bf16.msra.mxu1 %v2818_v60  ;;  %2565 = vmatprep.subr.bf16.mxu0 %v2564_v61  ;;  %v507_v60 = vld [vmem:[#allocation5 + $0xd00] sm:$0xff] }
 0x119   :  { %2821 = vmatprep.subr.bf16.mxu1 %v2820_v1  ;;  %v511_v61 = vld [vmem:[#allocation5 + $0xd20] sm:$0xff]  ;;  %v516_v1 = vld [vmem:[#allocation5 + $0xd48] sm:$0xff] }
 0x11a   :  { %v2586_v5 = vpack.c.bf16 %v511_v61, %v507_v60  ;;  %v553_v60 = vld [vmem:[#allocation5 + $0xe70] sm:$0xff]  ;;  %v556_v61 = vld [vmem:[#allocation5 + $0xe88] sm:$0xff] }
 0x11b   :  { %2567 = vmatpush1.bf16.msra.mxu0 %v2566_v7  ;;  %v2588_v7 = vpack.c.bf16 %v520_v2, %v516_v1  ;;  %v2608_v3 = vpack.c.bf16 %v560_v62, %v556_v61 }
 0x11c   :  { %2823 = vmatpush1.bf16.msra.mxu1 %v2822_v8  ;;  %2569 = vmatprep.subr.bf16.mxu0 %v2568_v9  ;;  %v515_v8 = vld [vmem:[#allocation5 + $0xd40] sm:$0xff] }
 0x11d   :  { %2825 = vmatprep.subr.bf16.mxu1 %v2824_v13  ;;  %v519_v9 = vld [vmem:[#allocation5 + $0xd60] sm:$0xff]  ;;  %v524_v13 = vld [vmem:[#allocation5 + $0xd88] sm:$0xff] }
 0x11e   :  { %832 = vmatmul.mubr.f32.vlgmr.msra.gmra.mrb[0].mxu0 %v87_v19  ;;  %v2590_v17 = vpack.c.bf16 %v519_v9, %v515_v8  ;;  %v561_v8 = vld [vmem:[#allocation5 + $0xeb0] sm:$0xff]  ;;  %v564_v9 = vld [vmem:[#allocation5 + $0xec8] sm:$0xff] }
 0x11f   :  { %2571 = vmatpush1.bf16.msra.mxu0 %v2570_v20  ;;  %1116 = vmatmul.mubr.f32.vlgmr.msra.gmra.mrb[0].mxu1 %v87_v19  ;;  %v2592_v19 = vpack.c.bf16 %v528_v14, %v524_v13  ;;  %v523_v20 = vld [vmem:[#allocation5 + $0xd80] sm:$0xff]  ;;  %v2612_v15 = vpack.c.bf16 %v568_v10, %v564_v9 }
 0x120   :  { %2827 = vmatpush1.bf16.msra.mxu1 %v2826_v21  ;;  %2573 = vmatprep.subr.bf16.mxu0 %v2572_v22  ;;  %v527_v21 = vld [vmem:[#allocation5 + $0xda0] sm:$0xff]  ;;  %v525_v22 = vld [vmem:[#allocation5 + $0xd90] sm:$0xff] }
 0x121   :  { %2829 = vmatprep.subr.bf16.mxu1 %v2828_v26  ;;  %902 = vmatprep.mubr.f32.mxu0 %v90_v32  ;;  %v536_v26 = vld [vmem:[#allocation5 + $0xde8] sm:$0xff]  ;;  %v2594_v29 = vpack.c.bf16 %v527_v21, %v523_v20  ;;  %v2850_v30 = vpack.c.bf16 %v529_v24, %v525_v22  ;;  %v569_v20 = vld [vmem:[#allocation5 + $0xef0] sm:$0xff]  ;;  %v578_v24 = vld [vmem:[#allocation5 + $0xf38] sm:$0xff] }
 0x122   :  { %1186 = vmatprep.mubr.f32.mxu1 %v90_v32  ;;  %v2596_v31 = vpack.c.bf16 %v536_v26, %v532_v25  ;;  %v531_v32 = vld [vmem:[#allocation5 + $0xdc0] sm:$0xff]  ;;  %v572_v21 = vld [vmem:[#allocation5 + $0xf08] sm:$0xff] }
 0x123   :  { %2575 = vmatpush1.bf16.msra.mxu0 %v2574_v33  ;;  %v535_v33 = vld [vmem:[#allocation5 + $0xde0] sm:$0xff]  ;;  %v576_v22 = vld [vmem:[#allocation5 + $0xf28] sm:$0xff] }
 0x124   :  { %2831 = vmatpush1.bf16.msra.mxu1 %v2830_v34  ;;  %2577 = vmatprep.subr.bf16.mxu0 %v2576_v35  ;;  %v533_v34 = vld [vmem:[#allocation5 + $0xdd0] sm:$0xff]  ;;  %v2852_v35 = vpack.c.bf16 %v538_v28, %v534_v27  ;;  %v2598_v41 = vpack.c.bf16 %v535_v33, %v531_v32  ;;  %v2616_v27 = vpack.c.bf16 %v576_v22, %v572_v21  ;;  %v571_v28 = vld [vmem:[#allocation5 + $0xf00] sm:$0xff]  ;;  %v580_v33 = vld [vmem:[#allocation5 + $0xf48] sm:$0xff] }
 0x125   :  { %2833 = vmatprep.subr.bf16.mxu1 %v2832_v39  ;;  %v542_v39 = vld [vmem:[#allocation5 + $0xe18] sm:$0xff]  ;;  %v2854_v42 = vpack.c.bf16 %v537_v36, %v533_v34  ;;  %v577_v32 = vld [vmem:[#allocation5 + $0xf30] sm:$0xff]  ;;  %v584_v34 = vld [vmem:[#allocation5 + $0xf68] sm:$0xff] }
 0x126   :  { %v586_v36 = vld [vmem:[#allocation5 + $0xf78] sm:$0xff]  ;;  %v89_v21 = vld [vmem:[#allocation2 + $0x30] sm:$0xff] }
 0x127   :  { %2579 = vmatpush1.bf16.msra.mxu0 %v2578_v45  ;;  %v543_v45 = vld [vmem:[#allocation5 + $0xe20] sm:$0xff] }
 0x128   :  { %2835 = vmatpush1.bf16.msra.mxu1 %v2834_v46  ;;  %2581 = vmatprep.subr.bf16.mxu0 %v2580_v47  ;;  %v541_v46 = vld [vmem:[#allocation5 + $0xe10] sm:$0xff]  ;;  %v2856_v47 = vpack.c.bf16 %v546_v40, %v542_v39  ;;  %v2602_v53 = vpack.c.bf16 %v543_v45, %v539_v44  ;;  %v2620_v39 = vpack.c.bf16 %v584_v34, %v580_v33  ;;  %v579_v40 = vld [vmem:[#allocation5 + $0xf40] sm:$0xff]  ;;  %v588_v45 = vld [vmem:[#allocation5 + $0xf88] sm:$0xff] }
 0x129   :  { %2837 = vmatprep.subr.bf16.mxu1 %v2836_v51  ;;  %v550_v51 = vld [vmem:[#allocation5 + $0xe58] sm:$0xff]  ;;  %v2858_v54 = vpack.c.bf16 %v545_v48, %v541_v46  ;;  %v585_v44 = vld [vmem:[#allocation5 + $0xf70] sm:$0xff]  ;;  %v592_v46 = vld [vmem:[#allocation5 + $0xfa8] sm:$0xff] }
 0x12a   :  { %v594_v48 = vld [vmem:[#allocation5 + $0xfb8] sm:$0xff] }
 0x12b   :  { %2583 = vmatpush1.bf16.msra.mxu0 %v2582_v57  ;;  %v551_v57 = vld [vmem:[#allocation5 + $0xe60] sm:$0xff] }
 0x12c   :  { %2839 = vmatpush1.bf16.msra.mxu1 %v2838_v58  ;;  %2585 = vmatprep.subr.bf16.mxu0 %v2584_v59  ;;  %v549_v58 = vld [vmem:[#allocation5 + $0xe50] sm:$0xff]  ;;  %v2860_v59 = vpack.c.bf16 %v554_v52, %v550_v51  ;;  %v2606_v1 = vpack.c.bf16 %v551_v57, %v547_v56  ;;  %v2624_v51 = vpack.c.bf16 %v592_v46, %v588_v45  ;;  %v587_v52 = vld [vmem:[#allocation5 + $0xf80] sm:$0xff]  ;;  %v596_v57 = vld [vmem:[#allocation5 + $0xfc8] sm:$0xff] }
 0x12d   :  { %2841 = vmatprep.subr.bf16.mxu1 %v2840_v63  ;;  %v558_v63 = vld [vmem:[#allocation5 + $0xe98] sm:$0xff]  ;;  %v2862_v2 = vpack.c.bf16 %v553_v60, %v549_v58  ;;  %v593_v56 = vld [vmem:[#allocation5 + $0xfb0] sm:$0xff]  ;;  %v600_v58 = vld [vmem:[#allocation5 + $0xfe8] sm:$0xff] }
 0x12e   :  { %v602_v60 = vld [vmem:[#allocation5 + $0xff8] sm:$0xff] }
 0x12f   :  { %2587 = vmatpush1.bf16.msra.mxu0 %v2586_v5  ;;  %v559_v5 = vld [vmem:[#allocation5 + $0xea0] sm:$0xff] }
 0x130   :  { %2843 = vmatpush1.bf16.msra.mxu1 %v2842_v6  ;;  %2589 = vmatprep.subr.bf16.mxu0 %v2588_v7  ;;  %v557_v6 = vld [vmem:[#allocation5 + $0xe90] sm:$0xff]  ;;  %v2864_v7 = vpack.c.bf16 %v562_v0, %v558_v63  ;;  %v2610_v13 = vpack.c.bf16 %v559_v5, %v555_v4  ;;  %v2628_v63 = vpack.c.bf16 %v600_v58, %v596_v57  ;;  %v595_v0 = vld [vmem:[#allocation5 + $0xfc0] sm:$0xff] }
 0x131   :  { %2845 = vmatprep.subr.bf16.mxu1 %v2844_v11  ;;  %v566_v11 = vld [vmem:[#allocation5 + $0xed8] sm:$0xff]  ;;  %v2866_v14 = vpack.c.bf16 %v561_v8, %v557_v6  ;;  %v601_v4 = vld [vmem:[#allocation5 + $0xff0] sm:$0xff] }
 0x132   :  { %v1230_v5 = vld [vmem:[#allocation8 + $0x8] sm:$0xff]  ;;  %v1240_v8 = vld [vmem:[#allocation8 + $0x58] sm:$0xff] }
 0x133   :  { %2591 = vmatpush1.bf16.msra.mxu0 %v2590_v17  ;;  %v567_v17 = vld [vmem:[#allocation5 + $0xee0] sm:$0xff]  ;;  %v1238_v6 = vld [vmem:[#allocation8 + $0x48] sm:$0xff] }
 0x134   :  { %2847 = vmatpush1.bf16.msra.mxu1 %v2846_v18  ;;  %2593 = vmatprep.subr.bf16.mxu0 %v2592_v19  ;;  %v565_v18 = vld [vmem:[#allocation5 + $0xed0] sm:$0xff]  ;;  %v2868_v19 = vpack.c.bf16 %v570_v12, %v566_v11  ;;  %v2614_v25 = vpack.c.bf16 %v567_v17, %v563_v16  ;;  %v2888_v11 = vpack.c.bf16 %v1238_v6, %v1230_v5  ;;  %v1229_v12 = vld [vmem:[#allocation8] sm:$0xff]  ;;  %v1272_v33 = vld [vmem:[#allocation8 + $0x158] sm:$0xff] }
 0x135   :  { %2849 = vmatprep.subr.bf16.mxu1 %v2848_v23  ;;  %v574_v23 = vld [vmem:[#allocation5 + $0xf18] sm:$0xff]  ;;  %v2870_v26 = vpack.c.bf16 %v569_v20, %v565_v18  ;;  %v1246_v17 = vld [vmem:[#allocation8 + $0x88] sm:$0xff] }
 0x136   :  { %v1239_v16 = vld [vmem:[#allocation8 + $0x50] sm:$0xff]  ;;  %v1254_v18 = vld [vmem:[#allocation8 + $0xc8] sm:$0xff]  ;;  %v1256_v20 = vld [vmem:[#allocation8 + $0xd8] sm:$0xff] }
 0x137   :  { %2595 = vmatpush1.bf16.msra.mxu0 %v2594_v29  ;;  %v575_v29 = vld [vmem:[#allocation5 + $0xf20] sm:$0xff] }
 0x138   :  { %2851 = vmatpush1.bf16.msra.mxu1 %v2850_v30  ;;  %2597 = vmatprep.subr.bf16.mxu0 %v2596_v31  ;;  %v573_v30 = vld [vmem:[#allocation5 + $0xf10] sm:$0xff]  ;;  %v2872_v31 = vpack.c.bf16 %v578_v24, %v574_v23  ;;  %v2618_v37 = vpack.c.bf16 %v575_v29, %v571_v28  ;;  %v2892_v24 = vpack.c.bf16 %v1254_v18, %v1246_v17  ;;  %v1288_v45 = vld [vmem:[#allocation8 + $0x1d8] sm:$0xff] }
 0x139   :  { %2853 = vmatprep.subr.bf16.mxu1 %v2852_v35  ;;  %v582_v35 = vld [vmem:[#allocation5 + $0xf58] sm:$0xff]  ;;  %v2874_v38 = vpack.c.bf16 %v577_v32, %v573_v30  ;;  %v1262_v30 = vld [vmem:[#allocation8 + $0x108] sm:$0xff] }
 0x13a   :  { %v1255_v29 = vld [vmem:[#allocation8 + $0xd0] sm:$0xff]  ;;  %v1264_v32 = vld [vmem:[#allocation8 + $0x118] sm:$0xff] }
 0x13b   :  { %2599 = vmatpush1.bf16.msra.mxu0 %v2598_v41  ;;  %v583_v41 = vld [vmem:[#allocation5 + $0xf60] sm:$0xff] }
 0x13c   :  { %2855 = vmatpush1.bf16.msra.mxu1 %v2854_v42  ;;  %2601 = vmatprep.subr.bf16.mxu0 %v2600_v43  ;;  %v581_v42 = vld [vmem:[#allocation5 + $0xf50] sm:$0xff]  ;;  %v2876_v43 = vpack.c.bf16 %v586_v36, %v582_v35  ;;  %v2622_v49 = vpack.c.bf16 %v583_v41, %v579_v40  ;;  %v3024_v40 = vpack.c.bf16 %v1272_v33, %v1264_v32  ;;  %v1304_v57 = vld [vmem:[#allocation8 + $0x258] sm:$0xff]  ;;  %v1341_v33 = vld [vmem:[#allocation8 + $0x380] sm:$0xff] }
 0x13d   :  { %2857 = vmatprep.subr.bf16.mxu1 %v2856_v47  ;;  %v590_v47 = vld [vmem:[#allocation5 + $0xf98] sm:$0xff]  ;;  %v2878_v50 = vpack.c.bf16 %v585_v44, %v581_v42  ;;  %v1278_v42 = vld [vmem:[#allocation8 + $0x188] sm:$0xff] }
 0x13e   :  { %v1271_v41 = vld [vmem:[#allocation8 + $0x150] sm:$0xff]  ;;  %v1280_v44 = vld [vmem:[#allocation8 + $0x198] sm:$0xff] }
 0x13f   :  { %2603 = vmatpush1.bf16.msra.mxu0 %v2602_v53  ;;  %v591_v53 = vld [vmem:[#allocation5 + $0xfa0] sm:$0xff] }
 0x140   :  { %2859 = vmatpush1.bf16.msra.mxu1 %v2858_v54  ;;  %2605 = vmatprep.subr.bf16.mxu0 %v2604_v55  ;;  %v589_v54 = vld [vmem:[#allocation5 + $0xf90] sm:$0xff]  ;;  %v2880_v55 = vpack.c.bf16 %v594_v48, %v590_v47  ;;  %v2626_v61 = vpack.c.bf16 %v591_v53, %v587_v52  ;;  %v3028_v52 = vpack.c.bf16 %v1288_v45, %v1280_v44  ;;  %v1320_v5 = vld [vmem:[#allocation8 + $0x2d8] sm:$0xff]  ;;  %v1357_v45 = vld [vmem:[#allocation8 + $0x400] sm:$0xff] }
 0x141   :  { %2861 = vmatprep.subr.bf16.mxu1 %v2860_v59  ;;  %v598_v59 = vld [vmem:[#allocation5 + $0xfd8] sm:$0xff]  ;;  %v2882_v62 = vpack.c.bf16 %v593_v56, %v589_v54  ;;  %v1294_v54 = vld [vmem:[#allocation8 + $0x208] sm:$0xff] }
 0x142   :  { %v1287_v53 = vld [vmem:[#allocation8 + $0x1d0] sm:$0xff]  ;;  %v1296_v56 = vld [vmem:[#allocation8 + $0x218] sm:$0xff] }
 0x143   :  { %2607 = vmatpush1.bf16.msra.mxu0 %v2606_v1  ;;  %v599_v1 = vld [vmem:[#allocation5 + $0xfe0] sm:$0xff] }
 0x144   :  { %2863 = vmatpush1.bf16.msra.mxu1 %v2862_v2  ;;  %2609 = vmatprep.subr.bf16.mxu0 %v2608_v3  ;;  %v597_v2 = vld [vmem:[#allocation5 + $0xfd0] sm:$0xff]  ;;  %v2884_v3 = vpack.c.bf16 %v602_v60, %v598_v59  ;;  %v2630_v9 = vpack.c.bf16 %v599_v1, %v595_v0  ;;  %v3032_v0 = vpack.c.bf16 %v1304_v57, %v1296_v56  ;;  %v1336_v17 = vld [vmem:[#allocation8 + $0x358] sm:$0xff]  ;;  %v1373_v57 = vld [vmem:[#allocation8 + $0x480] sm:$0xff] }
 0x145   :  { %2865 = vmatprep.subr.bf16.mxu1 %v2864_v7  ;;  %v1232_v7 = vld [vmem:[#allocation8 + $0x18] sm:$0xff]  ;;  %v2886_v10 = vpack.c.bf16 %v601_v4, %v597_v2  ;;  %v1303_v1 = vld [vmem:[#allocation8 + $0x250] sm:$0xff]  ;;  %v1310_v2 = vld [vmem:[#allocation8 + $0x288] sm:$0xff] }
 0x146   :  { %v1312_v4 = vld [vmem:[#allocation8 + $0x298] sm:$0xff] }
 0x147   :  { %2611 = vmatpush1.bf16.msra.mxu0 %v2610_v13  ;;  %v1237_v13 = vld [vmem:[#allocation8 + $0x40] sm:$0xff]  ;;  %v1384_v56 = vld [vmem:[#allocation8 + $0x4d8] sm:$0xff] }
 0x148   :  { %2867 = vmatpush1.bf16.msra.mxu1 %v2866_v14  ;;  %2613 = vmatprep.subr.bf16.mxu0 %v2612_v15  ;;  %v1231_v14 = vld [vmem:[#allocation8 + $0x10] sm:$0xff]  ;;  %v3016_v15 = vpack.c.bf16 %v1240_v8, %v1232_v7  ;;  %v2890_v22 = vpack.c.bf16 %v1237_v13, %v1229_v12  ;;  %v3036_v12 = vpack.c.bf16 %v1320_v5, %v1312_v4  ;;  %v1400_v4 = vld [vmem:[#allocation8 + $0x558] sm:$0xff]  ;;  %v1389_v5 = vld [vmem:[#allocation8 + $0x500] sm:$0xff] }
 0x149   :  { %2869 = vmatprep.subr.bf16.mxu1 %v2868_v19  ;;  %v1248_v19 = vld [vmem:[#allocation8 + $0x98] sm:$0xff]  ;;  %v3018_v23 = vpack.c.bf16 %v1239_v16, %v1231_v14  ;;  %v1319_v13 = vld [vmem:[#allocation8 + $0x2d0] sm:$0xff]  ;;  %v1326_v14 = vld [vmem:[#allocation8 + $0x308] sm:$0xff] }
 0x14a   :  { %v3020_v28 = vpack.c.bf16 %v1256_v20, %v1248_v19  ;;  %v1328_v16 = vld [vmem:[#allocation8 + $0x318] sm:$0xff] }
 0x14b   :  { %2615 = vmatpush1.bf16.msra.mxu0 %v2614_v25  ;;  %v1245_v25 = vld [vmem:[#allocation8 + $0x80] sm:$0xff] }
 0x14c   :  { %2871 = vmatpush1.bf16.msra.mxu1 %v2870_v26  ;;  %2617 = vmatprep.subr.bf16.mxu0 %v2616_v27  ;;  %v1253_v26 = vld [vmem:[#allocation8 + $0xc0] sm:$0xff]  ;;  %v1247_v27 = vld [vmem:[#allocation8 + $0x90] sm:$0xff] }
 0x14d   :  { %2873 = vmatprep.subr.bf16.mxu1 %v2872_v31  ;;  %v1270_v31 = vld [vmem:[#allocation8 + $0x148] sm:$0xff]  ;;  %v2894_v34 = vpack.c.bf16 %v1253_v26, %v1245_v25  ;;  %v3022_v35 = vpack.c.bf16 %v1255_v29, %v1247_v27  ;;  %v1335_v25 = vld [vmem:[#allocation8 + $0x350] sm:$0xff]  ;;  %v1352_v29 = vld [vmem:[#allocation8 + $0x3d8] sm:$0xff] }
 0x14e   :  { %v2896_v36 = vpack.c.bf16 %v1270_v31, %v1262_v30  ;;  %v1342_v26 = vld [vmem:[#allocation8 + $0x388] sm:$0xff] }
 0x14f   :  { %2619 = vmatpush1.bf16.msra.mxu0 %v2618_v37  ;;  %v1261_v37 = vld [vmem:[#allocation8 + $0x100] sm:$0xff]  ;;  %v1350_v27 = vld [vmem:[#allocation8 + $0x3c8] sm:$0xff] }
 0x150   :  { %2875 = vmatpush1.bf16.msra.mxu1 %v2874_v38  ;;  %2621 = vmatprep.subr.bf16.mxu0 %v2620_v39  ;;  %v1269_v38 = vld [vmem:[#allocation8 + $0x140] sm:$0xff]  ;;  %v1263_v39 = vld [vmem:[#allocation8 + $0x110] sm:$0xff]  ;;  %v2916_v32 = vpack.c.bf16 %v1350_v27, %v1342_v26  ;;  %v1424_v26 = vld [vmem:[#allocation8 + $0x618] sm:$0xff] }
 0x151   :  { %2877 = vmatprep.subr.bf16.mxu1 %v2876_v43  ;;  %v1286_v43 = vld [vmem:[#allocation8 + $0x1c8] sm:$0xff]  ;;  %v2898_v46 = vpack.c.bf16 %v1269_v38, %v1261_v37  ;;  %v3026_v47 = vpack.c.bf16 %v1271_v41, %v1263_v39  ;;  %v1351_v37 = vld [vmem:[#allocation8 + $0x3d0] sm:$0xff]  ;;  %v1368_v41 = vld [vmem:[#allocation8 + $0x458] sm:$0xff] }
 0x152   :  { %v2900_v48 = vpack.c.bf16 %v1286_v43, %v1278_v42  ;;  %v1358_v38 = vld [vmem:[#allocation8 + $0x408] sm:$0xff] }
 0x153   :  { %2623 = vmatpush1.bf16.msra.mxu0 %v2622_v49  ;;  %v1277_v49 = vld [vmem:[#allocation8 + $0x180] sm:$0xff]  ;;  %v1366_v39 = vld [vmem:[#allocation8 + $0x448] sm:$0xff] }
 0x154   :  { %2879 = vmatpush1.bf16.msra.mxu1 %v2878_v50  ;;  %2625 = vmatprep.subr.bf16.mxu0 %v2624_v51  ;;  %v1285_v50 = vld [vmem:[#allocation8 + $0x1c0] sm:$0xff]  ;;  %v1279_v51 = vld [vmem:[#allocation8 + $0x190] sm:$0xff]  ;;  %v2920_v44 = vpack.c.bf16 %v1366_v39, %v1358_v38  ;;  %v1440_v38 = vld [vmem:[#allocation8 + $0x698] sm:$0xff] }
 0x155   :  { %2881 = vmatprep.subr.bf16.mxu1 %v2880_v55  ;;  %v1302_v55 = vld [vmem:[#allocation8 + $0x248] sm:$0xff]  ;;  %v2902_v58 = vpack.c.bf16 %v1285_v50, %v1277_v49  ;;  %v3030_v59 = vpack.c.bf16 %v1287_v53, %v1279_v51  ;;  %v1367_v49 = vld [vmem:[#allocation8 + $0x450] sm:$0xff]  ;;  %v1448_v39 = vld [vmem:[#allocation8 + $0x6d8] sm:$0xff] }
 0x156   :  { %v2904_v60 = vpack.c.bf16 %v1302_v55, %v1294_v54  ;;  %v1382_v53 = vld [vmem:[#allocation8 + $0x4c8] sm:$0xff]  ;;  %v1376_v54 = vld [vmem:[#allocation8 + $0x498] sm:$0xff] }
 0x157   :  { %2627 = vmatpush1.bf16.msra.mxu0 %v2626_v61  ;;  %v1293_v61 = vld [vmem:[#allocation8 + $0x200] sm:$0xff] }
 0x158   :  { %2883 = vmatpush1.bf16.msra.mxu1 %v2882_v62  ;;  %2629 = vmatprep.subr.bf16.mxu0 %v2628_v63  ;;  %v1301_v62 = vld [vmem:[#allocation8 + $0x240] sm:$0xff]  ;;  %v1295_v63 = vld [vmem:[#allocation8 + $0x210] sm:$0xff] }
 0x159   :  { %2885 = vmatprep.subr.bf16.mxu1 %v2884_v3  ;;  %v1318_v3 = vld [vmem:[#allocation8 + $0x2c8] sm:$0xff]  ;;  %v2906_v6 = vpack.c.bf16 %v1301_v62, %v1293_v61  ;;  %v3034_v7 = vpack.c.bf16 %v1303_v1, %v1295_v63  ;;  %v1375_v61 = vld [vmem:[#allocation8 + $0x490] sm:$0xff] }
 0x15a   :  { %v2908_v8 = vpack.c.bf16 %v1318_v3, %v1310_v2  ;;  %v1383_v62 = vld [vmem:[#allocation8 + $0x4d0] sm:$0xff]  ;;  %v1398_v1 = vld [vmem:[#allocation8 + $0x548] sm:$0xff]  ;;  %v1392_v2 = vld [vmem:[#allocation8 + $0x518] sm:$0xff] }
 0x15b   :  { %2631 = vmatpush1.bf16.msra.mxu0 %v2630_v9  ;;  %v1309_v9 = vld [vmem:[#allocation8 + $0x280] sm:$0xff]  ;;  %v3054_v63 = vpack.c.bf16 %v1383_v62, %v1375_v61  ;;  %v1472_v61 = vld [vmem:[#allocation8 + $0x798] sm:$0xff] }
 0x15c   :  { %2887 = vmatpush1.bf16.msra.mxu1 %v2886_v10  ;;  %2889 = vmatprep.subr.bf16.mxu0 %v2888_v11  ;;  %v1317_v10 = vld [vmem:[#allocation8 + $0x2c0] sm:$0xff]  ;;  %v1311_v11 = vld [vmem:[#allocation8 + $0x290] sm:$0xff] }
 0x15d   :  { %3017 = vmatprep.subr.bf16.mxu1 %v3016_v15  ;;  %v1334_v15 = vld [vmem:[#allocation8 + $0x348] sm:$0xff]  ;;  %v2910_v18 = vpack.c.bf16 %v1317_v10, %v1309_v9  ;;  %v3038_v19 = vpack.c.bf16 %v1319_v13, %v1311_v11  ;;  %v1391_v9 = vld [vmem:[#allocation8 + $0x510] sm:$0xff] }
 0x15e   :  { %903 = vmatmul.mubr.f32.vlgmr.msra.gmra.mrb[0].mxu0 %v89_v21  ;;  %v2912_v20 = vpack.c.bf16 %v1334_v15, %v1326_v14  ;;  %v1399_v10 = vld [vmem:[#allocation8 + $0x550] sm:$0xff]  ;;  %v1414_v13 = vld [vmem:[#allocation8 + $0x5c8] sm:$0xff]  ;;  %v1408_v14 = vld [vmem:[#allocation8 + $0x598] sm:$0xff] }
 0x15f   :  { %1187 = vmatmul.mubr.f32.vlgmr.msra.gmra.mrb[0].mxu1 %v89_v21  ;;  %2891 = vmatpush1.bf16.msra.mxu0 %v2890_v22  ;;  %v1325_v21 = vld [vmem:[#allocation8 + $0x300] sm:$0xff]  ;;  %v3058_v11 = vpack.c.bf16 %v1399_v10, %v1391_v9  ;;  %v1494_v9 = vld [vmem:[#allocation8 + $0x848] sm:$0xff]  ;;  %v1488_v10 = vld [vmem:[#allocation8 + $0x818] sm:$0xff] }
 0x160   :  { %3019 = vmatpush1.bf16.msra.mxu1 %v3018_v23  ;;  %2893 = vmatprep.subr.bf16.mxu0 %v2892_v24  ;;  %v1333_v22 = vld [vmem:[#allocation8 + $0x340] sm:$0xff]  ;;  %v1327_v23 = vld [vmem:[#allocation8 + $0x310] sm:$0xff]  ;;  %v3040_v24 = vpack.c.bf16 %v1336_v17, %v1328_v16  ;;  %v1416_v16 = vld [vmem:[#allocation8 + $0x5d8] sm:$0xff] }
 0x161   :  { %3021 = vmatprep.subr.bf16.mxu1 %v3020_v28  ;;  %v1344_v28 = vld [vmem:[#allocation8 + $0x398] sm:$0xff]  ;;  %v2914_v30 = vpack.c.bf16 %v1333_v22, %v1325_v21  ;;  %v3042_v31 = vpack.c.bf16 %v1335_v25, %v1327_v23  ;;  %v1405_v17 = vld [vmem:[#allocation8 + $0x580] sm:$0xff]  ;;  %v1407_v21 = vld [vmem:[#allocation8 + $0x590] sm:$0xff] }
 0x162   :  { %v1415_v22 = vld [vmem:[#allocation8 + $0x5d0] sm:$0xff]  ;;  %v1430_v25 = vld [vmem:[#allocation8 + $0x648] sm:$0xff] }
 0x163   :  { %2895 = vmatpush1.bf16.msra.mxu0 %v2894_v34  ;;  %v1349_v34 = vld [vmem:[#allocation8 + $0x3c0] sm:$0xff]  ;;  %v3062_v23 = vpack.c.bf16 %v1415_v22, %v1407_v21 }
 0x164   :  { %3023 = vmatpush1.bf16.msra.mxu1 %v3022_v35  ;;  %2897 = vmatprep.subr.bf16.mxu0 %v2896_v36  ;;  %v1343_v35 = vld [vmem:[#allocation8 + $0x390] sm:$0xff]  ;;  %v3044_v36 = vpack.c.bf16 %v1352_v29, %v1344_v28  ;;  %v2918_v42 = vpack.c.bf16 %v1349_v34, %v1341_v33  ;;  %v1432_v28 = vld [vmem:[#allocation8 + $0x658] sm:$0xff]  ;;  %v1421_v29 = vld [vmem:[#allocation8 + $0x600] sm:$0xff] }
 0x165   :  { %3025 = vmatprep.subr.bf16.mxu1 %v3024_v40  ;;  %v1360_v40 = vld [vmem:[#allocation8 + $0x418] sm:$0xff]  ;;  %v3046_v43 = vpack.c.bf16 %v1351_v37, %v1343_v35  ;;  %v1423_v33 = vld [vmem:[#allocation8 + $0x610] sm:$0xff]  ;;  %v1438_v35 = vld [vmem:[#allocation8 + $0x688] sm:$0xff] }
 0x166   :  { %v1431_v34 = vld [vmem:[#allocation8 + $0x650] sm:$0xff]  ;;  %v1446_v37 = vld [vmem:[#allocation8 + $0x6c8] sm:$0xff] }
 0x167   :  { %2899 = vmatpush1.bf16.msra.mxu0 %v2898_v46  ;;  %v1365_v46 = vld [vmem:[#allocation8 + $0x440] sm:$0xff] }
 0x168   :  { %3027 = vmatpush1.bf16.msra.mxu1 %v3026_v47  ;;  %2901 = vmatprep.subr.bf16.mxu0 %v2900_v48  ;;  %v3048_v47 = vpack.c.bf16 %v1368_v41, %v1360_v40  ;;  %v1359_v48 = vld [vmem:[#allocation8 + $0x410] sm:$0xff]  ;;  %v2922_v50 = vpack.c.bf16 %v1365_v46, %v1357_v45  ;;  %v2940_v40 = vpack.c.bf16 %v1446_v37, %v1438_v35 }
 0x169   :  { %3029 = vmatprep.subr.bf16.mxu1 %v3028_v52  ;;  %v3050_v51 = vpack.c.bf16 %v1367_v49, %v1359_v48  ;;  %v1374_v52 = vld [vmem:[#allocation8 + $0x488] sm:$0xff]  ;;  %v3068_v41 = vpack.c.bf16 %v1448_v39, %v1440_v38  ;;  %v1447_v46 = vld [vmem:[#allocation8 + $0x6d0] sm:$0xff] }
 0x16a   :  { %v2924_v55 = vpack.c.bf16 %v1382_v53, %v1374_v52  ;;  %v1462_v48 = vld [vmem:[#allocation8 + $0x748] sm:$0xff]  ;;  %v1464_v52 = vld [vmem:[#allocation8 + $0x758] sm:$0xff]  ;;  %v1453_v53 = vld [vmem:[#allocation8 + $0x700] sm:$0xff] }
 0x16b   :  { %2903 = vmatpush1.bf16.msra.mxu0 %v2902_v58  ;;  %v1381_v58 = vld [vmem:[#allocation8 + $0x4c0] sm:$0xff] }
 0x16c   :  { %3031 = vmatpush1.bf16.msra.mxu1 %v3030_v59  ;;  %2905 = vmatprep.subr.bf16.mxu0 %v2904_v60  ;;  %v3052_v59 = vpack.c.bf16 %v1384_v56, %v1376_v54  ;;  %v2926_v60 = vpack.c.bf16 %v1381_v58, %v1373_v57  ;;  %v1455_v56 = vld [vmem:[#allocation8 + $0x710] sm:$0xff] }
 0x16d   :  { %3033 = vmatprep.subr.bf16.mxu1 %v3032_v0  ;;  %v1390_v0 = vld [vmem:[#allocation8 + $0x508] sm:$0xff]  ;;  %v1463_v57 = vld [vmem:[#allocation8 + $0x750] sm:$0xff] }
 0x16e   :  { %v2928_v3 = vpack.c.bf16 %v1398_v1, %v1390_v0  ;;  %v3074_v62 = vpack.c.bf16 %v1463_v57, %v1455_v56  ;;  %v1480_v0 = vld [vmem:[#allocation8 + $0x7d8] sm:$0xff]  ;;  %v1469_v1 = vld [vmem:[#allocation8 + $0x780] sm:$0xff] }
 0x16f   :  { %2907 = vmatpush1.bf16.msra.mxu0 %v2906_v6  ;;  %v1397_v6 = vld [vmem:[#allocation8 + $0x540] sm:$0xff] }
 0x170   :  { %3035 = vmatpush1.bf16.msra.mxu1 %v3034_v7  ;;  %2909 = vmatprep.subr.bf16.mxu0 %v2908_v8  ;;  %v3056_v7 = vpack.c.bf16 %v1400_v4, %v1392_v2  ;;  %v2930_v8 = vpack.c.bf16 %v1397_v6, %v1389_v5  ;;  %v1477_v2 = vld [vmem:[#allocation8 + $0x7c0] sm:$0xff]  ;;  %v1471_v4 = vld [vmem:[#allocation8 + $0x790] sm:$0xff] }
 0x171   :  { %3037 = vmatprep.subr.bf16.mxu1 %v3036_v12  ;;  %v1406_v12 = vld [vmem:[#allocation8 + $0x588] sm:$0xff]  ;;  %v1479_v5 = vld [vmem:[#allocation8 + $0x7d0] sm:$0xff]  ;;  %v2950_v6 = vpack.c.bf16 %v1477_v2, %v1469_v1  ;;  %v1509_v1 = vld [vmem:[#allocation8 + $0x8c0] sm:$0xff] }
 0x172   :  { %v2932_v15 = vpack.c.bf16 %v1414_v13, %v1406_v12  ;;  %v1496_v12 = vld [vmem:[#allocation8 + $0x858] sm:$0xff] }
 0x173   :  { %2911 = vmatpush1.bf16.msra.mxu0 %v2910_v18  ;;  %v1413_v18 = vld [vmem:[#allocation8 + $0x5c0] sm:$0xff]  ;;  %v3080_v13 = vpack.c.bf16 %v1496_v12, %v1488_v10  ;;  %v1520_v10 = vld [vmem:[#allocation8 + $0x918] sm:$0xff] }
 0x174   :  { %3039 = vmatpush1.bf16.msra.mxu1 %v3038_v19  ;;  %2913 = vmatprep.subr.bf16.mxu0 %v2912_v20  ;;  %v3060_v19 = vpack.c.bf16 %v1416_v16, %v1408_v14  ;;  %v2934_v20 = vpack.c.bf16 %v1413_v18, %v1405_v17  ;;  %v605_v14 = vlaneseq  ;;  %v3693_v17 = vld [vmem:[#allocation7] sm:$0xf] }
 0x175   :  { %3041 = vmatprep.subr.bf16.mxu1 %v3040_v24  ;;  %v1422_v24 = vld [vmem:[#allocation8 + $0x608] sm:$0xff] }
 0x176   :  { %v2936_v27 = vpack.c.bf16 %v1430_v25, %v1422_v24 }
 0x177   :  { %2915 = vmatpush1.bf16.msra.mxu0 %v2914_v30  ;;  %v1429_v30 = vld [vmem:[#allocation8 + $0x640] sm:$0xff] }
 0x178   :  { %3043 = vmatpush1.bf16.msra.mxu1 %v3042_v31  ;;  %2917 = vmatprep.subr.bf16.mxu0 %v2916_v32  ;;  %v3064_v31 = vpack.c.bf16 %v1432_v28, %v1424_v26  ;;  %v2938_v32 = vpack.c.bf16 %v1429_v30, %v1421_v29 }
 0x179   :  { %3045 = vmatprep.subr.bf16.mxu1 %v3044_v36  ;;  %v3066_v36 = vpack.c.bf16 %v1431_v34, %v1423_v33 }
 0x17b   :  { %2919 = vmatpush1.bf16.msra.mxu0 %v2918_v42  ;;  %v1437_v42 = vld [vmem:[#allocation8 + $0x680] sm:$0xff] }
 0x17c   :  { %3047 = vmatpush1.bf16.msra.mxu1 %v3046_v43  ;;  %2921 = vmatprep.subr.bf16.mxu0 %v2920_v44  ;;  %v1445_v43 = vld [vmem:[#allocation8 + $0x6c0] sm:$0xff]  ;;  %v1439_v44 = vld [vmem:[#allocation8 + $0x690] sm:$0xff] }
 0x17d   :  { %3049 = vmatprep.subr.bf16.mxu1 %v3048_v47  ;;  %v2942_v45 = vpack.c.bf16 %v1445_v43, %v1437_v42  ;;  %v1454_v47 = vld [vmem:[#allocation8 + $0x708] sm:$0xff]  ;;  %v3070_v49 = vpack.c.bf16 %v1447_v46, %v1439_v44  ;;  %v1485_v46 = vld [vmem:[#allocation8 + $0x800] sm:$0xff] }
 0x17f   :  { %2923 = vmatpush1.bf16.msra.mxu0 %v2922_v50  ;;  %v2944_v50 = vpack.c.bf16 %v1462_v48, %v1454_v47 }
 0x180   :  { %3051 = vmatpush1.bf16.msra.mxu1 %v3050_v51  ;;  %2925 = vmatprep.subr.bf16.mxu0 %v2924_v55  ;;  %v1456_v51 = vld [vmem:[#allocation8 + $0x718] sm:$0xff]  ;;  %v1461_v55 = vld [vmem:[#allocation8 + $0x740] sm:$0xff] }
 0x181   :  { %3053 = vmatprep.subr.bf16.mxu1 %v3052_v59  ;;  %v3072_v54 = vpack.c.bf16 %v1464_v52, %v1456_v51  ;;  %v2946_v58 = vpack.c.bf16 %v1461_v55, %v1453_v53  ;;  %v1470_v59 = vld [vmem:[#allocation8 + $0x788] sm:$0xff]  ;;  %v1495_v51 = vld [vmem:[#allocation8 + $0x850] sm:$0xff] }
 0x182   :  { %v1502_v55 = vld [vmem:[#allocation8 + $0x888] sm:$0xff] }
 0x183   :  { %2927 = vmatpush1.bf16.msra.mxu0 %v2926_v60  ;;  %v1478_v60 = vld [vmem:[#allocation8 + $0x7c8] sm:$0xff] }
 0x184   :  { %3055 = vmatpush1.bf16.msra.mxu1 %v3054_v63  ;;  %2929 = vmatprep.subr.bf16.mxu0 %v2928_v3  ;;  %v2948_v63 = vpack.c.bf16 %v1478_v60, %v1470_v59  ;;  %v3076_v3 = vpack.c.bf16 %v1480_v0, %v1472_v61  ;;  %v1504_v59 = vld [vmem:[#allocation8 + $0x898] sm:$0xff]  ;;  %v1501_v0 = vld [vmem:[#allocation8 + $0x880] sm:$0xff] }
 0x185   :  { %3057 = vmatprep.subr.bf16.mxu1 %v3056_v7  ;;  %v3078_v7 = vpack.c.bf16 %v1479_v5, %v1471_v4  ;;  %v1512_v60 = vld [vmem:[#allocation8 + $0x8d8] sm:$0xff]  ;;  %v1503_v4 = vld [vmem:[#allocation8 + $0x890] sm:$0xff] }
 0x186   :  { %v1511_v5 = vld [vmem:[#allocation8 + $0x8d0] sm:$0xff] }
 0x187   :  { %2931 = vmatpush1.bf16.msra.mxu0 %v2930_v8  ;;  %v1486_v8 = vld [vmem:[#allocation8 + $0x808] sm:$0xff] }
 0x188   :  { %3059 = vmatpush1.bf16.msra.mxu1 %v3058_v11  ;;  %2933 = vmatprep.subr.bf16.mxu0 %v2932_v15  ;;  %v2952_v11 = vpack.c.bf16 %v1494_v9, %v1486_v8  ;;  %v3690_v15 = vshrl.u32 %v605_v14, 7  ;;  %v3084_v8 = vpack.c.bf16 %v1512_v60, %v1504_v59  ;;  %v1526_v9 = vld [vmem:[#allocation8 + $0x948] sm:$0xff]  ;;  %v3086_v14 = vpack.c.bf16 %v1511_v5, %v1503_v4  ;;  %v1573_v59 = vld [vmem:[#allocation8 + $0xac0] sm:$0xff]  ;;  %v1584_v4 = vld [vmem:[#allocation8 + $0xb18] sm:$0xff] }
 0x189   :  { %3061 = vmatprep.subr.bf16.mxu1 %v3060_v19  ;;  %v1592_v5 = vld [vmem:[#allocation8 + $0xb58] sm:$0xff] }
 0x18a   :  { %v607_v16 = vsub.s32 0, %v3690_v15  ;;  %v611_v18 = vsub.s32 1, %v3690_v15  ;;  %v619_v19 = vsub.s32 3, %v3690_v15 }
 0x18b   :  { %2935 = vmatpush1.bf16.msra.mxu0 %v2934_v20 }
 0x18c   :  { %3063 = vmatpush1.bf16.msra.mxu1 %v3062_v23  ;;  %2937 = vmatprep.subr.bf16.mxu0 %v2936_v27  ;;  %v608_v20 = vrot.slane %v3693_v17, %v607_v16  ;;  %v612_v21 = vrot.slane %v3693_v17, %v611_v18  ;;  %v620_v22 = vrot.slane %v3693_v17, %v619_v19 }
 0x18d   :  { %3065 = vmatprep.subr.bf16.mxu1 %v3064_v31 }
 0x18f   :  { %2939 = vmatpush1.bf16.msra.mxu0 %v2938_v32 }
 0x190   :  { %3067 = vmatpush1.bf16.msra.mxu1 %v3066_v36  ;;  %2941 = vmatprep.subr.bf16.mxu0 %v2940_v40 }
 0x191   :  { %3069 = vmatprep.subr.bf16.mxu1 %v3068_v41 }
 0x193   :  { %2943 = vmatpush1.bf16.msra.mxu0 %v2942_v45 }
 0x194   :  { %3071 = vmatpush1.bf16.msra.mxu1 %v3070_v49  ;;  %2945 = vmatprep.subr.bf16.mxu0 %v2944_v50  ;;  %v1493_v49 = vld [vmem:[#allocation8 + $0x840] sm:$0xff]  ;;  %v1487_v50 = vld [vmem:[#allocation8 + $0x810] sm:$0xff] }
 0x195   :  { %3073 = vmatprep.subr.bf16.mxu1 %v3072_v54 }
 0x197   :  { %2947 = vmatpush1.bf16.msra.mxu0 %v2946_v58  ;;  %v1510_v58 = vld [vmem:[#allocation8 + $0x8c8] sm:$0xff] }
 0x198   :  { %3075 = vmatpush1.bf16.msra.mxu1 %v3074_v62  ;;  %2949 = vmatprep.subr.bf16.mxu0 %v2948_v63  ;;  %v2954_v62 = vpack.c.bf16 %v1493_v49, %v1485_v46  ;;  %v3082_v63 = vpack.c.bf16 %v1495_v51, %v1487_v50  ;;  %v1557_v46 = vld [vmem:[#allocation8 + $0xa40] sm:$0xff]  ;;  %v1551_v49 = vld [vmem:[#allocation8 + $0xa10] sm:$0xff]  ;;  %v1566_v51 = vld [vmem:[#allocation8 + $0xa88] sm:$0xff] }
 0x199   :  { %3077 = vmatprep.subr.bf16.mxu1 %v3076_v3  ;;  %v1559_v50 = vld [vmem:[#allocation8 + $0xa50] sm:$0xff] }
 0x19b   :  { %2951 = vmatpush1.bf16.msra.mxu0 %v2950_v6  ;;  %v1518_v6 = vld [vmem:[#allocation8 + $0x908] sm:$0xff] }
 0x19c   :  { %3079 = vmatpush1.bf16.msra.mxu1 %v3078_v7  ;;  %2953 = vmatprep.subr.bf16.mxu0 %v2952_v11  ;;  %v2956_v7 = vpack.c.bf16 %v1510_v58, %v1502_v55  ;;  %v1528_v11 = vld [vmem:[#allocation8 + $0x958] sm:$0xff]  ;;  %v615_v55 = vsub.s32 2, %v3690_v15  ;;  %v1565_v58 = vld [vmem:[#allocation8 + $0xa80] sm:$0xff] }
 0x19d   :  { %3081 = vmatprep.subr.bf16.mxu1 %v3080_v13  ;;  %v2958_v13 = vpack.c.bf16 %v1509_v1, %v1501_v0  ;;  %v1575_v0 = vld [vmem:[#allocation8 + $0xad0] sm:$0xff]  ;;  %v1582_v1 = vld [vmem:[#allocation8 + $0xb08] sm:$0xff] }
 0x231   :  { %v904_v23 = vpop.f32.mrb[0].mxu0 }
 0x232   :  { %v3400_v24 = vadd.f32 %v904_v23, %v608_v20  ;;  %v3706_v25 = vpop.f32.mrb[0].mxu1  ;;  %v906_v26 = vpop.f32.mrb[1].mxu0  ;;  %v1517_v20 = vld [vmem:[#allocation8 + $0x900] sm:$0xff]  ;;  %v3088_v23 = vpack.c.bf16 %v1528_v11, %v1520_v10 }
 0x233   :  { %v3401_v27 = vadd.f32 %v906_v26, %v612_v21  ;;  %v1190_v28 = vpop.f32.mrb[1].mxu1  ;;  %v1525_v21 = vld [vmem:[#allocation8 + $0x940] sm:$0xff]  ;;  %v1527_v26 = vld [vmem:[#allocation8 + $0x950] sm:$0xff] }
 0x234   :  { %v1197_v29 = vmul.f32 0.044715, %v3400_v24  ;;  %v3403_v30 = vadd.f32 %v1190_v28, %v620_v22  ;;  %v1193_v56 = vmul.f32 0.5, %v3400_v24  ;;  %v2960_v22 = vpack.c.bf16 %v1526_v9, %v1518_v6  ;;  %v1542_v28 = vld [vmem:[#allocation8 + $0x9c8] sm:$0xff]  ;;  %v1581_v9 = vld [vmem:[#allocation8 + $0xb00] sm:$0xff] }
 0x235   :  { %v1198_v31 = vmul.f32 0.044715, %v3401_v27  ;;  %v1194_v53 = vmul.f32 0.5, %v3401_v27  ;;  %v616_v6 = vrot.slane %v3693_v17, %v615_v55  ;;  %v1589_v10 = vld [vmem:[#allocation8 + $0xb40] sm:$0xff] }
 0x236   :  { %v1201_v32 = vmul.f32 %v3400_v24, %v1197_v29  ;;  %v1200_v33 = vmul.f32 0.044715, %v3403_v30  ;;  %v1196_v3 = vmul.f32 0.5, %v3403_v30  ;;  %v1536_v29 = vld [vmem:[#allocation8 + $0x998] sm:$0xff]  ;;  %v2978_v17 = vpack.c.bf16 %v1589_v10, %v1581_v9  ;;  %v1647_v9 = vld [vmem:[#allocation8 + $0xd10] sm:$0xff] }
 0x237   :  { %v1202_v34 = vmul.f32 %v3401_v27, %v1198_v31  ;;  %v2962_v31 = vpack.c.bf16 %v1525_v21, %v1517_v20  ;;  %v1591_v20 = vld [vmem:[#allocation8 + $0xb50] sm:$0xff]  ;;  %v1598_v21 = vld [vmem:[#allocation8 + $0xb88] sm:$0xff] }
 0x238   :  { %v1205_v35 = vmul.f32 %v3400_v24, %v1201_v32  ;;  %v1204_v36 = vmul.f32 %v3403_v30, %v1200_v33  ;;  %v1533_v33 = vld [vmem:[#allocation8 + $0x980] sm:$0xff]  ;;  %v1655_v10 = vld [vmem:[#allocation8 + $0xd50] sm:$0xff] }
 0x239   :  { %v1206_v37 = vmul.f32 %v3401_v27, %v1202_v34  ;;  %v1541_v34 = vld [vmem:[#allocation8 + $0x9c0] sm:$0xff] }
 0x23a   :  { %v1209_v38 = vadd.f32 %v3400_v24, %v1205_v35  ;;  %v1208_v39 = vmul.f32 %v3403_v30, %v1204_v36  ;;  %v1519_v24 = vld [vmem:[#allocation8 + $0x910] sm:$0xff] }
 0x23b   :  { %v1210_v40 = vadd.f32 %v3401_v27, %v1206_v37  ;;  %v1534_v27 = vld [vmem:[#allocation8 + $0x988] sm:$0xff]  ;;  %v3090_v32 = vpack.c.bf16 %v1527_v26, %v1519_v24  ;;  %v1535_v37 = vld [vmem:[#allocation8 + $0x990] sm:$0xff]  ;;  %v1608_v24 = vld [vmem:[#allocation8 + $0xbd8] sm:$0xff]  ;;  %v3725_v26 = vadd.f32 %v3706_v25, %v616_v6 }
 0x23c   :  { %v1212_v41 = vadd.f32 %v3403_v30, %v1208_v39  ;;  %v1213_v42 = vmul.f32 0.7978846, %v1209_v38  ;;  %v1544_v30 = vld [vmem:[#allocation8 + $0x9d8] sm:$0xff]  ;;  %v2964_v35 = vpack.c.bf16 %v1542_v28, %v1534_v27  ;;  %v1543_v38 = vld [vmem:[#allocation8 + $0x9d0] sm:$0xff]  ;;  %v1550_v39 = vld [vmem:[#allocation8 + $0xa08] sm:$0xff] }
 0x23d   :  { %v1214_v43 = vmul.f32 0.7978846, %v1210_v40  ;;  %v3092_v36 = vpack.c.bf16 %v1544_v30, %v1536_v29  ;;  %v1558_v40 = vld [vmem:[#allocation8 + $0xa48] sm:$0xff]  ;;  %v1597_v28 = vld [vmem:[#allocation8 + $0xb80] sm:$0xff] }
 0x23e   :  { %3442 = vtanh.f32 %v1213_v42  ;;  %v1216_v44 = vmul.f32 0.7978846, %v1212_v41  ;;  %v1552_v41 = vld [vmem:[#allocation8 + $0xa18] sm:$0xff]  ;;  %v1605_v29 = vld [vmem:[#allocation8 + $0xbc0] sm:$0xff] }
 0x23f   :  { %3444 = vtanh.f32 %v1214_v43  ;;  %v1560_v42 = vld [vmem:[#allocation8 + $0xa58] sm:$0xff]  ;;  %v2966_v43 = vpack.c.bf16 %v1541_v34, %v1533_v33  ;;  %v1607_v33 = vld [vmem:[#allocation8 + $0xbd0] sm:$0xff]  ;;  %v1614_v34 = vld [vmem:[#allocation8 + $0xc08] sm:$0xff]  ;;  %v2982_v25 = vpack.c.bf16 %v1605_v29, %v1597_v28 }
 0x240   :  { %3446 = vtanh.f32 %v1216_v44  ;;  %v3094_v44 = vpack.c.bf16 %v1543_v38, %v1535_v37  ;;  %v1624_v37 = vld [vmem:[#allocation8 + $0xc58] sm:$0xff]  ;;  %v1199_v38 = vmul.f32 0.044715, %v3725_v26  ;;  %v1653_v6 = vld [vmem:[#allocation8 + $0xd40] sm:$0xff]  ;;  %v1663_v29 = vld [vmem:[#allocation8 + $0xd90] sm:$0xff] }
 0x248   :  { %v3443_v45 = vpop.eup %3442 }
 0x249   :  { %v3445_v47 = vpop.eup %3444  ;;  %v1221_v48 = vadd.f32 1.0, %v3443_v45  ;;  %v1549_v45 = vld [vmem:[#allocation8 + $0xa00] sm:$0xff] }
 0x24a   :  { %v3447_v52 = vpop.eup %3446  ;;  %v1222_v54 = vadd.f32 1.0, %v3445_v47  ;;  %v2968_v47 = vpack.c.bf16 %v1558_v40, %v1550_v39  ;;  %v1613_v40 = vld [vmem:[#allocation8 + $0xc00] sm:$0xff] }
 0x24b   :  { %v1224_v57 = vadd.f32 1.0, %v3447_v52  ;;  %v3710_v2 = vmul.f32 %v1221_v48, %v1193_v56  ;;  %v3096_v48 = vpack.c.bf16 %v1560_v42, %v1552_v41  ;;  %v1574_v52 = vld [vmem:[#allocation8 + $0xac8] sm:$0xff]  ;;  %v2970_v56 = vpack.c.bf16 %v1557_v46, %v1549_v45  ;;  %v1621_v41 = vld [vmem:[#allocation8 + $0xc40] sm:$0xff]  ;;  %v1623_v45 = vld [vmem:[#allocation8 + $0xc50] sm:$0xff] }
 0x24c   :  { %v3708_v61 = vmul.f32 %v1222_v54, %v1194_v53  ;;  %v1568_v53 = vld [vmem:[#allocation8 + $0xa98] sm:$0xff]  ;;  %v2972_v60 = vpack.c.bf16 %v1574_v52, %v1566_v51  ;;  %v1630_v46 = vld [vmem:[#allocation8 + $0xc88] sm:$0xff]  ;;  %v2986_v51 = vpack.c.bf16 %v1621_v41, %v1613_v40  ;;  %v1679_v41 = vld [vmem:[#allocation8 + $0xe10] sm:$0xff] }
 0x24d   :  { %v3716_v12 = vmul.f32 %v1224_v57, %v1196_v3  ;;  %v1576_v54 = vld [vmem:[#allocation8 + $0xad8] sm:$0xff]  ;;  %v3098_v57 = vpack.c.bf16 %v1559_v50, %v1551_v49  ;;  %v1590_v3 = vld [vmem:[#allocation8 + $0xb48] sm:$0xff]  ;;  %v1203_v50 = vmul.f32 %v3725_v26, %v1199_v38  ;;  %v1685_v38 = vld [vmem:[#allocation8 + $0xe40] sm:$0xff] }
 0x24e   :  { %1847 = vmatprep.mubr.f32.mxu0 %v3708_v61  ;;  %1989 = vmatprep.mubr.f32.mxu1 %v3708_v61  ;;  %v2976_v11 = vpack.c.bf16 %v1590_v3, %v1582_v1  ;;  %v1640_v49 = vld [vmem:[#allocation8 + $0xcd8] sm:$0xff] }
 0x24f   :  { %1848 = vmatmul.mubr.f32.vlgmr.msra.gmra.mrb[2].mxu0 %v3710_v2  ;;  %1990 = vmatmul.mubr.f32.vlgmr.msra.gmra.mrb[2].mxu1 %v3710_v2  ;;  %v1207_v1 = vmul.f32 %v3725_v26, %v1203_v50  ;;  %v1701_v50 = vld [vmem:[#allocation8 + $0xec0] sm:$0xff] }
 0x250   :  { %2955 = vmatpush1.bf16.msra.mxu0 %v2954_v62  ;;  %3083 = vmatpush1.bf16.msra.mxu1 %v3082_v63  ;;  %v3100_v62 = vpack.c.bf16 %v1576_v54, %v1568_v53  ;;  %v1567_v63 = vld [vmem:[#allocation8 + $0xa90] sm:$0xff]  ;;  %v1629_v53 = vld [vmem:[#allocation8 + $0xc80] sm:$0xff] }
 0x251   :  { %1918 = vmatprep.mubr.f32.mxu0 %v3716_v12  ;;  %2060 = vmatprep.mubr.f32.mxu1 %v3716_v12  ;;  %v1637_v54 = vld [vmem:[#allocation8 + $0xcc0] sm:$0xff] }
 0x252   :  { %2957 = vmatprep.subr.bf16.mxu0 %v2956_v7  ;;  %3085 = vmatprep.subr.bf16.mxu1 %v3084_v8  ;;  %v2974_v7 = vpack.c.bf16 %v1573_v59, %v1565_v58  ;;  %v3102_v8 = vpack.c.bf16 %v1575_v0, %v1567_v63  ;;  %v1631_v58 = vld [vmem:[#allocation8 + $0xc90] sm:$0xff]  ;;  %v1648_v63 = vld [vmem:[#allocation8 + $0xd18] sm:$0xff]  ;;  %v2990_v3 = vpack.c.bf16 %v1637_v54, %v1629_v53 }
 0x253   :  { %v1639_v59 = vld [vmem:[#allocation8 + $0xcd0] sm:$0xff]  ;;  %v1656_v0 = vld [vmem:[#allocation8 + $0xd58] sm:$0xff] }
 0x254   :  { %2959 = vmatpush1.bf16.msra.mxu0 %v2958_v13  ;;  %3087 = vmatpush1.bf16.msra.mxu1 %v3086_v14  ;;  %v3104_v13 = vpack.c.bf16 %v1592_v5, %v1584_v4  ;;  %v1583_v14 = vld [vmem:[#allocation8 + $0xb10] sm:$0xff]  ;;  %v3118_v4 = vpack.c.bf16 %v1639_v59, %v1631_v58  ;;  %v1645_v5 = vld [vmem:[#allocation8 + $0xd00] sm:$0xff]  ;;  %v1712_v58 = vld [vmem:[#allocation8 + $0xf18] sm:$0xff] }
 0x255   :  { %2961 = vmatprep.subr.bf16.mxu0 %v2960_v22  ;;  %3089 = vmatprep.subr.bf16.mxu1 %v3088_v23  ;;  %v1606_v22 = vld [vmem:[#allocation8 + $0xbc8] sm:$0xff]  ;;  %v1600_v23 = vld [vmem:[#allocation8 + $0xb98] sm:$0xff]  ;;  %v3106_v27 = vpack.c.bf16 %v1591_v20, %v1583_v14  ;;  %v1695_v53 = vld [vmem:[#allocation8 + $0xe90] sm:$0xff] }
 0x256   :  { %v2980_v30 = vpack.c.bf16 %v1606_v22, %v1598_v21  ;;  %v1664_v14 = vld [vmem:[#allocation8 + $0xd98] sm:$0xff]  ;;  %v1211_v21 = vadd.f32 %v3725_v26, %v1207_v1  ;;  %v2994_v22 = vpack.c.bf16 %v1653_v6, %v1645_v5  ;;  %v1703_v54 = vld [vmem:[#allocation8 + $0xed0] sm:$0xff]  ;;  %v1726_v6 = vld [vmem:[#allocation8 + $0xf88] sm:$0xff] }
 0x257   :  { %v1672_v20 = vld [vmem:[#allocation8 + $0xdd8] sm:$0xff]  ;;  %v1719_v5 = vld [vmem:[#allocation8 + $0xf50] sm:$0xff] }
 0x258   :  { %2963 = vmatpush1.bf16.msra.mxu0 %v2962_v31  ;;  %3091 = vmatpush1.bf16.msra.mxu1 %v3090_v32  ;;  %v3108_v31 = vpack.c.bf16 %v1608_v24, %v1600_v23  ;;  %v1599_v32 = vld [vmem:[#allocation8 + $0xb90] sm:$0xff]  ;;  %v3122_v23 = vpack.c.bf16 %v1655_v10, %v1647_v9  ;;  %v1661_v24 = vld [vmem:[#allocation8 + $0xd80] sm:$0xff]  ;;  %v3124_v28 = vpack.c.bf16 %v1672_v20, %v1664_v14  ;;  %v1720_v59 = vld [vmem:[#allocation8 + $0xf58] sm:$0xff] }
 0x259   :  { %2965 = vmatprep.subr.bf16.mxu0 %v2964_v35  ;;  %3093 = vmatprep.subr.bf16.mxu1 %v3092_v36  ;;  %v1622_v35 = vld [vmem:[#allocation8 + $0xc48] sm:$0xff]  ;;  %v1616_v36 = vld [vmem:[#allocation8 + $0xc18] sm:$0xff]  ;;  %v3110_v39 = vpack.c.bf16 %v1607_v33, %v1599_v32  ;;  %v1733_v14 = vld [vmem:[#allocation8 + $0xfc0] sm:$0xff] }
 0x25a   :  { %v2984_v42 = vpack.c.bf16 %v1622_v35, %v1614_v34  ;;  %v1686_v32 = vld [vmem:[#allocation8 + $0xe48] sm:$0xff]  ;;  %v1680_v33 = vld [vmem:[#allocation8 + $0xe18] sm:$0xff] }
 0x25b   :  { %v1688_v34 = vld [vmem:[#allocation8 + $0xe58] sm:$0xff] }
 0x25c   :  { %2967 = vmatpush1.bf16.msra.mxu0 %v2966_v43  ;;  %3095 = vmatpush1.bf16.msra.mxu1 %v3094_v44  ;;  %v3112_v43 = vpack.c.bf16 %v1624_v37, %v1616_v36  ;;  %v1615_v44 = vld [vmem:[#allocation8 + $0xc10] sm:$0xff]  ;;  %v1677_v37 = vld [vmem:[#allocation8 + $0xe00] sm:$0xff]  ;;  %v3128_v40 = vpack.c.bf16 %v1688_v34, %v1680_v33  ;;  %v1736_v9 = vld [vmem:[#allocation8 + $0xfd8] sm:$0xff] }
 0x25d   :  { %2969 = vmatprep.subr.bf16.mxu0 %v2968_v47  ;;  %3097 = vmatprep.subr.bf16.mxu1 %v3096_v48  ;;  %v1638_v47 = vld [vmem:[#allocation8 + $0xcc8] sm:$0xff]  ;;  %v1632_v48 = vld [vmem:[#allocation8 + $0xc98] sm:$0xff]  ;;  %v3114_v52 = vpack.c.bf16 %v1623_v45, %v1615_v44 }
 0x25e   :  { %v1702_v44 = vld [vmem:[#allocation8 + $0xec8] sm:$0xff]  ;;  %v1696_v45 = vld [vmem:[#allocation8 + $0xe98] sm:$0xff] }
 0x260   :  { %2971 = vmatpush1.bf16.msra.mxu0 %v2970_v56  ;;  %3099 = vmatpush1.bf16.msra.mxu1 %v3098_v57  ;;  %v2988_v56 = vpack.c.bf16 %v1638_v47, %v1630_v46  ;;  %v3116_v57 = vpack.c.bf16 %v1640_v49, %v1632_v48  ;;  %v1704_v46 = vld [vmem:[#allocation8 + $0xed8] sm:$0xff]  ;;  %v3002_v47 = vpack.c.bf16 %v1685_v38, %v1677_v37  ;;  %v1693_v49 = vld [vmem:[#allocation8 + $0xe80] sm:$0xff]  ;;  %v1235_v37 = vld [vmem:[#allocation8 + $0x30] sm:$0xff] }
 0x261   :  { %2973 = vmatprep.subr.bf16.mxu0 %v2972_v60  ;;  %3101 = vmatprep.subr.bf16.mxu1 %v3100_v62  ;;  %v1646_v60 = vld [vmem:[#allocation8 + $0xd08] sm:$0xff]  ;;  %v1243_v38 = vld [vmem:[#allocation8 + $0x70] sm:$0xff] }
 0x262   :  { %v1654_v62 = vld [vmem:[#allocation8 + $0xd48] sm:$0xff] }
 0x264   :  { %2975 = vmatpush1.bf16.msra.mxu0 %v2974_v7  ;;  %3103 = vmatpush1.bf16.msra.mxu1 %v3102_v8  ;;  %v2992_v7 = vpack.c.bf16 %v1654_v62, %v1646_v60  ;;  %v3120_v8 = vpack.c.bf16 %v1656_v0, %v1648_v63  ;;  %v3006_v60 = vpack.c.bf16 %v1701_v50, %v1693_v49  ;;  %v1709_v63 = vld [vmem:[#allocation8 + $0xf00] sm:$0xff] }
 0x265   :  { %2977 = vmatprep.subr.bf16.mxu0 %v2976_v11  ;;  %3105 = vmatprep.subr.bf16.mxu1 %v3104_v13  ;;  %v1662_v11 = vld [vmem:[#allocation8 + $0xd88] sm:$0xff]  ;;  %v3134_v62 = vpack.c.bf16 %v1703_v54, %v1695_v53  ;;  %v1717_v0 = vld [vmem:[#allocation8 + $0xf40] sm:$0xff]  ;;  %v1276_v54 = vld [vmem:[#allocation8 + $0x178] sm:$0xff] }
 0x266   :  { %v1670_v13 = vld [vmem:[#allocation8 + $0xdc8] sm:$0xff]  ;;  %v3010_v10 = vpack.c.bf16 %v1717_v0, %v1709_v63  ;;  %v1275_v0 = vld [vmem:[#allocation8 + $0x170] sm:$0xff] }
 0x267   :  { %v1274_v53 = vld [vmem:[#allocation8 + $0x168] sm:$0xff] }
 0x268   :  { %2979 = vmatpush1.bf16.msra.mxu0 %v2978_v17  ;;  %3107 = vmatpush1.bf16.msra.mxu1 %v3106_v27  ;;  %v1669_v17 = vld [vmem:[#allocation8 + $0xdc0] sm:$0xff]  ;;  %v2996_v27 = vpack.c.bf16 %v1670_v13, %v1662_v11 }
 0x269   :  { %2981 = vmatprep.subr.bf16.mxu0 %v2980_v30  ;;  %3109 = vmatprep.subr.bf16.mxu1 %v3108_v31  ;;  %v1671_v30 = vld [vmem:[#allocation8 + $0xdd0] sm:$0xff]  ;;  %v1678_v31 = vld [vmem:[#allocation8 + $0xe08] sm:$0xff]  ;;  %v2998_v35 = vpack.c.bf16 %v1669_v17, %v1661_v24  ;;  %v1725_v13 = vld [vmem:[#allocation8 + $0xf80] sm:$0xff] }
 0x26a   :  { %v3126_v36 = vpack.c.bf16 %v1671_v30, %v1663_v29  ;;  %v1234_v24 = vld [vmem:[#allocation8 + $0x28] sm:$0xff]  ;;  %v1244_v29 = vld [vmem:[#allocation8 + $0x78] sm:$0xff]  ;;  %v3014_v30 = vpack.c.bf16 %v1733_v14, %v1725_v13  ;;  %v1291_v13 = vld [vmem:[#allocation8 + $0x1f0] sm:$0xff] }
 0x26b   :  { %v1298_v14 = vld [vmem:[#allocation8 + $0x228] sm:$0xff] }
 0x26c   :  { %2983 = vmatpush1.bf16.msra.mxu0 %v2982_v25  ;;  %3111 = vmatpush1.bf16.msra.mxu1 %v3110_v39  ;;  %v1215_v25 = vmul.f32 0.7978846, %v1211_v21  ;;  %v3000_v39 = vpack.c.bf16 %v1686_v32, %v1678_v31 }
 0x26d   :  { %2985 = vmatprep.subr.bf16.mxu0 %v2984_v42  ;;  %3113 = vmatprep.subr.bf16.mxu1 %v3112_v43  ;;  %v1687_v42 = vld [vmem:[#allocation8 + $0xe50] sm:$0xff]  ;;  %v1694_v43 = vld [vmem:[#allocation8 + $0xe88] sm:$0xff] }
 0x26e   :  { %v3130_v48 = vpack.c.bf16 %v1687_v42, %v1679_v41  ;;  %3448 = vtanh.f32 %v1215_v25  ;;  %v1250_v25 = vld [vmem:[#allocation8 + $0xa8] sm:$0xff]  ;;  %v1252_v41 = vld [vmem:[#allocation8 + $0xb8] sm:$0xff] }
 0x26f   :  { %v1260_v42 = vld [vmem:[#allocation8 + $0xf8] sm:$0xff] }
 0x270   :  { %2987 = vmatpush1.bf16.msra.mxu0 %v2986_v51  ;;  %3115 = vmatpush1.bf16.msra.mxu1 %v3114_v52  ;;  %v3004_v51 = vpack.c.bf16 %v1702_v44, %v1694_v43  ;;  %v3132_v52 = vpack.c.bf16 %v1704_v46, %v1696_v45  ;;  %v3274_v45 = vpack.c.bf16 %v1243_v38, %v1235_v37  ;;  %v1249_v46 = vld [vmem:[#allocation8 + $0xa0] sm:$0xff] }
 0x271   :  { %2989 = vmatprep.subr.bf16.mxu0 %v2988_v56  ;;  %3117 = vmatprep.subr.bf16.mxu1 %v3116_v57  ;;  %v1710_v56 = vld [vmem:[#allocation8 + $0xf08] sm:$0xff]  ;;  %v3276_v50 = vpack.c.bf16 %v1260_v42, %v1252_v41  ;;  %v1323_v42 = vld [vmem:[#allocation8 + $0x2f0] sm:$0xff] }
 0x272   :  { %v1718_v57 = vld [vmem:[#allocation8 + $0xf48] sm:$0xff] }
 0x273   :  { %v3008_v1 = vpack.c.bf16 %v1718_v57, %v1710_v56 }
 0x274   :  { %2991 = vmatpush1.bf16.msra.mxu0 %v2990_v3  ;;  %3119 = vmatpush1.bf16.msra.mxu1 %v3118_v4  ;;  %v3136_v3 = vpack.c.bf16 %v1720_v59, %v1712_v58  ;;  %v1711_v4 = vld [vmem:[#allocation8 + $0xf10] sm:$0xff]  ;;  %v1265_v59 = vld [vmem:[#allocation8 + $0x120] sm:$0xff] }
 0x275   :  { %2993 = vmatprep.subr.bf16.mxu0 %v2992_v7  ;;  %3121 = vmatprep.subr.bf16.mxu1 %v3120_v8  ;;  %v1734_v7 = vld [vmem:[#allocation8 + $0xfc8] sm:$0xff]  ;;  %v1728_v8 = vld [vmem:[#allocation8 + $0xf98] sm:$0xff]  ;;  %v3138_v11 = vpack.c.bf16 %v1719_v5, %v1711_v4 }
 0x276   :  { %v3012_v20 = vpack.c.bf16 %v1734_v7, %v1726_v6  ;;  %v3140_v21 = vpack.c.bf16 %v1736_v9, %v1728_v8  ;;  %v1284_v4 = vld [vmem:[#allocation8 + $0x1b8] sm:$0xff]  ;;  %v1289_v9 = vld [vmem:[#allocation8 + $0x1e0] sm:$0xff] }
 0x277   :  { %v1292_v5 = vld [vmem:[#allocation8 + $0x1f8] sm:$0xff] }
 0x278   :  { %2995 = vmatpush1.bf16.msra.mxu0 %v2994_v22  ;;  %3123 = vmatpush1.bf16.msra.mxu1 %v3122_v23  ;;  %v1727_v22 = vld [vmem:[#allocation8 + $0xf90] sm:$0xff]  ;;  %v3449_v17 = vpop.eup %3448 }
 0x279   :  { %2997 = vmatprep.subr.bf16.mxu0 %v2996_v27  ;;  %3125 = vmatprep.subr.bf16.mxu1 %v3124_v28  ;;  %v1735_v23 = vld [vmem:[#allocation8 + $0xfd0] sm:$0xff]  ;;  %v1242_v27 = vld [vmem:[#allocation8 + $0x68] sm:$0xff]  ;;  %v1236_v28 = vld [vmem:[#allocation8 + $0x38] sm:$0xff]  ;;  %v1223_v32 = vadd.f32 1.0, %v3449_v17 }
 0x27a   :  { %v3142_v31 = vpack.c.bf16 %v1735_v23, %v1727_v22  ;;  %v3144_v33 = vpack.c.bf16 %v1242_v27, %v1234_v24  ;;  %v3272_v34 = vpack.c.bf16 %v1244_v29, %v1236_v28  ;;  %v1308_v22 = vld [vmem:[#allocation8 + $0x278] sm:$0xff]  ;;  %v1297_v27 = vld [vmem:[#allocation8 + $0x220] sm:$0xff]  ;;  %v1299_v29 = vld [vmem:[#allocation8 + $0x230] sm:$0xff] }
 0x27b   :  { %v1305_v28 = vld [vmem:[#allocation8 + $0x260] sm:$0xff] }
 0x27c   :  { %2999 = vmatpush1.bf16.msra.mxu0 %v2998_v35  ;;  %3127 = vmatpush1.bf16.msra.mxu1 %v3126_v36  ;;  %v1233_v35 = vld [vmem:[#allocation8 + $0x20] sm:$0xff] }
 0x27d   :  { %3001 = vmatprep.subr.bf16.mxu0 %v3000_v39  ;;  %3129 = vmatprep.subr.bf16.mxu1 %v3128_v40  ;;  %v1241_v36 = vld [vmem:[#allocation8 + $0x60] sm:$0xff]  ;;  %v1195_v39 = vmul.f32 0.5, %v3725_v26  ;;  %v1258_v40 = vld [vmem:[#allocation8 + $0xe8] sm:$0xff]  ;;  %v1268_v26 = vld [vmem:[#allocation8 + $0x138] sm:$0xff] }
 0x27e   :  { %v3146_v43 = vpack.c.bf16 %v1241_v36, %v1233_v35  ;;  %v3148_v49 = vpack.c.bf16 %v1258_v40, %v1250_v25  ;;  %v3280_v63 = vpack.c.bf16 %v1276_v54, %v1268_v26  ;;  %v1324_v35 = vld [vmem:[#allocation8 + $0x2f8] sm:$0xff]  ;;  %v3162_v36 = vpack.c.bf16 %v1305_v28, %v1297_v27  ;;  %v1313_v25 = vld [vmem:[#allocation8 + $0x2a0] sm:$0xff]  ;;  %v1315_v40 = vld [vmem:[#allocation8 + $0x2b0] sm:$0xff] }
 0x27f   :  { %v3732_v44 = vmul.f32 %v1223_v32, %v1195_v39  ;;  %v1314_v32 = vld [vmem:[#allocation8 + $0x2a8] sm:$0xff]  ;;  %v1321_v39 = vld [vmem:[#allocation8 + $0x2e0] sm:$0xff]  ;;  %v1339_v54 = vld [vmem:[#allocation8 + $0x370] sm:$0xff] }
 0x280   :  { %3003 = vmatpush1.bf16.msra.mxu0 %v3002_v47  ;;  %3131 = vmatpush1.bf16.msra.mxu1 %v3130_v48  ;;  %v1257_v47 = vld [vmem:[#allocation8 + $0xe0] sm:$0xff]  ;;  %v1251_v48 = vld [vmem:[#allocation8 + $0xb0] sm:$0xff]  ;;  %v1388_v27 = vld [vmem:[#allocation8 + $0x4f8] sm:$0xff] }
 0x281   :  { %3005 = vmatprep.subr.bf16.mxu0 %v3004_v51  ;;  %3133 = vmatprep.subr.bf16.mxu1 %v3132_v52  ;;  %v1259_v51 = vld [vmem:[#allocation8 + $0xf0] sm:$0xff]  ;;  %v1266_v52 = vld [vmem:[#allocation8 + $0x128] sm:$0xff]  ;;  %v3150_v56 = vpack.c.bf16 %v1257_v47, %v1249_v46  ;;  %v1332_v46 = vld [vmem:[#allocation8 + $0x338] sm:$0xff] }
 0x282   :  { %v3278_v57 = vpack.c.bf16 %v1259_v51, %v1251_v48  ;;  %v3152_v58 = vpack.c.bf16 %v1274_v53, %v1266_v52  ;;  %v1340_v47 = vld [vmem:[#allocation8 + $0x378] sm:$0xff]  ;;  %v3166_v48 = vpack.c.bf16 %v1321_v39, %v1313_v25  ;;  %v1329_v51 = vld [vmem:[#allocation8 + $0x320] sm:$0xff]  ;;  %v1331_v53 = vld [vmem:[#allocation8 + $0x330] sm:$0xff] }
 0x283   :  { %v1337_v52 = vld [vmem:[#allocation8 + $0x360] sm:$0xff]  ;;  %v3296_v26 = vpack.c.bf16 %v1340_v47, %v1332_v46  ;;  %v1404_v25 = vld [vmem:[#allocation8 + $0x578] sm:$0xff]  ;;  %v1403_v47 = vld [vmem:[#allocation8 + $0x570] sm:$0xff] }
 0x284   :  { %3007 = vmatpush1.bf16.msra.mxu0 %v3006_v60  ;;  %3135 = vmatpush1.bf16.msra.mxu1 %v3134_v62  ;;  %v1273_v60 = vld [vmem:[#allocation8 + $0x160] sm:$0xff]  ;;  %v1267_v62 = vld [vmem:[#allocation8 + $0x130] sm:$0xff] }
 0x285   :  { %3009 = vmatprep.subr.bf16.mxu0 %v3008_v1  ;;  %3137 = vmatprep.subr.bf16.mxu1 %v3136_v3  ;;  %v1282_v1 = vld [vmem:[#allocation8 + $0x1a8] sm:$0xff]  ;;  %v3154_v6 = vpack.c.bf16 %v1273_v60, %v1265_v59  ;;  %v3282_v7 = vpack.c.bf16 %v1275_v0, %v1267_v62  ;;  %v1356_v59 = vld [vmem:[#allocation8 + $0x3f8] sm:$0xff]  ;;  %v3170_v60 = vpack.c.bf16 %v1337_v52, %v1329_v51  ;;  %v1345_v0 = vld [vmem:[#allocation8 + $0x3a0] sm:$0xff] }
 0x286   :  { %v1290_v3 = vld [vmem:[#allocation8 + $0x1e8] sm:$0xff]  ;;  %v3298_v62 = vpack.c.bf16 %v1339_v54, %v1331_v53  ;;  %v1420_v51 = vld [vmem:[#allocation8 + $0x5f8] sm:$0xff]  ;;  %v1409_v54 = vld [vmem:[#allocation8 + $0x5a0] sm:$0xff] }
 0x287   :  { %v3156_v8 = vpack.c.bf16 %v1290_v3, %v1282_v1  ;;  %v1353_v1 = vld [vmem:[#allocation8 + $0x3e0] sm:$0xff]  ;;  %v1347_v3 = vld [vmem:[#allocation8 + $0x3b0] sm:$0xff] }
 0x288   :  { %3011 = vmatpush1.bf16.msra.mxu0 %v3010_v10  ;;  %3139 = vmatpush1.bf16.msra.mxu1 %v3138_v11  ;;  %v1283_v10 = vld [vmem:[#allocation8 + $0x1b0] sm:$0xff]  ;;  %v3284_v11 = vpack.c.bf16 %v1292_v5, %v1284_v4 }
 0x289   :  { %3013 = vmatprep.subr.bf16.mxu0 %v3012_v20  ;;  %3141 = vmatprep.subr.bf16.mxu1 %v3140_v21  ;;  %v1306_v20 = vld [vmem:[#allocation8 + $0x268] sm:$0xff]  ;;  %v1300_v21 = vld [vmem:[#allocation8 + $0x238] sm:$0xff]  ;;  %v3286_v24 = vpack.c.bf16 %v1291_v13, %v1283_v10  ;;  %v1355_v5 = vld [vmem:[#allocation8 + $0x3f0] sm:$0xff] }
 0x28a   :  { %v3160_v17 = vpack.c.bf16 %v1306_v20, %v1298_v14  ;;  %v3302_v10 = vpack.c.bf16 %v1355_v5, %v1347_v3  ;;  %v1361_v13 = vld [vmem:[#allocation8 + $0x420] sm:$0xff]  ;;  %v1363_v20 = vld [vmem:[#allocation8 + $0x430] sm:$0xff] }
 0x28b   :  { %v1369_v14 = vld [vmem:[#allocation8 + $0x460] sm:$0xff] }
 0x28c   :  { %3015 = vmatpush1.bf16.msra.mxu0 %v3014_v30  ;;  %3143 = vmatpush1.bf16.msra.mxu1 %v3142_v31  ;;  %v3288_v30 = vpack.c.bf16 %v1308_v22, %v1300_v21  ;;  %v1307_v31 = vld [vmem:[#allocation8 + $0x270] sm:$0xff]  ;;  %v3178_v28 = vpack.c.bf16 %v1369_v14, %v1361_v13  ;;  %v1425_v5 = vld [vmem:[#allocation8 + $0x620] sm:$0xff]  ;;  %v1452_v13 = vld [vmem:[#allocation8 + $0x6f8] sm:$0xff] }
 0x28d   :  { %3145 = vmatprep.subr.bf16.mxu0 %v3144_v33  ;;  %3273 = vmatprep.subr.bf16.mxu1 %v3272_v34  ;;  %v1322_v33 = vld [vmem:[#allocation8 + $0x2e8] sm:$0xff]  ;;  %v1316_v34 = vld [vmem:[#allocation8 + $0x2b8] sm:$0xff]  ;;  %v3290_v37 = vpack.c.bf16 %v1307_v31, %v1299_v29  ;;  %v1371_v22 = vld [vmem:[#allocation8 + $0x470] sm:$0xff] }
 0x28e   :  { %v3164_v38 = vpack.c.bf16 %v1322_v33, %v1314_v32  ;;  %v3292_v41 = vpack.c.bf16 %v1324_v35, %v1316_v34  ;;  %v3306_v29 = vpack.c.bf16 %v1371_v22, %v1363_v20  ;;  %v1377_v31 = vld [vmem:[#allocation8 + $0x4a0] sm:$0xff]  ;;  %v1379_v33 = vld [vmem:[#allocation8 + $0x4b0] sm:$0xff] }
 0x28f   :  { %1919 = vmatmul.mubr.f32.vlgmr.msra.gmra.mrb[2].mxu0 %v3732_v44  ;;  %2061 = vmatmul.mubr.f32.vlgmr.msra.gmra.mrb[2].mxu1 %v3732_v44  ;;  %v1385_v32 = vld [vmem:[#allocation8 + $0x4e0] sm:$0xff]  ;;  %v1387_v35 = vld [vmem:[#allocation8 + $0x4f0] sm:$0xff] }
 0x290   :  { %3147 = vmatpush1.bf16.msra.mxu0 %v3146_v43  ;;  %2131 = vmatprep.mubr.f32.mxu0 %v3708_v61  ;;  %v1330_v43 = vld [vmem:[#allocation8 + $0x328] sm:$0xff]  ;;  %v3182_v39 = vpack.c.bf16 %v1385_v32, %v1377_v31  ;;  %v1441_v22 = vld [vmem:[#allocation8 + $0x6a0] sm:$0xff]  ;;  %v1468_v31 = vld [vmem:[#allocation8 + $0x778] sm:$0xff] }
 0x291   :  { %3275 = vmatpush1.bf16.msra.mxu1 %v3274_v45  ;;  %2273 = vmatprep.mubr.f32.mxu1 %v3708_v61  ;;  %v1281_v61 = vld [vmem:[#allocation8 + $0x1a0] sm:$0xff]  ;;  %v1338_v45 = vld [vmem:[#allocation8 + $0x368] sm:$0xff] }
 0x292   :  { %3149 = vmatprep.subr.bf16.mxu0 %v3148_v49  ;;  %3277 = vmatprep.subr.bf16.mxu1 %v3276_v50  ;;  %v3158_v23 = vpack.c.bf16 %v1289_v9, %v1281_v61  ;;  %v3294_v49 = vpack.c.bf16 %v1323_v42, %v1315_v40  ;;  %v3168_v50 = vpack.c.bf16 %v1338_v45, %v1330_v43  ;;  %v1372_v61 = vld [vmem:[#allocation8 + $0x478] sm:$0xff]  ;;  %v1393_v42 = vld [vmem:[#allocation8 + $0x520] sm:$0xff]  ;;  %v1395_v45 = vld [vmem:[#allocation8 + $0x530] sm:$0xff] }
 0x293   :  { %v3174_v9 = vpack.c.bf16 %v1353_v1, %v1345_v0  ;;  %v3310_v40 = vpack.c.bf16 %v1387_v35, %v1379_v33  ;;  %v1401_v43 = vld [vmem:[#allocation8 + $0x560] sm:$0xff]  ;;  %v3314_v53 = vpack.c.bf16 %v1403_v47, %v1395_v45  ;;  %v1436_v0 = vld [vmem:[#allocation8 + $0x678] sm:$0xff] }
 0x294   :  { %3151 = vmatpush1.bf16.msra.mxu0 %v3150_v56  ;;  %v1346_v56 = vld [vmem:[#allocation8 + $0x3a8] sm:$0xff]  ;;  %v3186_v52 = vpack.c.bf16 %v1401_v43, %v1393_v42  ;;  %v1457_v35 = vld [vmem:[#allocation8 + $0x720] sm:$0xff]  ;;  %v1484_v42 = vld [vmem:[#allocation8 + $0x7f8] sm:$0xff] }
 0x295   :  { %3279 = vmatpush1.bf16.msra.mxu1 %v3278_v57  ;;  %3153 = vmatprep.subr.bf16.mxu0 %v3152_v58  ;;  %v1354_v57 = vld [vmem:[#allocation8 + $0x3e8] sm:$0xff]  ;;  %v1348_v58 = vld [vmem:[#allocation8 + $0x3b8] sm:$0xff]  ;;  %v1473_v47 = vld [vmem:[#allocation8 + $0x7a0] sm:$0xff] }
 0x296   :  { %3281 = vmatprep.subr.bf16.mxu1 %v3280_v63  ;;  %v3172_v63 = vpack.c.bf16 %v1354_v57, %v1346_v56  ;;  %v3300_v4 = vpack.c.bf16 %v1356_v59, %v1348_v58  ;;  %v1417_v56 = vld [vmem:[#allocation8 + $0x5e0] sm:$0xff]  ;;  %v1411_v57 = vld [vmem:[#allocation8 + $0x5b0] sm:$0xff] }
 0x297   :  { %v1419_v59 = vld [vmem:[#allocation8 + $0x5f0] sm:$0xff]  ;;  %v3190_v1 = vpack.c.bf16 %v1417_v56, %v1409_v54  ;;  %v1500_v54 = vld [vmem:[#allocation8 + $0x878] sm:$0xff] }
 0x298   :  { %3155 = vmatpush1.bf16.msra.mxu0 %v3154_v6  ;;  %v1362_v6 = vld [vmem:[#allocation8 + $0x428] sm:$0xff]  ;;  %v3318_v3 = vpack.c.bf16 %v1419_v59, %v1411_v57  ;;  %v1489_v59 = vld [vmem:[#allocation8 + $0x820] sm:$0xff] }
 0x299   :  { %3283 = vmatpush1.bf16.msra.mxu1 %v3282_v7  ;;  %3157 = vmatprep.subr.bf16.mxu0 %v3156_v8  ;;  %v1370_v7 = vld [vmem:[#allocation8 + $0x468] sm:$0xff]  ;;  %v1364_v8 = vld [vmem:[#allocation8 + $0x438] sm:$0xff] }
 0x29a   :  { %3285 = vmatprep.subr.bf16.mxu1 %v3284_v11  ;;  %v3176_v11 = vpack.c.bf16 %v1370_v7, %v1362_v6  ;;  %v3304_v21 = vpack.c.bf16 %v1372_v61, %v1364_v8  ;;  %v1433_v6 = vld [vmem:[#allocation8 + $0x660] sm:$0xff]  ;;  %v1427_v7 = vld [vmem:[#allocation8 + $0x630] sm:$0xff] }
 0x29b   :  { %v1435_v61 = vld [vmem:[#allocation8 + $0x670] sm:$0xff]  ;;  %v3194_v14 = vpack.c.bf16 %v1433_v6, %v1425_v5  ;;  %v1508_v5 = vld [vmem:[#allocation8 + $0x8b8] sm:$0xff] }
 0x29c   :  { %3159 = vmatpush1.bf16.msra.mxu0 %v3158_v23  ;;  %v1378_v23 = vld [vmem:[#allocation8 + $0x4a8] sm:$0xff]  ;;  %v3322_v20 = vpack.c.bf16 %v1435_v61, %v1427_v7  ;;  %v1516_v6 = vld [vmem:[#allocation8 + $0x8f8] sm:$0xff]  ;;  %v1513_v61 = vld [vmem:[#allocation8 + $0x8e0] sm:$0xff] }
 0x29d   :  { %3287 = vmatpush1.bf16.msra.mxu1 %v3286_v24  ;;  %3161 = vmatprep.subr.bf16.mxu0 %v3160_v17  ;;  %v1386_v24 = vld [vmem:[#allocation8 + $0x4e8] sm:$0xff]  ;;  %v1380_v17 = vld [vmem:[#allocation8 + $0x4b8] sm:$0xff] }
 0x29e   :  { %3289 = vmatprep.subr.bf16.mxu1 %v3288_v30  ;;  %v3180_v30 = vpack.c.bf16 %v1386_v24, %v1378_v23  ;;  %v3308_v34 = vpack.c.bf16 %v1388_v27, %v1380_v17  ;;  %v1449_v23 = vld [vmem:[#allocation8 + $0x6e0] sm:$0xff]  ;;  %v1443_v24 = vld [vmem:[#allocation8 + $0x6b0] sm:$0xff] }
 0x29f   :  { %v1451_v27 = vld [vmem:[#allocation8 + $0x6f0] sm:$0xff]  ;;  %v3198_v32 = vpack.c.bf16 %v1449_v23, %v1441_v22  ;;  %v1532_v22 = vld [vmem:[#allocation8 + $0x978] sm:$0xff] }
 0x2a0   :  { %3163 = vmatpush1.bf16.msra.mxu0 %v3162_v36  ;;  %v1394_v36 = vld [vmem:[#allocation8 + $0x528] sm:$0xff]  ;;  %v3326_v33 = vpack.c.bf16 %v1451_v27, %v1443_v24  ;;  %v1521_v27 = vld [vmem:[#allocation8 + $0x920] sm:$0xff] }
 0x2a1   :  { %3291 = vmatpush1.bf16.msra.mxu1 %v3290_v37  ;;  %3165 = vmatprep.subr.bf16.mxu0 %v3164_v38  ;;  %v1402_v37 = vld [vmem:[#allocation8 + $0x568] sm:$0xff]  ;;  %v1396_v38 = vld [vmem:[#allocation8 + $0x538] sm:$0xff] }
 0x2a2   :  { %3293 = vmatprep.subr.bf16.mxu1 %v3292_v41  ;;  %v3184_v41 = vpack.c.bf16 %v1402_v37, %v1394_v36  ;;  %v3312_v46 = vpack.c.bf16 %v1404_v25, %v1396_v38  ;;  %v1465_v36 = vld [vmem:[#allocation8 + $0x760] sm:$0xff]  ;;  %v1459_v37 = vld [vmem:[#allocation8 + $0x730] sm:$0xff] }
 0x2a3   :  { %v1467_v25 = vld [vmem:[#allocation8 + $0x770] sm:$0xff]  ;;  %v3202_v43 = vpack.c.bf16 %v1465_v36, %v1457_v35 }
 0x2a4   :  { %3167 = vmatpush1.bf16.msra.mxu0 %v3166_v48  ;;  %v1410_v48 = vld [vmem:[#allocation8 + $0x5a8] sm:$0xff]  ;;  %v3330_v45 = vpack.c.bf16 %v1467_v25, %v1459_v37  ;;  %v1545_v25 = vld [vmem:[#allocation8 + $0x9e0] sm:$0xff] }
 0x2a5   :  { %3295 = vmatpush1.bf16.msra.mxu1 %v3294_v49  ;;  %3169 = vmatprep.subr.bf16.mxu0 %v3168_v50  ;;  %v1418_v49 = vld [vmem:[#allocation8 + $0x5e8] sm:$0xff]  ;;  %v1412_v50 = vld [vmem:[#allocation8 + $0x5b8] sm:$0xff] }
 0x2a6   :  { %3297 = vmatprep.subr.bf16.mxu1 %v3296_v26  ;;  %v3188_v26 = vpack.c.bf16 %v1418_v49, %v1410_v48  ;;  %v3316_v58 = vpack.c.bf16 %v1420_v51, %v1412_v50  ;;  %v1481_v48 = vld [vmem:[#allocation8 + $0x7e0] sm:$0xff]  ;;  %v1475_v49 = vld [vmem:[#allocation8 + $0x7b0] sm:$0xff] }
 0x2a7   :  { %v1483_v51 = vld [vmem:[#allocation8 + $0x7f0] sm:$0xff]  ;;  %v3206_v56 = vpack.c.bf16 %v1481_v48, %v1473_v47 }
 0x2a8   :  { %3171 = vmatpush1.bf16.msra.mxu0 %v3170_v60  ;;  %v1426_v60 = vld [vmem:[#allocation8 + $0x628] sm:$0xff]  ;;  %v3334_v57 = vpack.c.bf16 %v1483_v51, %v1475_v49  ;;  %v1553_v49 = vld [vmem:[#allocation8 + $0xa20] sm:$0xff]  ;;  %v1555_v51 = vld [vmem:[#allocation8 + $0xa30] sm:$0xff] }
 0x2a9   :  { %3299 = vmatpush1.bf16.msra.mxu1 %v3298_v62  ;;  %3173 = vmatprep.subr.bf16.mxu0 %v3172_v63  ;;  %v1434_v62 = vld [vmem:[#allocation8 + $0x668] sm:$0xff]  ;;  %v1428_v63 = vld [vmem:[#allocation8 + $0x638] sm:$0xff] }
 0x2aa   :  { %3301 = vmatprep.subr.bf16.mxu1 %v3300_v4  ;;  %v3192_v4 = vpack.c.bf16 %v1434_v62, %v1426_v60  ;;  %v3320_v8 = vpack.c.bf16 %v1436_v0, %v1428_v63  ;;  %v1497_v60 = vld [vmem:[#allocation8 + $0x860] sm:$0xff]  ;;  %v1491_v63 = vld [vmem:[#allocation8 + $0x830] sm:$0xff] }
 0x2ab   :  { %v1499_v0 = vld [vmem:[#allocation8 + $0x870] sm:$0xff] }
 0x2ac   :  { %3175 = vmatpush1.bf16.msra.mxu0 %v3174_v9  ;;  %v1442_v9 = vld [vmem:[#allocation8 + $0x6a8] sm:$0xff]  ;;  %v3338_v7 = vpack.c.bf16 %v1499_v0, %v1491_v63  ;;  %v1577_v63 = vld [vmem:[#allocation8 + $0xae0] sm:$0xff]  ;;  %v1571_v0 = vld [vmem:[#allocation8 + $0xab0] sm:$0xff] }
 0x2ad   :  { %3303 = vmatpush1.bf16.msra.mxu1 %v3302_v10  ;;  %3177 = vmatprep.subr.bf16.mxu0 %v3176_v11  ;;  %v1450_v10 = vld [vmem:[#allocation8 + $0x6e8] sm:$0xff]  ;;  %v1444_v11 = vld [vmem:[#allocation8 + $0x6b8] sm:$0xff] }
 0x2ae   :  { %3305 = vmatprep.subr.bf16.mxu1 %v3304_v21  ;;  %v3196_v21 = vpack.c.bf16 %v1450_v10, %v1442_v9  ;;  %v3324_v17 = vpack.c.bf16 %v1452_v13, %v1444_v11  ;;  %v1507_v9 = vld [vmem:[#allocation8 + $0x8b0] sm:$0xff]  ;;  %v1522_v13 = vld [vmem:[#allocation8 + $0x928] sm:$0xff] }
 0x2af   :  { %v1515_v11 = vld [vmem:[#allocation8 + $0x8f0] sm:$0xff] }
 0x2b0   :  { %3179 = vmatpush1.bf16.msra.mxu0 %v3178_v28  ;;  %v1458_v28 = vld [vmem:[#allocation8 + $0x728] sm:$0xff]  ;;  %v3342_v24 = vpack.c.bf16 %v1515_v11, %v1507_v9  ;;  %v1593_v11 = vld [vmem:[#allocation8 + $0xb60] sm:$0xff] }
 0x2b1   :  { %3307 = vmatpush1.bf16.msra.mxu1 %v3306_v29  ;;  %3181 = vmatprep.subr.bf16.mxu0 %v3180_v30  ;;  %v1466_v29 = vld [vmem:[#allocation8 + $0x768] sm:$0xff]  ;;  %v1460_v30 = vld [vmem:[#allocation8 + $0x738] sm:$0xff] }
 0x2b2   :  { %3309 = vmatprep.subr.bf16.mxu1 %v3308_v34  ;;  %v3200_v34 = vpack.c.bf16 %v1466_v29, %v1458_v28  ;;  %v3328_v38 = vpack.c.bf16 %v1468_v31, %v1460_v30  ;;  %v1529_v28 = vld [vmem:[#allocation8 + $0x960] sm:$0xff]  ;;  %v1523_v29 = vld [vmem:[#allocation8 + $0x930] sm:$0xff] }
 0x2b3   :  { %v1531_v31 = vld [vmem:[#allocation8 + $0x970] sm:$0xff]  ;;  %v3218_v35 = vpack.c.bf16 %v1529_v28, %v1521_v27 }
 0x2b4   :  { %3183 = vmatpush1.bf16.msra.mxu0 %v3182_v39  ;;  %v1474_v39 = vld [vmem:[#allocation8 + $0x7a8] sm:$0xff]  ;;  %v3346_v36 = vpack.c.bf16 %v1531_v31, %v1523_v29  ;;  %v1601_v29 = vld [vmem:[#allocation8 + $0xba0] sm:$0xff]  ;;  %v1603_v31 = vld [vmem:[#allocation8 + $0xbb0] sm:$0xff] }
 0x2b5   :  { %3311 = vmatpush1.bf16.msra.mxu1 %v3310_v40  ;;  %3185 = vmatprep.subr.bf16.mxu0 %v3184_v41  ;;  %v1482_v40 = vld [vmem:[#allocation8 + $0x7e8] sm:$0xff]  ;;  %v1476_v41 = vld [vmem:[#allocation8 + $0x7b8] sm:$0xff] }
 0x2b6   :  { %3313 = vmatprep.subr.bf16.mxu1 %v3312_v46  ;;  %v3204_v46 = vpack.c.bf16 %v1482_v40, %v1474_v39  ;;  %v3332_v50 = vpack.c.bf16 %v1484_v42, %v1476_v41  ;;  %v1539_v39 = vld [vmem:[#allocation8 + $0x9b0] sm:$0xff]  ;;  %v1554_v41 = vld [vmem:[#allocation8 + $0xa28] sm:$0xff] }
 0x2b7   :  { %v1562_v42 = vld [vmem:[#allocation8 + $0xa68] sm:$0xff] }
 0x2b8   :  { %3187 = vmatpush1.bf16.msra.mxu0 %v3186_v52  ;;  %v1490_v52 = vld [vmem:[#allocation8 + $0x828] sm:$0xff]  ;;  %v3224_v48 = vpack.c.bf16 %v1562_v42, %v1554_v41  ;;  %v1627_v42 = vld [vmem:[#allocation8 + $0xc70] sm:$0xff] }
 0x2b9   :  { %3315 = vmatpush1.bf16.msra.mxu1 %v3314_v53  ;;  %3189 = vmatprep.subr.bf16.mxu0 %v3188_v26  ;;  %v1498_v53 = vld [vmem:[#allocation8 + $0x868] sm:$0xff]  ;;  %v1492_v26 = vld [vmem:[#allocation8 + $0x838] sm:$0xff] }
 0x2ba   :  { %3317 = vmatprep.subr.bf16.mxu1 %v3316_v58  ;;  %v3208_v58 = vpack.c.bf16 %v1498_v53, %v1490_v52  ;;  %v3336_v62 = vpack.c.bf16 %v1500_v54, %v1492_v26  ;;  %v1563_v53 = vld [vmem:[#allocation8 + $0xa70] sm:$0xff]  ;;  %v1570_v26 = vld [vmem:[#allocation8 + $0xaa8] sm:$0xff] }
 0x2bb   :  { %v1578_v54 = vld [vmem:[#allocation8 + $0xae8] sm:$0xff] }
 0x2bc   :  { %3191 = vmatpush1.bf16.msra.mxu0 %v3190_v1  ;;  %v1506_v1 = vld [vmem:[#allocation8 + $0x8a8] sm:$0xff] }
 0x2bd   :  { %3319 = vmatpush1.bf16.msra.mxu1 %v3318_v3  ;;  %3193 = vmatprep.subr.bf16.mxu0 %v3192_v4  ;;  %v1514_v3 = vld [vmem:[#allocation8 + $0x8e8] sm:$0xff]  ;;  %v3210_v4 = vpack.c.bf16 %v1497_v60, %v1489_v59  ;;  %v3354_v59 = vpack.c.bf16 %v1563_v53, %v1555_v51  ;;  %v3228_v60 = vpack.c.bf16 %v1578_v54, %v1570_v26  ;;  %v1633_v51 = vld [vmem:[#allocation8 + $0xca0] sm:$0xff]  ;;  %v1635_v53 = vld [vmem:[#allocation8 + $0xcb0] sm:$0xff] }
 0x2be   :  { %3321 = vmatprep.subr.bf16.mxu1 %v3320_v8  ;;  %v1505_v8 = vld [vmem:[#allocation8 + $0x8a0] sm:$0xff]  ;;  %v3212_v10 = vpack.c.bf16 %v1514_v3, %v1506_v1  ;;  %v1579_v3 = vld [vmem:[#allocation8 + $0xaf0] sm:$0xff] }
 0x2bf   :  { %v3214_v23 = vpack.c.bf16 %v1513_v61, %v1505_v8  ;;  %v3358_v61 = vpack.c.bf16 %v1579_v3, %v1571_v0  ;;  %v1643_v54 = vld [vmem:[#allocation8 + $0xcf0] sm:$0xff]  ;;  %v1649_v0 = vld [vmem:[#allocation8 + $0xd20] sm:$0xff] }
 0x2c0   :  { %3195 = vmatpush1.bf16.msra.mxu0 %v3194_v14  ;;  %v1530_v14 = vld [vmem:[#allocation8 + $0x968] sm:$0xff]  ;;  %v1651_v3 = vld [vmem:[#allocation8 + $0xd30] sm:$0xff] }
 0x2c1   :  { %3323 = vmatpush1.bf16.msra.mxu1 %v3322_v20  ;;  %3197 = vmatprep.subr.bf16.mxu0 %v3196_v21  ;;  %v3340_v20 = vpack.c.bf16 %v1516_v6, %v1508_v5  ;;  %v1524_v21 = vld [vmem:[#allocation8 + $0x938] sm:$0xff]  ;;  %v1594_v5 = vld [vmem:[#allocation8 + $0xb68] sm:$0xff] }
 0x2c2   :  { %3325 = vmatprep.subr.bf16.mxu1 %v3324_v17  ;;  %v3216_v17 = vpack.c.bf16 %v1530_v14, %v1522_v13  ;;  %v3344_v30 = vpack.c.bf16 %v1532_v22, %v1524_v21  ;;  %v1588_v6 = vld [vmem:[#allocation8 + $0xb38] sm:$0xff]  ;;  %v1587_v13 = vld [vmem:[#allocation8 + $0xb30] sm:$0xff]  ;;  %v1602_v21 = vld [vmem:[#allocation8 + $0xba8] sm:$0xff] }
 0x2c3   :  { %v1610_v22 = vld [vmem:[#allocation8 + $0xbe8] sm:$0xff] }
 0x2c4   :  { %3199 = vmatpush1.bf16.msra.mxu0 %v3198_v32  ;;  %v1538_v32 = vld [vmem:[#allocation8 + $0x9a8] sm:$0xff]  ;;  %v3236_v28 = vpack.c.bf16 %v1610_v22, %v1602_v21  ;;  %v1675_v22 = vld [vmem:[#allocation8 + $0xdf0] sm:$0xff] }
 0x2c5   :  { %3327 = vmatpush1.bf16.msra.mxu1 %v3326_v33  ;;  %3201 = vmatprep.subr.bf16.mxu0 %v3200_v34  ;;  %v1546_v33 = vld [vmem:[#allocation8 + $0x9e8] sm:$0xff]  ;;  %v1540_v34 = vld [vmem:[#allocation8 + $0x9b8] sm:$0xff] }
 0x2c6   :  { %3329 = vmatprep.subr.bf16.mxu1 %v3328_v38  ;;  %v3220_v37 = vpack.c.bf16 %v1546_v33, %v1538_v32  ;;  %v1537_v38 = vld [vmem:[#allocation8 + $0x9a0] sm:$0xff]  ;;  %v1611_v33 = vld [vmem:[#allocation8 + $0xbf0] sm:$0xff] }
 0x2c8   :  { %3203 = vmatpush1.bf16.msra.mxu0 %v3202_v43  ;;  %v1556_v43 = vld [vmem:[#allocation8 + $0xa38] sm:$0xff] }
 0x2c9   :  { %3331 = vmatpush1.bf16.msra.mxu1 %v3330_v45  ;;  %3205 = vmatprep.subr.bf16.mxu0 %v3204_v46  ;;  %v1564_v45 = vld [vmem:[#allocation8 + $0xa78] sm:$0xff]  ;;  %v3222_v46 = vpack.c.bf16 %v1545_v25, %v1537_v38  ;;  %v3366_v38 = vpack.c.bf16 %v1611_v33, %v1603_v31  ;;  %v1681_v31 = vld [vmem:[#allocation8 + $0xe20] sm:$0xff]  ;;  %v1683_v33 = vld [vmem:[#allocation8 + $0xe30] sm:$0xff] }
 0x2ca   :  { %3333 = vmatprep.subr.bf16.mxu1 %v3332_v50  ;;  %v1561_v50 = vld [vmem:[#allocation8 + $0xa60] sm:$0xff]  ;;  %v3352_v52 = vpack.c.bf16 %v1564_v45, %v1556_v43  ;;  %v1634_v43 = vld [vmem:[#allocation8 + $0xca8] sm:$0xff] }
 0x2cb   :  { %v1642_v45 = vld [vmem:[#allocation8 + $0xce8] sm:$0xff] }
 0x2cc   :  { %3207 = vmatpush1.bf16.msra.mxu0 %v3206_v56  ;;  %v1572_v56 = vld [vmem:[#allocation8 + $0xab8] sm:$0xff] }
 0x2cd   :  { %3335 = vmatpush1.bf16.msra.mxu1 %v3334_v57  ;;  %3209 = vmatprep.subr.bf16.mxu0 %v3208_v58  ;;  %v1580_v57 = vld [vmem:[#allocation8 + $0xaf8] sm:$0xff]  ;;  %v3226_v58 = vpack.c.bf16 %v1561_v50, %v1553_v49  ;;  %v3244_v50 = vpack.c.bf16 %v1642_v45, %v1634_v43  ;;  %v1707_v45 = vld [vmem:[#allocation8 + $0xef0] sm:$0xff] }
 0x2ce   :  { %3337 = vmatprep.subr.bf16.mxu1 %v3336_v62  ;;  %v1569_v62 = vld [vmem:[#allocation8 + $0xaa0] sm:$0xff]  ;;  %v3356_v1 = vpack.c.bf16 %v1580_v57, %v1572_v56  ;;  %v1650_v56 = vld [vmem:[#allocation8 + $0xd28] sm:$0xff] }
 0x2cf   :  { %2132 = vmatmul.mubr.f32.vlgmr.msra.gmra.mrb[4].mxu0 %v3710_v2  ;;  %v3230_v8 = vpack.c.bf16 %v1577_v63, %v1569_v62  ;;  %v1658_v57 = vld [vmem:[#allocation8 + $0xd68] sm:$0xff]  ;;  %v3374_v62 = vpack.c.bf16 %v1643_v54, %v1635_v53  ;;  %v1713_v53 = vld [vmem:[#allocation8 + $0xf20] sm:$0xff]  ;;  %v1715_v54 = vld [vmem:[#allocation8 + $0xf30] sm:$0xff] }
 0x2d0   :  { %2274 = vmatmul.mubr.f32.vlgmr.msra.gmra.mrb[4].mxu1 %v3710_v2  ;;  %3211 = vmatpush1.bf16.msra.mxu0 %v3210_v4  ;;  %v1548_v2 = vld [vmem:[#allocation8 + $0x9f8] sm:$0xff]  ;;  %v1586_v4 = vld [vmem:[#allocation8 + $0xb28] sm:$0xff]  ;;  %v3248_v63 = vpack.c.bf16 %v1658_v57, %v1650_v56  ;;  %v1723_v57 = vld [vmem:[#allocation8 + $0xf70] sm:$0xff] }
 0x2d1   :  { %2202 = vmatprep.mubr.f32.mxu0 %v3716_v12  ;;  %3339 = vmatpush1.bf16.msra.mxu1 %v3338_v7  ;;  %v3348_v40 = vpack.c.bf16 %v1548_v2, %v1540_v34  ;;  %v1596_v7 = vld [vmem:[#allocation8 + $0xb78] sm:$0xff]  ;;  %v3232_v9 = vpack.c.bf16 %v1594_v5, %v1586_v4  ;;  %v1618_v34 = vld [vmem:[#allocation8 + $0xc28] sm:$0xff]  ;;  %v1659_v5 = vld [vmem:[#allocation8 + $0xd70] sm:$0xff] }
 0x2d2   :  { %2344 = vmatprep.mubr.f32.mxu1 %v3716_v12  ;;  %3213 = vmatprep.subr.bf16.mxu0 %v3212_v10  ;;  %v1547_v12 = vld [vmem:[#allocation8 + $0x9f0] sm:$0xff]  ;;  %v1585_v10 = vld [vmem:[#allocation8 + $0xb20] sm:$0xff]  ;;  %v3360_v14 = vpack.c.bf16 %v1596_v7, %v1588_v6  ;;  %v1626_v2 = vld [vmem:[#allocation8 + $0xc68] sm:$0xff] }
 0x2d3   :  { %3341 = vmatprep.subr.bf16.mxu1 %v3340_v20  ;;  %v3350_v47 = vpack.c.bf16 %v1547_v12, %v1539_v39  ;;  %v1595_v20 = vld [vmem:[#allocation8 + $0xb70] sm:$0xff]  ;;  %v3240_v25 = vpack.c.bf16 %v1626_v2, %v1618_v34  ;;  %v1617_v39 = vld [vmem:[#allocation8 + $0xc20] sm:$0xff]  ;;  %v1666_v6 = vld [vmem:[#allocation8 + $0xda8] sm:$0xff] }
 0x2d4   :  { %3215 = vmatpush1.bf16.msra.mxu0 %v3214_v23  ;;  %v1604_v23 = vld [vmem:[#allocation8 + $0xbb8] sm:$0xff]  ;;  %v3362_v27 = vpack.c.bf16 %v1595_v20, %v1587_v13  ;;  %v1619_v12 = vld [vmem:[#allocation8 + $0xc30] sm:$0xff]  ;;  %v1674_v7 = vld [vmem:[#allocation8 + $0xde8] sm:$0xff] }
 0x2d5   :  { %3343 = vmatpush1.bf16.msra.mxu1 %v3342_v24  ;;  %3217 = vmatprep.subr.bf16.mxu0 %v3216_v17  ;;  %v1612_v24 = vld [vmem:[#allocation8 + $0xbf8] sm:$0xff]  ;;  %v3234_v17 = vpack.c.bf16 %v1593_v11, %v1585_v10  ;;  %v3370_v49 = vpack.c.bf16 %v1627_v42, %v1619_v12  ;;  %v3378_v10 = vpack.c.bf16 %v1659_v5, %v1651_v3  ;;  %v1665_v13 = vld [vmem:[#allocation8 + $0xda0] sm:$0xff]  ;;  %v1667_v20 = vld [vmem:[#allocation8 + $0xdb0] sm:$0xff] }
 0x2d6   :  { %3345 = vmatprep.subr.bf16.mxu1 %v3344_v30  ;;  %v1609_v30 = vld [vmem:[#allocation8 + $0xbe0] sm:$0xff]  ;;  %v3364_v32 = vpack.c.bf16 %v1612_v24, %v1604_v23  ;;  %v3252_v11 = vpack.c.bf16 %v1674_v7, %v1666_v6  ;;  %v1682_v23 = vld [vmem:[#allocation8 + $0xe28] sm:$0xff]  ;;  %v1691_v2 = vld [vmem:[#allocation8 + $0xe70] sm:$0xff] }
 0x2d7   :  { %v1690_v24 = vld [vmem:[#allocation8 + $0xe68] sm:$0xff]  ;;  %v1697_v12 = vld [vmem:[#allocation8 + $0xea0] sm:$0xff]  ;;  %v1699_v42 = vld [vmem:[#allocation8 + $0xeb0] sm:$0xff] }
 0x2d8   :  { %3219 = vmatpush1.bf16.msra.mxu0 %v3218_v35  ;;  %v1620_v35 = vld [vmem:[#allocation8 + $0xc38] sm:$0xff]  ;;  %v1729_v3 = vld [vmem:[#allocation8 + $0xfa0] sm:$0xff]  ;;  %v1731_v6 = vld [vmem:[#allocation8 + $0xfb0] sm:$0xff] }
 0x2d9   :  { %3347 = vmatpush1.bf16.msra.mxu1 %v3346_v36  ;;  %3221 = vmatprep.subr.bf16.mxu0 %v3220_v37  ;;  %v1628_v36 = vld [vmem:[#allocation8 + $0xc78] sm:$0xff]  ;;  %v3238_v37 = vpack.c.bf16 %v1609_v30, %v1601_v29  ;;  %v3382_v29 = vpack.c.bf16 %v1675_v22, %v1667_v20  ;;  %v3256_v30 = vpack.c.bf16 %v1690_v24, %v1682_v23  ;;  %v1739_v7 = vld [vmem:[#allocation8 + $0xff0] sm:$0xff] }
 0x2da   :  { %3349 = vmatprep.subr.bf16.mxu1 %v3348_v40  ;;  %v1625_v40 = vld [vmem:[#allocation8 + $0xc60] sm:$0xff]  ;;  %v3368_v41 = vpack.c.bf16 %v1628_v36, %v1620_v35  ;;  %v1698_v35 = vld [vmem:[#allocation8 + $0xea8] sm:$0xff] }
 0x2db   :  { %v1706_v36 = vld [vmem:[#allocation8 + $0xee8] sm:$0xff] }
 0x2dc   :  { %3223 = vmatpush1.bf16.msra.mxu0 %v3222_v46  ;;  %v1636_v46 = vld [vmem:[#allocation8 + $0xcb8] sm:$0xff] }
 0x2dd   :  { %3351 = vmatpush1.bf16.msra.mxu1 %v3350_v47  ;;  %3225 = vmatprep.subr.bf16.mxu0 %v3224_v48  ;;  %v1644_v47 = vld [vmem:[#allocation8 + $0xcf8] sm:$0xff]  ;;  %v3242_v48 = vpack.c.bf16 %v1625_v40, %v1617_v39  ;;  %v3386_v39 = vpack.c.bf16 %v1691_v2, %v1683_v33  ;;  %v3260_v40 = vpack.c.bf16 %v1706_v36, %v1698_v35 }
 0x2de   :  { %3353 = vmatprep.subr.bf16.mxu1 %v3352_v52  ;;  %v1641_v52 = vld [vmem:[#allocation8 + $0xce0] sm:$0xff]  ;;  %v3372_v26 = vpack.c.bf16 %v1644_v47, %v1636_v46  ;;  %v1714_v46 = vld [vmem:[#allocation8 + $0xf28] sm:$0xff] }
 0x2df   :  { %v1722_v47 = vld [vmem:[#allocation8 + $0xf68] sm:$0xff] }
 0x2e0   :  { %3227 = vmatpush1.bf16.msra.mxu0 %v3226_v58  ;;  %v1652_v58 = vld [vmem:[#allocation8 + $0xd38] sm:$0xff] }
 0x2e1   :  { %3355 = vmatpush1.bf16.msra.mxu1 %v3354_v59  ;;  %3229 = vmatprep.subr.bf16.mxu0 %v3228_v60  ;;  %v1660_v59 = vld [vmem:[#allocation8 + $0xd78] sm:$0xff]  ;;  %v3246_v60 = vpack.c.bf16 %v1641_v52, %v1633_v51  ;;  %v3390_v51 = vpack.c.bf16 %v1707_v45, %v1699_v42  ;;  %v3264_v52 = vpack.c.bf16 %v1722_v47, %v1714_v46 }
 0x2e2   :  { %3357 = vmatprep.subr.bf16.mxu1 %v3356_v1  ;;  %v1657_v1 = vld [vmem:[#allocation8 + $0xd60] sm:$0xff]  ;;  %v3376_v4 = vpack.c.bf16 %v1660_v59, %v1652_v58  ;;  %v1730_v58 = vld [vmem:[#allocation8 + $0xfa8] sm:$0xff] }
 0x2e3   :  { %v1738_v59 = vld [vmem:[#allocation8 + $0xfe8] sm:$0xff] }
 0x2e4   :  { %3231 = vmatpush1.bf16.msra.mxu0 %v3230_v8  ;;  %v1668_v8 = vld [vmem:[#allocation8 + $0xdb8] sm:$0xff] }
 0x2e5   :  { %3359 = vmatpush1.bf16.msra.mxu1 %v3358_v61  ;;  %3233 = vmatprep.subr.bf16.mxu0 %v3232_v9  ;;  %v1676_v61 = vld [vmem:[#allocation8 + $0xdf8] sm:$0xff]  ;;  %v3250_v9 = vpack.c.bf16 %v1657_v1, %v1649_v0  ;;  %v3394_v0 = vpack.c.bf16 %v1723_v57, %v1715_v54  ;;  %v3268_v1 = vpack.c.bf16 %v1738_v59, %v1730_v58 }
 0x2e6   :  { %3361 = vmatprep.subr.bf16.mxu1 %v3360_v14  ;;  %v1673_v14 = vld [vmem:[#allocation8 + $0xde0] sm:$0xff]  ;;  %v3380_v21 = vpack.c.bf16 %v1676_v61, %v1668_v8  ;;  %v3398_v61 = vpack.c.bf16 %v1739_v7, %v1731_v6 }
 0x2e8   :  { %3235 = vmatpush1.bf16.msra.mxu0 %v3234_v17  ;;  %v1684_v17 = vld [vmem:[#allocation8 + $0xe38] sm:$0xff] }
 0x2e9   :  { %3363 = vmatpush1.bf16.msra.mxu1 %v3362_v27  ;;  %3237 = vmatprep.subr.bf16.mxu0 %v3236_v28  ;;  %v1692_v27 = vld [vmem:[#allocation8 + $0xe78] sm:$0xff]  ;;  %v3254_v28 = vpack.c.bf16 %v1673_v14, %v1665_v13 }
 0x2ea   :  { %3365 = vmatprep.subr.bf16.mxu1 %v3364_v32  ;;  %v1689_v32 = vld [vmem:[#allocation8 + $0xe60] sm:$0xff]  ;;  %v3384_v34 = vpack.c.bf16 %v1692_v27, %v1684_v17 }
 0x2ec   :  { %3239 = vmatpush1.bf16.msra.mxu0 %v3238_v37  ;;  %v1700_v37 = vld [vmem:[#allocation8 + $0xeb8] sm:$0xff] }
 0x2ed   :  { %3367 = vmatpush1.bf16.msra.mxu1 %v3366_v38  ;;  %3241 = vmatprep.subr.bf16.mxu0 %v3240_v25  ;;  %v1708_v38 = vld [vmem:[#allocation8 + $0xef8] sm:$0xff]  ;;  %v3258_v25 = vpack.c.bf16 %v1689_v32, %v1681_v31 }
 0x2ee   :  { %3369 = vmatprep.subr.bf16.mxu1 %v3368_v41  ;;  %v1705_v41 = vld [vmem:[#allocation8 + $0xee0] sm:$0xff]  ;;  %v3388_v43 = vpack.c.bf16 %v1708_v38, %v1700_v37 }
 0x2f0   :  { %3243 = vmatpush1.bf16.msra.mxu0 %v3242_v48  ;;  %v1716_v48 = vld [vmem:[#allocation8 + $0xf38] sm:$0xff] }
 0x2f1   :  { %3371 = vmatpush1.bf16.msra.mxu1 %v3370_v49  ;;  %3245 = vmatprep.subr.bf16.mxu0 %v3244_v50  ;;  %v1724_v49 = vld [vmem:[#allocation8 + $0xf78] sm:$0xff]  ;;  %v3262_v50 = vpack.c.bf16 %v1705_v41, %v1697_v12 }
 0x2f2   :  { %3373 = vmatprep.subr.bf16.mxu1 %v3372_v26  ;;  %v1721_v26 = vld [vmem:[#allocation8 + $0xf60] sm:$0xff]  ;;  %v3392_v56 = vpack.c.bf16 %v1724_v49, %v1716_v48 }
 0x2f4   :  { %3247 = vmatpush1.bf16.msra.mxu0 %v3246_v60  ;;  %v1732_v60 = vld [vmem:[#allocation8 + $0xfb8] sm:$0xff] }
 0x2f5   :  { %3375 = vmatpush1.bf16.msra.mxu1 %v3374_v62  ;;  %3249 = vmatprep.subr.bf16.mxu0 %v3248_v63  ;;  %v1740_v62 = vld [vmem:[#allocation8 + $0xff8] sm:$0xff]  ;;  %v3266_v63 = vpack.c.bf16 %v1721_v26, %v1713_v53 }
 0x2f6   :  { %3377 = vmatprep.subr.bf16.mxu1 %v3376_v4  ;;  %v1737_v4 = vld [vmem:[#allocation8 + $0xfe0] sm:$0xff]  ;;  %v3396_v5 = vpack.c.bf16 %v1740_v62, %v1732_v60 }
 0x2f7   :  { %v3270_v8 = vpack.c.bf16 %v1737_v4, %v1729_v3 }
 0x2f8   :  { %3251 = vmatpush1.bf16.msra.mxu0 %v3250_v9  ;;  %v1741_v9 = vld [vmem:[#allocation10] sm:$0xff] }
 0x2f9   :  { %3379 = vmatpush1.bf16.msra.mxu1 %v3378_v10  ;;  %3253 = vmatprep.subr.bf16.mxu0 %v3252_v11  ;;  %v1746_v10 = vrot.slane %v1741_v9, %v607_v16  ;;  %v1754_v11 = vrot.slane %v1741_v9, %v615_v55  ;;  %v1750_v13 = vrot.slane %v1741_v9, %v611_v18  ;;  %v1761_v16 = vsub.s32 4, %v3690_v15 }
 0x2fa   :  { %3381 = vmatprep.subr.bf16.mxu1 %v3380_v21  ;;  %v1758_v14 = vrot.slane %v1741_v9, %v619_v19  ;;  %v1769_v55 = vsub.s32 6, %v3690_v15  ;;  %v1765_v18 = vsub.s32 5, %v3690_v15  ;;  %v1773_v19 = vsub.s32 7, %v3690_v15 }
 0x2fc   :  { %3255 = vmatpush1.bf16.msra.mxu0 %v3254_v28  ;;  %v1762_v28 = vrot.slane %v1741_v9, %v1761_v16  ;;  %v1774_v31 = vrot.slane %v1741_v9, %v1773_v19 }
 0x2fd   :  { %3383 = vmatpush1.bf16.msra.mxu1 %v3382_v29  ;;  %3257 = vmatprep.subr.bf16.mxu0 %v3256_v30  ;;  %v1770_v29 = vrot.slane %v1741_v9, %v1769_v55  ;;  %v1766_v30 = vrot.slane %v1741_v9, %v1765_v18 }
 0x2fe   :  { %3385 = vmatprep.subr.bf16.mxu1 %v3384_v34 }
 0x300   :  { %3259 = vmatpush1.bf16.msra.mxu0 %v3258_v25 }
 0x301   :  { %3387 = vmatpush1.bf16.msra.mxu1 %v3386_v39  ;;  %3261 = vmatprep.subr.bf16.mxu0 %v3260_v40 }
 0x302   :  { %3389 = vmatprep.subr.bf16.mxu1 %v3388_v43 }
 0x304   :  { %3263 = vmatpush1.bf16.msra.mxu0 %v3262_v50 }
 0x305   :  { %3391 = vmatpush1.bf16.msra.mxu1 %v3390_v51  ;;  %3265 = vmatprep.subr.bf16.mxu0 %v3264_v52 }
 0x306   :  { %3393 = vmatprep.subr.bf16.mxu1 %v3392_v56 }
 0x308   :  { %3267 = vmatpush1.bf16.msra.mxu0 %v3266_v63 }
 0x309   :  { %3395 = vmatpush1.bf16.msra.mxu1 %v3394_v0  ;;  %3269 = vmatprep.subr.bf16.mxu0 %v3268_v1 }
 0x30a   :  { %3397 = vmatprep.subr.bf16.mxu1 %v3396_v5 }
 0x30c   :  { %3271 = vmatpush1.bf16.msra.mxu0 %v3270_v8 }
 0x30d   :  { %3399 = vmatpush1.bf16.msra.mxu1 %v3398_v61 }
 0x30f   :  { %2203 = vmatmul.mubr.f32.vlgmr.msra.gmra.mrb[4].mxu0 %v3732_v44 }
 0x310   :  { %2345 = vmatmul.mubr.f32.vlgmr.msra.gmra.mrb[4].mxu1 %v3732_v44 }
 0x362   :  { %v1920_v20 = vpop.f32.mrb[2].mxu0  ;;  %v2062_v21 = vpop.f32.mrb[2].mxu1 }
 0x363   :  { %v3404_v22 = vadd.f32 %v1920_v20, %v1746_v10  ;;  %v3406_v23 = vadd.f32 %v2062_v21, %v1754_v11  ;;  %v1922_v24 = vpop.f32.mrb[3].mxu0  ;;  %v2064_v17 = vpop.f32.mrb[3].mxu1 }
 0x364   :  { %v3405_v44 = vadd.f32 %v1922_v24, %v1750_v13  ;;  %v3407_v27 = vadd.f32 %v2064_v17, %v1758_v14 }
 0x365   :  { %2351 = vst [vmem:[#allocation11] sm:$0xff] %v3404_v22  ;;  %2353 = vst [vmem:[#allocation11 + $0x10] sm:$0xff] %v3406_v23 }
 0x366   :  { %2352 = vst [vmem:[#allocation11 + $0x8] sm:$0xff] %v3405_v44  ;;  %2354 = vst [vmem:[#allocation11 + $0x18] sm:$0xff] %v3407_v27 }
 0x3e2   :  { %v2204_v32 = vpop.f32.mrb[4].mxu0 }
 0x3e3   :  { %v3408_v33 = vadd.f32 %v2204_v32, %v1762_v28  ;;  %v2346_v34 = vpop.f32.mrb[4].mxu1  ;;  %v2206_v2 = vpop.f32.mrb[5].mxu0 }
 0x3e4   :  { %v3410_v35 = vadd.f32 %v2346_v34, %v1770_v29  ;;  %v3409_v36 = vadd.f32 %v2206_v2, %v1766_v30  ;;  %v2348_v37 = vpop.f32.mrb[5].mxu1 }
 0x3e5   :  { %2355 = vst [vmem:[#allocation11 + $0x20] sm:$0xff] %v3408_v33  ;;  %v3411_v38 = vadd.f32 %v2348_v37, %v1774_v31 }
 0x3e6   :  { %2357 = vst [vmem:[#allocation11 + $0x30] sm:$0xff] %v3410_v35  ;;  %2356 = vst [vmem:[#allocation11 + $0x28] sm:$0xff] %v3409_v36 }
 0x3e7   :  { %2358 = vst [vmem:[#allocation11 + $0x38] sm:$0xff] %v3411_v38 }
 0x3e8   :  { %3571 = shalt.err (!%p3568_p2)
}
 0x3e9   :  { %s3572_s3 = scalar_lea.hbm %s3773_s5, 1024 }
 0x3ea   :  { %p3573_p3 = scmp.ne.s32.totalorder %s3773_s5, %s3572_s3  ;;  %p3576_p4 = scmp.lt.u32.totalorder %s3572_s3, %s3773_s5 }
 0x3ec   :  { %p3578_p5 = pnand %p3576_p4, %p3573_p3 }
 0x3ee   :  { %3581 = shalt.err (!%p3578_p5)
}
 0x3ef   :  { %2368 = dma.vmem_to_hbm [thread:$0]  %s2366_s27, 1024, %s3773_s5, [#allocation4]  }
 0x3f0   :  { %3588 = dma.done.wait [#allocation4], 1024  }
 0x3f1   :  { %3589 = vsyncadd [#allocation4], 4294966272 }
 0x3f2   :  { %2372 = vsyncpa [#allocation3], 1 }
 0x3f3   :  { %2373 = vsyncpa [#allocation6], 1 }
 0x3f4   :  { %2374 = vsyncpa [#allocation9], 1 }
 0x3f5   :  { %2375 = vsyncpa [#allocation4], 1 }

</bundles_post_ra>
